<compile_context>
chip_gen: v7x
topology: tpu7x:2x2x1
jax: 0.10.0
libtpu: 0.0.40
codegen_flags: <defaults>
</compile_context>

<pallas_src>
from functools import partial

import jax
import jax.numpy as jnp
from jax.experimental import pallas as pl
from jax.experimental.pallas import tpu as pltpu


# ----------------------------------------------------------------------------
# Fused Pallas kernel: conv3x3+ReLU -> conv3x3+ReLU -> GAP -> fused heads
# ----------------------------------------------------------------------------
def _fused_aux_kernel(x_ref, w1_ref, b1_ref, w2_ref, b2_ref, wh_ref, bh_ref,
                      out_ref, ybuf_ref, *, H, W):
    # x_ref : (1, HW + 2*(W+1), Cin)  flattened-spatial input with zero row halo
    # w*_ref: (9, Cin/C, C)           per-tap weight slabs, tap t = dy*3 + dx
    # wh_ref: (C, n_style + n_comp)   fused head weight;  bh_ref: (1, NH)
    # out_ref: (1, 1, NH)             fused logits for this batch element
    # ybuf_ref: (HW + 2*(W+1), C)     VMEM staging buffer for y1 (with halo)
    HW = H * W

    # Per-row horizontal-validity masks (shared by both convs): a tap with
    # dx==0 reads column w-1 (invalid at w==0); dx==2 reads w+1 (invalid at
    # w==W-1). Vertical out-of-range reads land in the zero halo rows.
    w_idx = jax.lax.broadcasted_iota(jnp.int32, (HW, 1), 0) % W
    not_left = w_idx != 0
    not_right = w_idx != (W - 1)

    def conv3x3(load_patch, w_ref, b_ref):
        acc = None
        for t in range(9):
            dy, dx = divmod(t, 3)
            patch = load_patch(dy * W + dx)          # (HW, Cin) contiguous rows
            if dx == 0:
                patch = jnp.where(not_left, patch, jnp.zeros_like(patch))
            elif dx == 2:
                patch = jnp.where(not_right, patch, jnp.zeros_like(patch))
            c = jnp.dot(patch, w_ref[t], preferred_element_type=jnp.float32)
            acc = c if acc is None else acc + c
        # bias + ReLU in f32 (v5e-safe even when the MXU path is bf16)
        return jnp.maximum(acc + b_ref[...], 0.0)    # (HW, C) f32

    # ---- layer 0: Conv3x3 + ReLU -------------------------------------------
    y1 = conv3x3(lambda s: x_ref[0, s:s + HW, :], w1_ref, b1_ref)

    # Stage y1 (with zero halo) in VMEM for conv2 — never touches HBM.
    ybuf_ref[...] = jnp.zeros_like(ybuf_ref)
    ybuf_ref[W + 1:W + 1 + HW, :] = y1.astype(ybuf_ref.dtype)

    # ---- layer 1: Conv3x3 + ReLU -------------------------------------------
    y2 = conv3x3(lambda s: ybuf_ref[s:s + HW, :], w2_ref, b2_ref)

    # ---- layer 2: GAP + Flatten, then the fused (style|comp) heads ----------
    feat = jnp.sum(y2, axis=0, keepdims=True) * (1.0 / HW)       # (1, C) f32
    logits = jnp.dot(feat.astype(wh_ref.dtype), wh_ref[...],
                     preferred_element_type=jnp.float32) + bh_ref[...]
    out_ref[0] = logits.astype(out_ref.dtype)


# ----------------------------------------------------------------------------
# Wrapper
# ----------------------------------------------------------------------------
def aux_classifier_forward(x_nchw, params, *, n_style,
                           compute_dtype=jnp.float32):
    """Forward pass; returns (logit_style, logit_comp)."""
    x = jnp.transpose(x_nchw, (0, 2, 3, 1))          # NCHW -> NHWC
    B, H, W, Cin = x.shape
    C = params["w1"].shape[-1]
    HW = H * W
    R = HW + 2 * (W + 1)                             # rows incl. zero halo

    # Flatten spatial and add a (W+1)-row zero halo so every 3x3 tap becomes a
    # contiguous row-slice inside the kernel (no HBM im2col materialization).
    x_flat = x.reshape(B, HW, Cin).astype(compute_dtype)
    x_pad = jnp.pad(x_flat, ((0, 0), (W + 1, W + 1), (0, 0)))

    # MXU operands optionally bf16 (v6e/v7x); biases stay f32 for the epilogue.
    w1 = params["w1"].astype(compute_dtype)
    w2 = params["w2"].astype(compute_dtype)
    wh = jnp.concatenate([params["ws"], params["wc"]], axis=1).astype(compute_dtype)
    b1 = params["b1"].astype(jnp.float32)
    b2 = params["b2"].astype(jnp.float32)
    bh = jnp.concatenate([params["bs"], params["bc"]],
                         axis=1).astype(jnp.float32)
    NH = wh.shape[1]

    itemsize = jnp.dtype(compute_dtype).itemsize
    flops = B * (2 * HW * 9 * Cin * C + 2 * HW * 9 * C * C + 2 * C * NH)
    bytes_accessed = (x_pad.size * itemsize
                      + (w1.size + w2.size + wh.size) * itemsize
                      + (b1.size + b2.size + bh.size) * 4
                      + B * NH * 4)

    out = pl.pallas_call(
        partial(_fused_aux_kernel, H=H, W=W),
        out_shape=jax.ShapeDtypeStruct((B, 1, NH), jnp.float32),
        grid_spec=pltpu.PrefetchScalarGridSpec(
            num_scalar_prefetch=0,
            grid=(B,),
            in_specs=[
                pl.BlockSpec((1, R, Cin), lambda b: (b, 0, 0)),
                pl.BlockSpec((9, Cin, C), lambda b: (0, 0, 0)),
                pl.BlockSpec((1, C), lambda b: (0, 0)),
                pl.BlockSpec((9, C, C), lambda b: (0, 0, 0)),
                pl.BlockSpec((1, C), lambda b: (0, 0)),
                pl.BlockSpec((C, NH), lambda b: (0, 0)),
                pl.BlockSpec((1, NH), lambda b: (0, 0)),
            ],
            out_specs=pl.BlockSpec((1, 1, NH), lambda b: (b, 0, 0)),
            scratch_shapes=[pltpu.VMEM((R, C), compute_dtype)],
        ),
        compiler_params=pltpu.CompilerParams(
            dimension_semantics=("parallel",),          # 2 TCs on v7x
            vmem_limit_bytes=32 * 1024 * 1024,          # safe on v5e/v6e/v7x
        ),
        cost_estimate=pl.CostEstimate(flops=flops, transcendentals=0,
                                      bytes_accessed=bytes_accessed),
    )(x_pad, w1, b1, w2, b2, wh, bh)

    logits = out.reshape(B, NH)
    return logits[:, :n_style], logits[:, n_style:]


# ----------------------------------------------------------------------------
# Parameter setup (PyTorch-style init, conv weights stored as (9, Cin, Cout))
# ----------------------------------------------------------------------------
def init_params(key, c_in, c_mid, n_style, n_comp):
    ks = jax.random.split(key, 8)

    def u(k, shape, fan_in):
        bound = 1.0 / jnp.sqrt(jnp.float32(fan_in))
        return jax.random.uniform(k, shape, jnp.float32, -bound, bound)

    # Conv weights generated in PyTorch layout (Cout, Cin, 3, 3), then stored
    # as per-tap slabs (kh*kw, Cin, Cout) via transpose(2,3,1,0).
    w1_t = u(ks[0], (c_mid, c_in, 3, 3), c_in * 9)
    w2_t = u(ks[1], (c_mid, c_mid, 3, 3), c_mid * 9)
    return {
        "w1": jnp.transpose(w1_t, (2, 3, 1, 0)).reshape(9, c_in, c_mid),
        "b1": u(ks[2], (1, c_mid), c_in * 9),
        "w2": jnp.transpose(w2_t, (2, 3, 1, 0)).reshape(9, c_mid, c_mid),
        "b2": u(ks[3], (1, c_mid), c_mid * 9),
        "ws": u(ks[4], (c_mid, n_style), c_mid),   # linear heads, (Cin, Cout)
        "bs": u(ks[5], (1, n_style), c_mid),
        "wc": u(ks[6], (c_mid, n_comp), c_mid),
        "bc": u(ks[7], (1, n_comp), c_mid),
    }


# ----------------------------------------------------------------------------
# Pure-JAX reference (independent im2col formulation) for the sanity check
# ----------------------------------------------------------------------------
def im2col_3x3(x_nhwc):
    B, H, W, C = x_nhwc.shape
    xp = jnp.pad(x_nhwc, ((0, 0), (1, 1), (1, 1), (0, 0)))
    cols = []
    for dy in range(3):
        for dx in range(3):
            cols.append(xp[:, dy:dy + H, dx:dx + W, :])
    return jnp.concatenate(cols, axis=-1)


def reference_forward(x_nchw, params):
    x = jnp.transpose(x_nchw, (0, 2, 3, 1))
    B, H, W, Cin = x.shape
    C = params["w1"].shape[-1]
    p1 = im2col_3x3(x).reshape(B * H * W, 9 * Cin)
    y1 = jnp.maximum(p1 @ params["w1"].reshape(9 * Cin, C) + params["b1"], 0.0)
    y1 = y1.reshape(B, H, W, C)
    p2 = im2col_3x3(y1).reshape(B * H * W, 9 * C)
    y2 = jnp.maximum(p2 @ params["w2"].reshape(9 * C, C) + params["b2"], 0.0)
    feat = jnp.mean(y2.reshape(B, H * W, C), axis=1)
    return feat @ params["ws"] + params["bs"], feat @ params["wc"] + params["bc"]


if __name__ == "__main__":
    B, C_in, H, W = 2, 4, 16, 16
    C_mid, n_style, n_comp = 32, 8, 16

    key = jax.random.PRNGKey(0)
    kx, kp = jax.random.split(key)
    x = jax.random.normal(kx, (B, C_in, H, W), jnp.float32)   # PyTorch NCHW
    params = init_params(kp, C_in, C_mid, n_style, n_comp)

    fwd = jax.jit(aux_classifier_forward,
                  static_argnames=("n_style", "compute_dtype"))

    # f32 path (tight tolerance per review).
    logit_s, logit_c = fwd(x, params, n_style=n_style)
    jax.block_until_ready((logit_s, logit_c))
    ref_s, ref_c = reference_forward(x, params)
    assert logit_s.shape == (B, n_style) and logit_c.shape == (B, n_comp)
    assert jnp.allclose(logit_s, ref_s, rtol=1e-4, atol=1e-5)
    assert jnp.allclose(logit_c, ref_c, rtol=1e-4, atol=1e-5)

    # bf16 storage / MXU path (v6e/v7x perf option; f32 accumulation inside).
    bf_s, bf_c = fwd(x, params, n_style=n_style, compute_dtype=jnp.bfloat16)
    jax.block_until_ready((bf_s, bf_c))
    assert jnp.allclose(bf_s, ref_s, rtol=1e-1, atol=1e-1)
    assert jnp.allclose(bf_c, ref_c, rtol=1e-1, atol=1e-1)

    print("KERNEL_OK")
</pallas_src>

<mosaic_0001>
module attributes {stable_mosaic.version = 11 : i64} {
  func.func @_fused_aux_kernel(%arg0: i32, %arg1: memref<1x290x4xf32, #tpu.memory_space<vmem>>, %arg2: memref<9x4x32xf32, #tpu.memory_space<vmem>>, %arg3: memref<1x32xf32, #tpu.memory_space<vmem>>, %arg4: memref<9x32x32xf32, #tpu.memory_space<vmem>>, %arg5: memref<1x32xf32, #tpu.memory_space<vmem>>, %arg6: memref<32x24xf32, #tpu.memory_space<vmem>>, %arg7: memref<1x24xf32, #tpu.memory_space<vmem>>, %arg8: memref<1x1x24xf32, #tpu.memory_space<vmem>>, %arg9: memref<290x32xf32, #tpu.memory_space<vmem>>) attributes {dimension_semantics = [#tpu.dimension_semantics<parallel>], iteration_bounds = array<i64: 2>, scalar_prefetch = 0 : i64, scratch_operands = 1 : i64, tpu.core_type = #tpu.core_type<tc>, window_params = [{transform_indices = @transform_0, window_bounds = array<i64: 1, 290, 4>}, {pipeline_mode = #tpu.pipeline_mode<synchronous>, transform_indices = @transform_1, window_bounds = array<i64: 9, 4, 32>}, {pipeline_mode = #tpu.pipeline_mode<synchronous>, transform_indices = @transform_2, window_bounds = array<i64: 1, 32>}, {pipeline_mode = #tpu.pipeline_mode<synchronous>, transform_indices = @transform_3, window_bounds = array<i64: 9, 32, 32>}, {pipeline_mode = #tpu.pipeline_mode<synchronous>, transform_indices = @transform_4, window_bounds = array<i64: 1, 32>}, {pipeline_mode = #tpu.pipeline_mode<synchronous>, transform_indices = @transform_5, window_bounds = array<i64: 32, 24>}, {pipeline_mode = #tpu.pipeline_mode<synchronous>, transform_indices = @transform_6, window_bounds = array<i64: 1, 24>}, {transform_indices = @transform_7, window_bounds = array<i64: 1, 1, 24>}]} {
    %0 = tpu.iota {dimensions = array<i32: 0>} : vector<256x1xi32>
    %c16_i32 = arith.constant 16 : i32
    %c0_i32 = arith.constant 0 : i32
    %1 = arith.cmpi eq, %c16_i32, %c0_i32 : i32
    %c1_i32 = arith.constant 1 : i32
    %2 = arith.select %1, %c1_i32, %c16_i32 : i32
    %3 = vector.broadcast %2 : i32 to vector<256x1xi32>
    %4 = arith.remsi %0, %3 : vector<256x1xi32>
    %c0_i32_0 = arith.constant 0 : i32
    %5 = vector.broadcast %c0_i32_0 : i32 to vector<256x1xi32>
    %6 = arith.cmpi ne, %4, %5 : vector<256x1xi32>
    %c0_i32_1 = arith.constant 0 : i32
    %7 = vector.broadcast %c0_i32_1 : i32 to vector<256x1xi32>
    %8 = arith.cmpi slt, %4, %7 : vector<256x1xi32>
    %c0_i32_2 = arith.constant 0 : i32
    %9 = arith.cmpi slt, %2, %c0_i32_2 : i32
    %10 = vector.broadcast %9 : i1 to vector<256x1xi1>
    %11 = vector.broadcast %10 : vector<256x1xi1> to vector<256x1xi1>
    %12 = arith.xori %8, %11 : vector<256x1xi1>
    %13 = arith.andi %12, %6 : vector<256x1xi1>
    %14 = vector.broadcast %2 : i32 to vector<256x1xi32>
    %15 = arith.addi %4, %14 : vector<256x1xi32>
    %16 = arith.select %13, %15, %4 : vector<256x1xi1>, vector<256x1xi32>
    %c0_i32_3 = arith.constant 0 : i32
    %17 = vector.broadcast %c0_i32_3 : i32 to vector<256x1xi32>
    %18 = arith.cmpi ne, %16, %17 : vector<256x1xi32>
    %c15_i32 = arith.constant 15 : i32
    %19 = vector.broadcast %c15_i32 : i32 to vector<256x1xi32>
    %20 = arith.cmpi ne, %16, %19 : vector<256x1xi32>
    %c0 = arith.constant 0 : index
    %c0_4 = arith.constant 0 : index
    %c0_5 = arith.constant 0 : index
    %21 = vector.load %arg1[%c0, %c0_4, %c0_5] : memref<1x290x4xf32, #tpu.memory_space<vmem>>, vector<1x256x4xf32>
    %22 = vector.shape_cast %21 : vector<1x256x4xf32> to vector<256x4xf32>
    %cst = arith.constant 0.000000e+00 : f32
    %23 = vector.broadcast %cst : f32 to vector<256x4xf32>
    %24 = vector.shape_cast %18 : vector<256x1xi1> to vector<256x1xi1>
    %25 = vector.broadcast %24 : vector<256x1xi1> to vector<256x4xi1>
    %26 = arith.select %25, %22, %23 : vector<256x4xi1>, vector<256x4xf32>
    %c0_6 = arith.constant 0 : index
    %c0_7 = arith.constant 0 : index
    %c0_8 = arith.constant 0 : index
    %27 = vector.load %arg2[%c0_6, %c0_7, %c0_8] : memref<9x4x32xf32, #tpu.memory_space<vmem>>, vector<1x4x32xf32>
    %28 = vector.shape_cast %27 : vector<1x4x32xf32> to vector<4x32xf32>
    %cst_9 = arith.constant dense<0.000000e+00> : vector<256x32xf32>
    %29 = tpu.matmul %26, %28, %cst_9 {dimension_numbers = #tpu.dot_dimension_numbers<[1], [0], [0], [1], [0, 0, 1, 1], [], []>} : vector<256x4xf32>, vector<4x32xf32>, vector<256x32xf32> -> vector<256x32xf32>
    %c0_10 = arith.constant 0 : index
    %c1 = arith.constant 1 : index
    %c0_11 = arith.constant 0 : index
    %30 = vector.load %arg1[%c0_10, %c1, %c0_11] : memref<1x290x4xf32, #tpu.memory_space<vmem>>, vector<1x256x4xf32>
    %31 = vector.shape_cast %30 : vector<1x256x4xf32> to vector<256x4xf32>
    %c1_12 = arith.constant 1 : index
    %c0_13 = arith.constant 0 : index
    %c0_14 = arith.constant 0 : index
    %32 = vector.load %arg2[%c1_12, %c0_13, %c0_14] : memref<9x4x32xf32, #tpu.memory_space<vmem>>, vector<1x4x32xf32>
    %33 = vector.shape_cast %32 : vector<1x4x32xf32> to vector<4x32xf32>
    %cst_15 = arith.constant dense<0.000000e+00> : vector<256x32xf32>
    %34 = tpu.matmul %31, %33, %cst_15 {dimension_numbers = #tpu.dot_dimension_numbers<[1], [0], [0], [1], [0, 0, 1, 1], [], []>} : vector<256x4xf32>, vector<4x32xf32>, vector<256x32xf32> -> vector<256x32xf32>
    %35 = arith.addf %29, %34 : vector<256x32xf32>
    %c0_16 = arith.constant 0 : index
    %c2 = arith.constant 2 : index
    %c0_17 = arith.constant 0 : index
    %36 = vector.load %arg1[%c0_16, %c2, %c0_17] : memref<1x290x4xf32, #tpu.memory_space<vmem>>, vector<1x256x4xf32>
    %37 = vector.shape_cast %36 : vector<1x256x4xf32> to vector<256x4xf32>
    %cst_18 = arith.constant 0.000000e+00 : f32
    %38 = vector.broadcast %cst_18 : f32 to vector<256x4xf32>
    %39 = vector.shape_cast %20 : vector<256x1xi1> to vector<256x1xi1>
    %40 = vector.broadcast %39 : vector<256x1xi1> to vector<256x4xi1>
    %41 = arith.select %40, %37, %38 : vector<256x4xi1>, vector<256x4xf32>
    %c2_19 = arith.constant 2 : index
    %c0_20 = arith.constant 0 : index
    %c0_21 = arith.constant 0 : index
    %42 = vector.load %arg2[%c2_19, %c0_20, %c0_21] : memref<9x4x32xf32, #tpu.memory_space<vmem>>, vector<1x4x32xf32>
    %43 = vector.shape_cast %42 : vector<1x4x32xf32> to vector<4x32xf32>
    %cst_22 = arith.constant dense<0.000000e+00> : vector<256x32xf32>
    %44 = tpu.matmul %41, %43, %cst_22 {dimension_numbers = #tpu.dot_dimension_numbers<[1], [0], [0], [1], [0, 0, 1, 1], [], []>} : vector<256x4xf32>, vector<4x32xf32>, vector<256x32xf32> -> vector<256x32xf32>
    %45 = arith.addf %35, %44 : vector<256x32xf32>
    %c0_23 = arith.constant 0 : index
    %c16 = arith.constant 16 : index
    %c0_24 = arith.constant 0 : index
    %46 = vector.load %arg1[%c0_23, %c16, %c0_24] : memref<1x290x4xf32, #tpu.memory_space<vmem>>, vector<1x256x4xf32>
    %47 = vector.shape_cast %46 : vector<1x256x4xf32> to vector<256x4xf32>
    %cst_25 = arith.constant 0.000000e+00 : f32
    %48 = vector.broadcast %cst_25 : f32 to vector<256x4xf32>
    %49 = vector.shape_cast %18 : vector<256x1xi1> to vector<256x1xi1>
    %50 = vector.broadcast %49 : vector<256x1xi1> to vector<256x4xi1>
    %51 = arith.select %50, %47, %48 : vector<256x4xi1>, vector<256x4xf32>
    %c3 = arith.constant 3 : index
    %c0_26 = arith.constant 0 : index
    %c0_27 = arith.constant 0 : index
    %52 = vector.load %arg2[%c3, %c0_26, %c0_27] : memref<9x4x32xf32, #tpu.memory_space<vmem>>, vector<1x4x32xf32>
    %53 = vector.shape_cast %52 : vector<1x4x32xf32> to vector<4x32xf32>
    %cst_28 = arith.constant dense<0.000000e+00> : vector<256x32xf32>
    %54 = tpu.matmul %51, %53, %cst_28 {dimension_numbers = #tpu.dot_dimension_numbers<[1], [0], [0], [1], [0, 0, 1, 1], [], []>} : vector<256x4xf32>, vector<4x32xf32>, vector<256x32xf32> -> vector<256x32xf32>
    %55 = arith.addf %45, %54 : vector<256x32xf32>
    %c0_29 = arith.constant 0 : index
    %c17 = arith.constant 17 : index
    %c0_30 = arith.constant 0 : index
    %56 = vector.load %arg1[%c0_29, %c17, %c0_30] : memref<1x290x4xf32, #tpu.memory_space<vmem>>, vector<1x256x4xf32>
    %57 = vector.shape_cast %56 : vector<1x256x4xf32> to vector<256x4xf32>
    %c4 = arith.constant 4 : index
    %c0_31 = arith.constant 0 : index
    %c0_32 = arith.constant 0 : index
    %58 = vector.load %arg2[%c4, %c0_31, %c0_32] : memref<9x4x32xf32, #tpu.memory_space<vmem>>, vector<1x4x32xf32>
    %59 = vector.shape_cast %58 : vector<1x4x32xf32> to vector<4x32xf32>
    %cst_33 = arith.constant dense<0.000000e+00> : vector<256x32xf32>
    %60 = tpu.matmul %57, %59, %cst_33 {dimension_numbers = #tpu.dot_dimension_numbers<[1], [0], [0], [1], [0, 0, 1, 1], [], []>} : vector<256x4xf32>, vector<4x32xf32>, vector<256x32xf32> -> vector<256x32xf32>
    %61 = arith.addf %55, %60 : vector<256x32xf32>
    %c0_34 = arith.constant 0 : index
    %c18 = arith.constant 18 : index
    %c0_35 = arith.constant 0 : index
    %62 = vector.load %arg1[%c0_34, %c18, %c0_35] : memref<1x290x4xf32, #tpu.memory_space<vmem>>, vector<1x256x4xf32>
    %63 = vector.shape_cast %62 : vector<1x256x4xf32> to vector<256x4xf32>
    %cst_36 = arith.constant 0.000000e+00 : f32
    %64 = vector.broadcast %cst_36 : f32 to vector<256x4xf32>
    %65 = vector.shape_cast %20 : vector<256x1xi1> to vector<256x1xi1>
    %66 = vector.broadcast %65 : vector<256x1xi1> to vector<256x4xi1>
    %67 = arith.select %66, %63, %64 : vector<256x4xi1>, vector<256x4xf32>
    %c5 = arith.constant 5 : index
    %c0_37 = arith.constant 0 : index
    %c0_38 = arith.constant 0 : index
    %68 = vector.load %arg2[%c5, %c0_37, %c0_38] : memref<9x4x32xf32, #tpu.memory_space<vmem>>, vector<1x4x32xf32>
    %69 = vector.shape_cast %68 : vector<1x4x32xf32> to vector<4x32xf32>
    %cst_39 = arith.constant dense<0.000000e+00> : vector<256x32xf32>
    %70 = tpu.matmul %67, %69, %cst_39 {dimension_numbers = #tpu.dot_dimension_numbers<[1], [0], [0], [1], [0, 0, 1, 1], [], []>} : vector<256x4xf32>, vector<4x32xf32>, vector<256x32xf32> -> vector<256x32xf32>
    %71 = arith.addf %61, %70 : vector<256x32xf32>
    %c0_40 = arith.constant 0 : index
    %c32 = arith.constant 32 : index
    %c0_41 = arith.constant 0 : index
    %72 = vector.load %arg1[%c0_40, %c32, %c0_41] : memref<1x290x4xf32, #tpu.memory_space<vmem>>, vector<1x256x4xf32>
    %73 = vector.shape_cast %72 : vector<1x256x4xf32> to vector<256x4xf32>
    %cst_42 = arith.constant 0.000000e+00 : f32
    %74 = vector.broadcast %cst_42 : f32 to vector<256x4xf32>
    %75 = vector.shape_cast %18 : vector<256x1xi1> to vector<256x1xi1>
    %76 = vector.broadcast %75 : vector<256x1xi1> to vector<256x4xi1>
    %77 = arith.select %76, %73, %74 : vector<256x4xi1>, vector<256x4xf32>
    %c6 = arith.constant 6 : index
    %c0_43 = arith.constant 0 : index
    %c0_44 = arith.constant 0 : index
    %78 = vector.load %arg2[%c6, %c0_43, %c0_44] : memref<9x4x32xf32, #tpu.memory_space<vmem>>, vector<1x4x32xf32>
    %79 = vector.shape_cast %78 : vector<1x4x32xf32> to vector<4x32xf32>
    %cst_45 = arith.constant dense<0.000000e+00> : vector<256x32xf32>
    %80 = tpu.matmul %77, %79, %cst_45 {dimension_numbers = #tpu.dot_dimension_numbers<[1], [0], [0], [1], [0, 0, 1, 1], [], []>} : vector<256x4xf32>, vector<4x32xf32>, vector<256x32xf32> -> vector<256x32xf32>
    %81 = arith.addf %71, %80 : vector<256x32xf32>
    %c0_46 = arith.constant 0 : index
    %c33 = arith.constant 33 : index
    %c0_47 = arith.constant 0 : index
    %82 = vector.load %arg1[%c0_46, %c33, %c0_47] : memref<1x290x4xf32, #tpu.memory_space<vmem>>, vector<1x256x4xf32>
    %83 = vector.shape_cast %82 : vector<1x256x4xf32> to vector<256x4xf32>
    %c7 = arith.constant 7 : index
    %c0_48 = arith.constant 0 : index
    %c0_49 = arith.constant 0 : index
    %84 = vector.load %arg2[%c7, %c0_48, %c0_49] : memref<9x4x32xf32, #tpu.memory_space<vmem>>, vector<1x4x32xf32>
    %85 = vector.shape_cast %84 : vector<1x4x32xf32> to vector<4x32xf32>
    %cst_50 = arith.constant dense<0.000000e+00> : vector<256x32xf32>
    %86 = tpu.matmul %83, %85, %cst_50 {dimension_numbers = #tpu.dot_dimension_numbers<[1], [0], [0], [1], [0, 0, 1, 1], [], []>} : vector<256x4xf32>, vector<4x32xf32>, vector<256x32xf32> -> vector<256x32xf32>
    %87 = arith.addf %81, %86 : vector<256x32xf32>
    %c0_51 = arith.constant 0 : index
    %c34 = arith.constant 34 : index
    %c0_52 = arith.constant 0 : index
    %88 = vector.load %arg1[%c0_51, %c34, %c0_52] : memref<1x290x4xf32, #tpu.memory_space<vmem>>, vector<1x256x4xf32>
    %89 = vector.shape_cast %88 : vector<1x256x4xf32> to vector<256x4xf32>
    %cst_53 = arith.constant 0.000000e+00 : f32
    %90 = vector.broadcast %cst_53 : f32 to vector<256x4xf32>
    %91 = vector.shape_cast %20 : vector<256x1xi1> to vector<256x1xi1>
    %92 = vector.broadcast %91 : vector<256x1xi1> to vector<256x4xi1>
    %93 = arith.select %92, %89, %90 : vector<256x4xi1>, vector<256x4xf32>
    %c8 = arith.constant 8 : index
    %c0_54 = arith.constant 0 : index
    %c0_55 = arith.constant 0 : index
    %94 = vector.load %arg2[%c8, %c0_54, %c0_55] : memref<9x4x32xf32, #tpu.memory_space<vmem>>, vector<1x4x32xf32>
    %95 = vector.shape_cast %94 : vector<1x4x32xf32> to vector<4x32xf32>
    %cst_56 = arith.constant dense<0.000000e+00> : vector<256x32xf32>
    %96 = tpu.matmul %93, %95, %cst_56 {dimension_numbers = #tpu.dot_dimension_numbers<[1], [0], [0], [1], [0, 0, 1, 1], [], []>} : vector<256x4xf32>, vector<4x32xf32>, vector<256x32xf32> -> vector<256x32xf32>
    %97 = arith.addf %87, %96 : vector<256x32xf32>
    %c0_57 = arith.constant 0 : index
    %c0_58 = arith.constant 0 : index
    %98 = vector.load %arg3[%c0_57, %c0_58] : memref<1x32xf32, #tpu.memory_space<vmem>>, vector<1x32xf32>
    %99 = vector.broadcast %98 : vector<1x32xf32> to vector<256x32xf32>
    %100 = arith.addf %97, %99 : vector<256x32xf32>
    %cst_59 = arith.constant 0.000000e+00 : f32
    %101 = vector.broadcast %cst_59 : f32 to vector<256x32xf32>
    %102 = arith.maximumf %100, %101 : vector<256x32xf32>
    %cst_60 = arith.constant 0.000000e+00 : f32
    %103 = vector.broadcast %cst_60 : f32 to vector<290x32xf32>
    %c0_61 = arith.constant 0 : index
    %c0_62 = arith.constant 0 : index
    %104 = vector.load %arg9[%c0_61, %c0_62] : memref<290x32xf32, #tpu.memory_space<vmem>>, vector<290x32xf32>
    tpu.vector_store %arg9[%c0_61, %c0_62], %103 {strides = array<i32>} : memref<290x32xf32, #tpu.memory_space<vmem>>, vector<290x32xf32>,
    %c17_63 = arith.constant 17 : index
    %c0_64 = arith.constant 0 : index
    %105 = vector.load %arg9[%c17_63, %c0_64] : memref<290x32xf32, #tpu.memory_space<vmem>>, vector<256x32xf32>
    tpu.vector_store %arg9[%c17_63, %c0_64], %102 {strides = array<i32>} : memref<290x32xf32, #tpu.memory_space<vmem>>, vector<256x32xf32>,
    %c0_65 = arith.constant 0 : index
    %c0_66 = arith.constant 0 : index
    %106 = vector.load %arg9[%c0_65, %c0_66] : memref<290x32xf32, #tpu.memory_space<vmem>>, vector<256x32xf32>
    %cst_67 = arith.constant 0.000000e+00 : f32
    %107 = vector.broadcast %cst_67 : f32 to vector<256x32xf32>
    %108 = vector.shape_cast %18 : vector<256x1xi1> to vector<256x1xi1>
    %109 = vector.broadcast %108 : vector<256x1xi1> to vector<256x32xi1>
    %110 = arith.select %109, %106, %107 : vector<256x32xi1>, vector<256x32xf32>
    %c0_68 = arith.constant 0 : index
    %c0_69 = arith.constant 0 : index
    %c0_70 = arith.constant 0 : index
    %111 = vector.load %arg4[%c0_68, %c0_69, %c0_70] : memref<9x32x32xf32, #tpu.memory_space<vmem>>, vector<1x32x32xf32>
    %112 = vector.shape_cast %111 : vector<1x32x32xf32> to vector<32x32xf32>
    %cst_71 = arith.constant dense<0.000000e+00> : vector<256x32xf32>
    %113 = tpu.matmul %110, %112, %cst_71 {dimension_numbers = #tpu.dot_dimension_numbers<[1], [0], [0], [1], [0, 0, 1, 1], [], []>} : vector<256x32xf32>, vector<32x32xf32>, vector<256x32xf32> -> vector<256x32xf32>
    %c1_72 = arith.constant 1 : index
    %c0_73 = arith.constant 0 : index
    %114 = vector.load %arg9[%c1_72, %c0_73] : memref<290x32xf32, #tpu.memory_space<vmem>>, vector<256x32xf32>
    %c1_74 = arith.constant 1 : index
    %c0_75 = arith.constant 0 : index
    %c0_76 = arith.constant 0 : index
    %115 = vector.load %arg4[%c1_74, %c0_75, %c0_76] : memref<9x32x32xf32, #tpu.memory_space<vmem>>, vector<1x32x32xf32>
    %116 = vector.shape_cast %115 : vector<1x32x32xf32> to vector<32x32xf32>
    %cst_77 = arith.constant dense<0.000000e+00> : vector<256x32xf32>
    %117 = tpu.matmul %114, %116, %cst_77 {dimension_numbers = #tpu.dot_dimension_numbers<[1], [0], [0], [1], [0, 0, 1, 1], [], []>} : vector<256x32xf32>, vector<32x32xf32>, vector<256x32xf32> -> vector<256x32xf32>
    %118 = arith.addf %113, %117 : vector<256x32xf32>
    %c2_78 = arith.constant 2 : index
    %c0_79 = arith.constant 0 : index
    %119 = vector.load %arg9[%c2_78, %c0_79] : memref<290x32xf32, #tpu.memory_space<vmem>>, vector<256x32xf32>
    %cst_80 = arith.constant 0.000000e+00 : f32
    %120 = vector.broadcast %cst_80 : f32 to vector<256x32xf32>
    %121 = vector.shape_cast %20 : vector<256x1xi1> to vector<256x1xi1>
    %122 = vector.broadcast %121 : vector<256x1xi1> to vector<256x32xi1>
    %123 = arith.select %122, %119, %120 : vector<256x32xi1>, vector<256x32xf32>
    %c2_81 = arith.constant 2 : index
    %c0_82 = arith.constant 0 : index
    %c0_83 = arith.constant 0 : index
    %124 = vector.load %arg4[%c2_81, %c0_82, %c0_83] : memref<9x32x32xf32, #tpu.memory_space<vmem>>, vector<1x32x32xf32>
    %125 = vector.shape_cast %124 : vector<1x32x32xf32> to vector<32x32xf32>
    %cst_84 = arith.constant dense<0.000000e+00> : vector<256x32xf32>
    %126 = tpu.matmul %123, %125, %cst_84 {dimension_numbers = #tpu.dot_dimension_numbers<[1], [0], [0], [1], [0, 0, 1, 1], [], []>} : vector<256x32xf32>, vector<32x32xf32>, vector<256x32xf32> -> vector<256x32xf32>
    %127 = arith.addf %118, %126 : vector<256x32xf32>
    %c16_85 = arith.constant 16 : index
    %c0_86 = arith.constant 0 : index
    %128 = vector.load %arg9[%c16_85, %c0_86] : memref<290x32xf32, #tpu.memory_space<vmem>>, vector<256x32xf32>
    %cst_87 = arith.constant 0.000000e+00 : f32
    %129 = vector.broadcast %cst_87 : f32 to vector<256x32xf32>
    %130 = vector.shape_cast %18 : vector<256x1xi1> to vector<256x1xi1>
    %131 = vector.broadcast %130 : vector<256x1xi1> to vector<256x32xi1>
    %132 = arith.select %131, %128, %129 : vector<256x32xi1>, vector<256x32xf32>
    %c3_88 = arith.constant 3 : index
    %c0_89 = arith.constant 0 : index
    %c0_90 = arith.constant 0 : index
    %133 = vector.load %arg4[%c3_88, %c0_89, %c0_90] : memref<9x32x32xf32, #tpu.memory_space<vmem>>, vector<1x32x32xf32>
    %134 = vector.shape_cast %133 : vector<1x32x32xf32> to vector<32x32xf32>
    %cst_91 = arith.constant dense<0.000000e+00> : vector<256x32xf32>
    %135 = tpu.matmul %132, %134, %cst_91 {dimension_numbers = #tpu.dot_dimension_numbers<[1], [0], [0], [1], [0, 0, 1, 1], [], []>} : vector<256x32xf32>, vector<32x32xf32>, vector<256x32xf32> -> vector<256x32xf32>
    %136 = arith.addf %127, %135 : vector<256x32xf32>
    %c17_92 = arith.constant 17 : index
    %c0_93 = arith.constant 0 : index
    %137 = vector.load %arg9[%c17_92, %c0_93] : memref<290x32xf32, #tpu.memory_space<vmem>>, vector<256x32xf32>
    %c4_94 = arith.constant 4 : index
    %c0_95 = arith.constant 0 : index
    %c0_96 = arith.constant 0 : index
    %138 = vector.load %arg4[%c4_94, %c0_95, %c0_96] : memref<9x32x32xf32, #tpu.memory_space<vmem>>, vector<1x32x32xf32>
    %139 = vector.shape_cast %138 : vector<1x32x32xf32> to vector<32x32xf32>
    %cst_97 = arith.constant dense<0.000000e+00> : vector<256x32xf32>
    %140 = tpu.matmul %137, %139, %cst_97 {dimension_numbers = #tpu.dot_dimension_numbers<[1], [0], [0], [1], [0, 0, 1, 1], [], []>} : vector<256x32xf32>, vector<32x32xf32>, vector<256x32xf32> -> vector<256x32xf32>
    %141 = arith.addf %136, %140 : vector<256x32xf32>
    %c18_98 = arith.constant 18 : index
    %c0_99 = arith.constant 0 : index
    %142 = vector.load %arg9[%c18_98, %c0_99] : memref<290x32xf32, #tpu.memory_space<vmem>>, vector<256x32xf32>
    %cst_100 = arith.constant 0.000000e+00 : f32
    %143 = vector.broadcast %cst_100 : f32 to vector<256x32xf32>
    %144 = vector.shape_cast %20 : vector<256x1xi1> to vector<256x1xi1>
    %145 = vector.broadcast %144 : vector<256x1xi1> to vector<256x32xi1>
    %146 = arith.select %145, %142, %143 : vector<256x32xi1>, vector<256x32xf32>
    %c5_101 = arith.constant 5 : index
    %c0_102 = arith.constant 0 : index
    %c0_103 = arith.constant 0 : index
    %147 = vector.load %arg4[%c5_101, %c0_102, %c0_103] : memref<9x32x32xf32, #tpu.memory_space<vmem>>, vector<1x32x32xf32>
    %148 = vector.shape_cast %147 : vector<1x32x32xf32> to vector<32x32xf32>
    %cst_104 = arith.constant dense<0.000000e+00> : vector<256x32xf32>
    %149 = tpu.matmul %146, %148, %cst_104 {dimension_numbers = #tpu.dot_dimension_numbers<[1], [0], [0], [1], [0, 0, 1, 1], [], []>} : vector<256x32xf32>, vector<32x32xf32>, vector<256x32xf32> -> vector<256x32xf32>
    %150 = arith.addf %141, %149 : vector<256x32xf32>
    %c32_105 = arith.constant 32 : index
    %c0_106 = arith.constant 0 : index
    %151 = vector.load %arg9[%c32_105, %c0_106] : memref<290x32xf32, #tpu.memory_space<vmem>>, vector<256x32xf32>
    %cst_107 = arith.constant 0.000000e+00 : f32
    %152 = vector.broadcast %cst_107 : f32 to vector<256x32xf32>
    %153 = vector.shape_cast %18 : vector<256x1xi1> to vector<256x1xi1>
    %154 = vector.broadcast %153 : vector<256x1xi1> to vector<256x32xi1>
    %155 = arith.select %154, %151, %152 : vector<256x32xi1>, vector<256x32xf32>
    %c6_108 = arith.constant 6 : index
    %c0_109 = arith.constant 0 : index
    %c0_110 = arith.constant 0 : index
    %156 = vector.load %arg4[%c6_108, %c0_109, %c0_110] : memref<9x32x32xf32, #tpu.memory_space<vmem>>, vector<1x32x32xf32>
    %157 = vector.shape_cast %156 : vector<1x32x32xf32> to vector<32x32xf32>
    %cst_111 = arith.constant dense<0.000000e+00> : vector<256x32xf32>
    %158 = tpu.matmul %155, %157, %cst_111 {dimension_numbers = #tpu.dot_dimension_numbers<[1], [0], [0], [1], [0, 0, 1, 1], [], []>} : vector<256x32xf32>, vector<32x32xf32>, vector<256x32xf32> -> vector<256x32xf32>
    %159 = arith.addf %150, %158 : vector<256x32xf32>
    %c33_112 = arith.constant 33 : index
    %c0_113 = arith.constant 0 : index
    %160 = vector.load %arg9[%c33_112, %c0_113] : memref<290x32xf32, #tpu.memory_space<vmem>>, vector<256x32xf32>
    %c7_114 = arith.constant 7 : index
    %c0_115 = arith.constant 0 : index
    %c0_116 = arith.constant 0 : index
    %161 = vector.load %arg4[%c7_114, %c0_115, %c0_116] : memref<9x32x32xf32, #tpu.memory_space<vmem>>, vector<1x32x32xf32>
    %162 = vector.shape_cast %161 : vector<1x32x32xf32> to vector<32x32xf32>
    %cst_117 = arith.constant dense<0.000000e+00> : vector<256x32xf32>
    %163 = tpu.matmul %160, %162, %cst_117 {dimension_numbers = #tpu.dot_dimension_numbers<[1], [0], [0], [1], [0, 0, 1, 1], [], []>} : vector<256x32xf32>, vector<32x32xf32>, vector<256x32xf32> -> vector<256x32xf32>
    %164 = arith.addf %159, %163 : vector<256x32xf32>
    %c34_118 = arith.constant 34 : index
    %c0_119 = arith.constant 0 : index
    %165 = vector.load %arg9[%c34_118, %c0_119] : memref<290x32xf32, #tpu.memory_space<vmem>>, vector<256x32xf32>
    %cst_120 = arith.constant 0.000000e+00 : f32
    %166 = vector.broadcast %cst_120 : f32 to vector<256x32xf32>
    %167 = vector.shape_cast %20 : vector<256x1xi1> to vector<256x1xi1>
    %168 = vector.broadcast %167 : vector<256x1xi1> to vector<256x32xi1>
    %169 = arith.select %168, %165, %166 : vector<256x32xi1>, vector<256x32xf32>
    %c8_121 = arith.constant 8 : index
    %c0_122 = arith.constant 0 : index
    %c0_123 = arith.constant 0 : index
    %170 = vector.load %arg4[%c8_121, %c0_122, %c0_123] : memref<9x32x32xf32, #tpu.memory_space<vmem>>, vector<1x32x32xf32>
    %171 = vector.shape_cast %170 : vector<1x32x32xf32> to vector<32x32xf32>
    %cst_124 = arith.constant dense<0.000000e+00> : vector<256x32xf32>
    %172 = tpu.matmul %169, %171, %cst_124 {dimension_numbers = #tpu.dot_dimension_numbers<[1], [0], [0], [1], [0, 0, 1, 1], [], []>} : vector<256x32xf32>, vector<32x32xf32>, vector<256x32xf32> -> vector<256x32xf32>
    %173 = arith.addf %164, %172 : vector<256x32xf32>
    %c0_125 = arith.constant 0 : index
    %c0_126 = arith.constant 0 : index
    %174 = vector.load %arg5[%c0_125, %c0_126] : memref<1x32xf32, #tpu.memory_space<vmem>>, vector<1x32xf32>
    %175 = vector.broadcast %174 : vector<1x32xf32> to vector<256x32xf32>
    %176 = arith.addf %173, %175 : vector<256x32xf32>
    %cst_127 = arith.constant 0.000000e+00 : f32
    %177 = vector.broadcast %cst_127 : f32 to vector<256x32xf32>
    %178 = arith.maximumf %176, %177 : vector<256x32xf32>
    %cst_128 = arith.constant dense<0.000000e+00> : vector<32xf32>
    %179 = vector.multi_reduction <add>, %178, %cst_128 [0] : vector<256x32xf32> to vector<32xf32>
    %180 = vector.shape_cast %179 : vector<32xf32> to vector<1x32xf32>
    %cst_129 = arith.constant 3.906250e-03 : f32
    %181 = vector.broadcast %cst_129 : f32 to vector<1x32xf32>
    %182 = arith.mulf %180, %181 : vector<1x32xf32>
    %c0_130 = arith.constant 0 : index
    %c0_131 = arith.constant 0 : index
    %183 = vector.load %arg6[%c0_130, %c0_131] : memref<32x24xf32, #tpu.memory_space<vmem>>, vector<32x24xf32>
    %cst_132 = arith.constant dense<0.000000e+00> : vector<1x24xf32>
    %184 = tpu.matmul %182, %183, %cst_132 {dimension_numbers = #tpu.dot_dimension_numbers<[1], [0], [0], [1], [0, 0, 1, 1], [], []>} : vector<1x32xf32>, vector<32x24xf32>, vector<1x24xf32> -> vector<1x24xf32>
    %c0_133 = arith.constant 0 : index
    %c0_134 = arith.constant 0 : index
    %185 = vector.load %arg7[%c0_133, %c0_134] : memref<1x24xf32, #tpu.memory_space<vmem>>, vector<1x24xf32>
    %186 = arith.addf %184, %185 : vector<1x24xf32>
    %c0_135 = arith.constant 0 : index
    %c0_136 = arith.constant 0 : index
    %c0_137 = arith.constant 0 : index
    %187 = vector.load %arg8[%c0_135, %c0_136, %c0_137] : memref<1x1x24xf32, #tpu.memory_space<vmem>>, vector<1x1x24xf32>
    %188 = vector.shape_cast %187 : vector<1x1x24xf32> to vector<1x24xf32>
    %189 = vector.shape_cast %186 : vector<1x24xf32> to vector<1x1x24xf32>
    tpu.vector_store %arg8[%c0_135, %c0_136, %c0_137], %189 {strides = array<i32>} : memref<1x1x24xf32, #tpu.memory_space<vmem>>, vector<1x1x24xf32>,
    return
  }
  func.func @transform_0(%arg0: i32) -> (i32, i32, i32) {
    %c0_i32 = arith.constant 0 : i32
    %c0_i32_0 = arith.constant 0 : i32
    %c0_i32_1 = arith.constant 0 : i32
    return %arg0, %c0_i32, %c0_i32_0 : i32, i32, i32
  }
  func.func @transform_1(%arg0: i32) -> (i32, i32, i32) {
    %c0_i32 = arith.constant 0 : i32
    %c0_i32_0 = arith.constant 0 : i32
    %c0_i32_1 = arith.constant 0 : i32
    %c0_i32_2 = arith.constant 0 : i32
    return %c0_i32, %c0_i32_0, %c0_i32_1 : i32, i32, i32
  }
  func.func @transform_2(%arg0: i32) -> (i32, i32) {
    %c0_i32 = arith.constant 0 : i32
    %c0_i32_0 = arith.constant 0 : i32
    %c0_i32_1 = arith.constant 0 : i32
    return %c0_i32, %c0_i32_0 : i32, i32
  }
  func.func @transform_3(%arg0: i32) -> (i32, i32, i32) {
    %c0_i32 = arith.constant 0 : i32
    %c0_i32_0 = arith.constant 0 : i32
    %c0_i32_1 = arith.constant 0 : i32
    %c0_i32_2 = arith.constant 0 : i32
    return %c0_i32, %c0_i32_0, %c0_i32_1 : i32, i32, i32
  }
  func.func @transform_4(%arg0: i32) -> (i32, i32) {
    %c0_i32 = arith.constant 0 : i32
    %c0_i32_0 = arith.constant 0 : i32
    %c0_i32_1 = arith.constant 0 : i32
    return %c0_i32, %c0_i32_0 : i32, i32
  }
  func.func @transform_5(%arg0: i32) -> (i32, i32) {
    %c0_i32 = arith.constant 0 : i32
    %c0_i32_0 = arith.constant 0 : i32
    %c0_i32_1 = arith.constant 0 : i32
    return %c0_i32, %c0_i32_0 : i32, i32
  }
  func.func @transform_6(%arg0: i32) -> (i32, i32) {
    %c0_i32 = arith.constant 0 : i32
    %c0_i32_0 = arith.constant 0 : i32
    %c0_i32_1 = arith.constant 0 : i32
    return %c0_i32, %c0_i32_0 : i32, i32
  }
  func.func @transform_7(%arg0: i32) -> (i32, i32, i32) {
    %c0_i32 = arith.constant 0 : i32
    %c0_i32_0 = arith.constant 0 : i32
    %c0_i32_1 = arith.constant 0 : i32
    return %arg0, %c0_i32, %c0_i32_0 : i32, i32, i32
  }
}

</mosaic_0001>

<bundles_post_ra>
// kernel: aux_classifier_forward.1
= control target key start
LH: loop header
LB: loop body
LE: loop exit
PB: predicated region body
PF: predicated region fallthrough
CT: control target
= control target key end

     0   :  { %s11450_s24 = smov 0   ;;  %s14016_s0 = inlined_call_operand.vmem [shape: f32[2,290,4], index: 0, kind: input, shape index: {}]   ;;  %s14017_s1 = inlined_call_operand.vmem [shape: f32[9,4,32], index: 1, kind: input, shape index: {}]   ;;  %s14018_s2 = inlined_call_operand.vmem [shape: f32[1,32], index: 2, kind: input, shape index: {}]   ;;  %s14019_s3 = inlined_call_operand.vmem [shape: f32[9,32,32], index: 3, kind: input, shape index: {}]   ;;  %s14020_s4 = inlined_call_operand.vmem [shape: f32[1,32], index: 4, kind: input, shape index: {}]   ;;  %s14021_s5 = inlined_call_operand.vmem [shape: f32[32,24], index: 5, kind: input, shape index: {}]   ;;  %s14022_s6 = inlined_call_operand.vmem [shape: f32[1,24], index: 6, kind: input, shape index: {}]   ;;  %s14023_s7 = inlined_call_operand.vmem [shape: f32[2,1,24], index: 7, kind: output, shape index: {}]  }
   0x1 LB: > { %s8570_s25 = sadd.s32 4294967295, %s11405_s24   ;;  %p8574_p0 = scmp.ge.s32.totalorder %s11405_s24, 1  ;;  %s11405_s24 = sphi %s11450_s24, %s17_s24  }
   0x2   : > { %p237_p1 = scmp.lt.s32.totalorder %s11405_s24, 3 }
   0x4   : > { %p238_p2 = pnand %p8574_p0, %p237_p1 }
   0x6   : > { %241 = sbr.rel (%p238_p2) target bundleno = 1778 (0x6f2), region = 48 }
   0xd   : > { %v8576_v0 = vld [vmem:[%s14017_s1 + $0x4] sm:$0xf]  ;;  %vm14036_vm0 = vcmask 1043456   ;;  %p267_p3 = scmp.lt.s32.totalorder %s8570_s25, 1  ;;  %v884_v1 = vld [vmem:[%s14017_s1] sm:$0xf]  ;;  %v275_v28 = vlaneseq }
   0xe   : > { %9832 = vmatprep.subr.msk.mxu0 %vm14036_vm0, %v8576_v0  ;;  %vm919_vm1 = vcmask 31744   ;;  %v11484_v5 = vld [vmem:[%s14017_s1 + $0x8] sm:$0xf]  ;;  %v14317_v38 = vmov 0  ;;  %v11673_v54 = vld [vmem:[%s14017_s1 + $0xc] sm:$0xf] }
   0xf   : > { %9833 = vmatpush3.msk.msra.mxu0 %vm14036_vm0, %v8576_v0  ;;  %s14787_s25 = smov (!%p267_p3, %s8570_s25), 1  ;;  %v11608_v31 = vshrl.u32 %v275_v28, 7  ;;  %v14326_v63 = vmov 0  ;;  %v14328_v28 = vmov 0 }
  0x10   : > { %9882 = vmatprep.subr.msk.mxu0 %vm14036_vm0, %v884_v1  ;;  %s11387_s30 = smul.u32 296, %s14787_s25  ;;  %s274_s8 = scalar_lea.vmem %s14023_s7, %s14787_s25 }
  0x11   : > { %v312_v34 = vand.u32 15, %v11608_v31  ;;  %v278_v35 = vadd.s32 16, %v11608_v31  ;;  %v280_v41 = vadd.s32 32, %v11608_v31  ;;  %v282_v47 = vadd.s32 48, %v11608_v31 }
  0x12   : > { %s11473_s10 = scalar_lea.vmem %s14016_s0, %s11387_s30  ;;  %v284_v53 = vadd.s32 64, %v11608_v31  ;;  %v286_v60 = vadd.s32 80, %v11608_v31 }
  0x13   : > { %v885_v2 = vld [vmem:[%s11473_s10 + $0x1] sm:$0xff]  ;;  %v886_v3 = vld [vmem:[%s11473_s10 + $0x9] sm:$0xff]  ;;  %v11478_v4 = vld [vmem:[%s11473_s10 + $0x11] sm:$0xff]  ;;  %vm11632_vm2 = vcmp.ne.s32.totalorder %v312_v34, 0  ;;  %v326_v40 = vand.u32 15, %v278_v35  ;;  %v340_v46 = vand.u32 15, %v280_v41 }
  0x14   : > { %9834 = vmatprep.mubr.msk.f32.mxu0 %vm919_vm1, %v885_v2  ;;  %v11491_v6 = vld [vmem:[%s11473_s10 + $0x19] sm:$0xff]  ;;  %v11494_v7 = vld [vmem:[%s11473_s10 + $0x21] sm:$0xff]  ;;  %v11503_v8 = vld [vmem:[%s11473_s10 + $0x29] sm:$0xff]  ;;  %v14318_v38 = vsel %vm11632_vm2, 4294967295, %v14317_v38  ;;  %v354_v52 = vand.u32 15, %v282_v47  ;;  %v368_v59 = vand.u32 15, %v284_v53 }
  0x15   : > { %9835 = vmatmul.mubr.msk.f32.vlgmr.msra.gmra.mrb[0].mxu0 %vm919_vm1, %v886_v3  ;;  %v11506_v9 = vld [vmem:[%s11473_s10 + $0x31] sm:$0xff]  ;;  %v11513_v10 = vld [vmem:[%s11473_s10 + $0x39] sm:$0xff]  ;;  %v11516_v11 = vld [vmem:[%s11473_s10 + $0x41] sm:$0xff]  ;;  %vm11647_vm3 = vcmp.ne.s32.totalorder %v326_v40, 0  ;;  %vm11662_vm4 = vcmp.ne.s32.totalorder %v340_v46, 0  ;;  %v288_v2 = vadd.s32 96, %v11608_v31 }
  0x16   : > { %9883 = vmatpush3.msk.msra.mxu0 %vm14036_vm0, %v884_v1  ;;  %9837 = vmatprep.mubr.msk.f32.mxu0 %vm919_vm1, %v11478_v4  ;;  %14292 = vst [vmem:[#allocation3_spill] sm:$0xff] %v11506_v9  ;;  %14293 = vst [vmem:[#allocation4_spill] sm:$0xff] %v11513_v10  ;;  %v11523_v12 = vld [vmem:[%s11473_s10 + $0x49] sm:$0xff]  ;;  %v11526_v13 = vld [vmem:[%s11473_s10 + $0x51] sm:$0xff]  ;;  %vm11687_vm5 = vcmp.ne.s32.totalorder %v354_v52, 0  ;;  %vm11704_vm6 = vcmp.ne.s32.totalorder %v368_v59, 0 }
  0x17   : > { %9932 = vmatprep.subr.msk.mxu0 %vm14036_vm0, %v11484_v5  ;;  %14294 = vst [vmem:[#allocation5_spill] sm:$0xff] %v11516_v11  ;;  %14295 = vst [vmem:[#allocation6_spill] sm:$0xff] %v11523_v12  ;;  %v11533_v14 = vld [vmem:[%s11473_s10 + $0x59] sm:$0xff]  ;;  %v11536_v15 = vld [vmem:[%s11473_s10 + $0x61] sm:$0xff]  ;;  %v14327_v63 = vsel %vm11704_vm6, 4294967295, %v14326_v63  ;;  %v382_v1 = vand.u32 15, %v286_v60 }
  0x18   : > { %14296 = vst [vmem:[#allocation7_spill] sm:$0xff] %v11526_v13  ;;  %14297 = vst [vmem:[#allocation8_spill] sm:$0xff] %v11533_v14  ;;  %v11543_v16 = vld [vmem:[%s11473_s10 + $0x69] sm:$0xff]  ;;  %v11546_v17 = vld [vmem:[%s11473_s10 + $0x71] sm:$0xff]  ;;  %v396_v35 = vand.u32 15, %v288_v2  ;;  %v14332_v53 = vmov 0 }
  0x19   : > { %9838 = vmatmul.mubr.msk.f32.gmra.mrb[2].mxu0 %vm919_vm1, %v11491_v6  ;;  %14298 = vst [vmem:[#allocation9_spill] sm:$0xff] %v11536_v15  ;;  %14299 = vst [vmem:[#allocation10_spill] sm:$0xff] %v11543_v16  ;;  %v11553_v18 = vld [vmem:[%s11473_s10 + $0x79] sm:$0xff]  ;;  %v11556_v19 = vld [vmem:[%s11473_s10 + $0x81] sm:$0xff]  ;;  %vm11721_vm7 = vcmp.ne.s32.totalorder %v382_v1, 0  ;;  %v294_v60 = vadd.s32 144, %v11608_v31 }
  0x1a   : > { %9840 = vmatprep.mubr.msk.f32.mxu0 %vm919_vm1, %v11494_v7  ;;  %14300 = vst [vmem:[#allocation11_spill] sm:$0xff] %v11546_v17  ;;  %14301 = vst [vmem:[#allocation12_spill] sm:$0xff] %v11553_v18  ;;  %v11563_v20 = vld [vmem:[%s11473_s10 + $0x89] sm:$0xff]  ;;  %v11566_v21 = vld [vmem:[%s11473_s10 + $0x91] sm:$0xff]  ;;  %v14329_v28 = vsel %vm11721_vm7, 4294967295, %v14328_v28  ;;  %vm11738_vm8 = vcmp.ne.s32.totalorder %v396_v35, 0 }
  0x1b   : > { %14302 = vst [vmem:[#allocation13_spill] sm:$0xff] %v11556_v19  ;;  %14303 = vst [vmem:[#allocation14_spill] sm:$0xff] %v11563_v20  ;;  %v11573_v22 = vld [vmem:[%s11473_s10 + $0x99] sm:$0xff]  ;;  %v11576_v23 = vld [vmem:[%s11473_s10 + $0xa1] sm:$0xff]  ;;  %v14334_v2 = vmov 0  ;;  %v438_v35 = vand.u32 15, %v294_v60 }
  0x1c   : > { %14304 = vst [vmem:[#allocation15_spill] sm:$0xff] %v11566_v21  ;;  %14305 = vst [vmem:[#allocation16_spill] sm:$0xff] %v11573_v22  ;;  %v11583_v24 = vld [vmem:[%s11473_s10 + $0xa9] sm:$0xff]  ;;  %v11586_v25 = vld [vmem:[%s11473_s10 + $0xb1] sm:$0xff]  ;;  %v298_v60 = vadd.s32 176, %v11608_v31 }
  0x1d   : > { %9841 = vmatmul.mubr.msk.f32.gmra.mrb[4].mxu0 %vm919_vm1, %v11503_v8  ;;  %14306 = vst [vmem:[#allocation17_spill] sm:$0xff] %v11576_v23  ;;  %14307 = vst [vmem:[#allocation18_spill] sm:$0xff] %v11583_v24  ;;  %v11593_v26 = vld [vmem:[%s11473_s10 + $0xb9] sm:$0xff]  ;;  %v11596_v27 = vld [vmem:[%s11473_s10 + $0xc1] sm:$0xff]  ;;  %vm11789_vm11 = vcmp.ne.s32.totalorder %v438_v35, 0 }
  0x1e   : > { %9843 = vmatprep.mubr.msk.f32.mxu0 %vm919_vm1, %v11506_v9  ;;  %14308 = vst [vmem:[#allocation19_spill] sm:$0xff] %v11586_v25  ;;  %14309 = vst [vmem:[#allocation20_spill] sm:$0xff] %v11593_v26  ;;  %v11603_v29 = vld [vmem:[%s11473_s10 + $0xc9] sm:$0xff]  ;;  %v11606_v30 = vld [vmem:[%s11473_s10 + $0xd1] sm:$0xff] }
  0x1f   : > { %14310 = vst [vmem:[#allocation21_spill] sm:$0xff] %v11596_v27  ;;  %14311 = vst [vmem:[#allocation22_spill] sm:$0xff] %v11603_v29  ;;  %v11615_v32 = vld [vmem:[%s11473_s10 + $0xd9] sm:$0xff]  ;;  %v11618_v33 = vld [vmem:[%s11473_s10 + $0xe1] sm:$0xff] }
  0x20   : > { %14312 = vst [vmem:[#allocation23_spill] sm:$0xff] %v11606_v30  ;;  %14313 = vst [vmem:[#allocation24_spill] sm:$0xff] %v11615_v32  ;;  %v11627_v36 = vld [vmem:[%s11473_s10 + $0xe9] sm:$0xff]  ;;  %v11630_v37 = vld [vmem:[%s11473_s10 + $0xf1] sm:$0xff] }
  0x21   : > { %9844 = vmatmul.mubr.msk.f32.gmra.mrb[6].mxu0 %vm919_vm1, %v11513_v10  ;;  %14314 = vst [vmem:[#allocation25_spill] sm:$0xff] %v11618_v33  ;;  %14315 = vst [vmem:[#allocation26_spill] sm:$0xff] %v11627_v36  ;;  %v756_v39 = vld [vmem:[%s11473_s10] sm:$0xff]  ;;  %v11652_v45 = vld [vmem:[%s11473_s10 + $0x10] sm:$0xff]  ;;  %v283_v10 = vadd.s32 56, %v11608_v31 }
  0x22   : > { %9846 = vmatprep.mubr.msk.f32.mxu0 %vm919_vm1, %v11516_v11  ;;  %14316 = vst [vmem:[#allocation27_spill] sm:$0xff] %v11630_v37  ;;  %v11643_v42 = vld [vmem:[%s11473_s10 + $0xf9] sm:$0xff]  ;;  %v852_v43 = vsel %vm11632_vm2, %v756_v39, 0.0  ;;  %v757_v48 = vld [vmem:[%s11473_s10 + $0x8] sm:$0xff]  ;;  %v854_v49 = vsel %vm11647_vm3, %v11652_v45, 0.0  ;;  %v11692_v58 = vld [vmem:[%s11473_s10 + $0x30] sm:$0xff] }
  0x23   : > { %14319 = vst [vmem:[#allocation28_spill] sm:$0xff] %v11643_v42  ;;  %v11667_v51 = vld [vmem:[%s11473_s10 + $0x20] sm:$0xff]  ;;  %v11680_v55 = vld [vmem:[%s11473_s10 + $0x18] sm:$0xff]  ;;  %v11699_v61 = vld [vmem:[%s11473_s10 + $0x28] sm:$0xff]  ;;  %v858_v62 = vsel %vm11687_vm5, %v11692_v58, 0.0  ;;  %v290_v39 = vadd.s32 112, %v11608_v31 }
  0x24   : > { %v856_v56 = vsel %vm11662_vm4, %v11667_v51, 0.0  ;;  %v11709_v0 = vld [vmem:[%s11473_s10 + $0x40] sm:$0xff]  ;;  %v11716_v3 = vld [vmem:[%s11473_s10 + $0x38] sm:$0xff]  ;;  %v11726_v34 = vld [vmem:[%s11473_s10 + $0x50] sm:$0xff] }
  0x25   : > { %9847 = vmatmul.mubr.msk.f32.gmra.mrb[8].mxu0 %vm919_vm1, %v11523_v12  ;;  %v11733_v40 = vld [vmem:[%s11473_s10 + $0x48] sm:$0xff]  ;;  %v862_v41 = vsel %vm11721_vm7, %v11726_v34, 0.0  ;;  %v11743_v46 = vld [vmem:[%s11473_s10 + $0x60] sm:$0xff]  ;;  %v410_v47 = vand.u32 15, %v290_v39  ;;  %v296_v39 = vadd.s32 160, %v11608_v31  ;;  %v281_v12 = vadd.s32 40, %v11608_v31 }
  0x26   : > { %9849 = vmatprep.mubr.msk.f32.mxu0 %vm919_vm1, %v11526_v13  ;;  %v864_v52 = vsel %vm11738_vm8, %v11743_v46, 0.0  ;;  %v11934_v11 = vld [vmem:[%s11473_s10 + $0x1a] sm:$0xff]  ;;  %v11940_v9 = vld [vmem:[%s14017_s1 + $0x10] sm:$0xf] }
  0x27   : > { %vm11755_vm9 = vcmp.ne.s32.totalorder %v410_v47, 0  ;;  %14361 = vst [vmem:[#allocation36_spill] sm:$0xff] %v11934_v11 }
  0x28   : > { %v14333_v53 = vsel %vm11755_vm9, 4294967295, %v14332_v53 }
  0x29   : > { %9850 = vmatmul.mubr.msk.f32.gmra.mrb[10].mxu0 %vm919_vm1, %v11533_v14  ;;  %v1570_v14 = vld [vmem:[%s11473_s10 + $0xa] sm:$0xff] }
  0x2a   : > { %9852 = vmatprep.mubr.msk.f32.mxu0 %vm919_vm1, %v11536_v15  ;;  %v1569_v15 = vld [vmem:[%s11473_s10 + $0x2] sm:$0xff] }
  0x2d   : > { %9853 = vmatmul.mubr.msk.f32.gmra.mrb[12].mxu0 %vm919_vm1, %v11543_v16  ;;  %v11912_v16 = vld [vmem:[%s11473_s10 + $0xf8] sm:$0xff] }
  0x2e   : > { %9855 = vmatprep.mubr.msk.f32.mxu0 %vm919_vm1, %v11546_v17 }
  0x31   : > { %9856 = vmatmul.mubr.msk.f32.gmra.mrb[14].mxu0 %vm919_vm1, %v11553_v18 }
  0x32   : > { %9858 = vmatprep.mubr.msk.f32.mxu0 %vm919_vm1, %v11556_v19  ;;  %v14352_v19 = vmov 0 }
  0x35   : > { %9859 = vmatmul.mubr.msk.f32.gmra.mrb[16].mxu0 %vm919_vm1, %v11563_v20  ;;  %v277_v20 = vadd.s32 8, %v11608_v31 }
  0x36   : > { %9861 = vmatprep.mubr.msk.f32.mxu0 %vm919_vm1, %v11566_v21  ;;  %v11879_v21 = vld [vmem:[%s11473_s10 + $0xe0] sm:$0xff] }
  0x37   : > { %v319_v17 = vand.u32 15, %v277_v20  ;;  %v11927_v20 = vld [vmem:[%s11473_s10 + $0x12] sm:$0xff] }
  0x39   : > { %9862 = vmatmul.mubr.msk.f32.gmra.mrb[18].mxu0 %vm919_vm1, %v11573_v22  ;;  %v14349_v22 = vmov 0 }
  0x3a   : > { %9864 = vmatprep.mubr.msk.f32.mxu0 %vm919_vm1, %v11576_v23  ;;  %v306_v23 = vadd.s32 240, %v11608_v31 }
  0x3d   : > { %9865 = vmatmul.mubr.msk.f32.gmra.mrb[20].mxu0 %vm919_vm1, %v11583_v24  ;;  %v11862_v24 = vld [vmem:[%s11473_s10 + $0xd0] sm:$0xff] }
  0x3e   : > { %9867 = vmatprep.mubr.msk.f32.mxu0 %vm919_vm1, %v11586_v25  ;;  %v14346_v25 = vmov 0 }
  0x41   : > { %9868 = vmatmul.mubr.msk.f32.gmra.mrb[22].mxu0 %vm919_vm1, %v11593_v26  ;;  %v304_v26 = vadd.s32 224, %v11608_v31 }
  0x42   : > { %9870 = vmatprep.mubr.msk.f32.mxu0 %vm919_vm1, %v11596_v27  ;;  %v11845_v27 = vld [vmem:[%s11473_s10 + $0xc0] sm:$0xff] }
  0x45   : > { %9871 = vmatmul.mubr.msk.f32.gmra.mrb[24].mxu0 %vm919_vm1, %v11603_v29  ;;  %v14343_v29 = vmov 0 }
  0x46   : > { %9873 = vmatprep.mubr.msk.f32.mxu0 %vm919_vm1, %v11606_v30  ;;  %v302_v30 = vadd.s32 208, %v11608_v31 }
  0x49   : > { %9874 = vmatmul.mubr.msk.f32.gmra.mrb[26].mxu0 %vm919_vm1, %v11615_v32  ;;  %v11828_v32 = vld [vmem:[%s11473_s10 + $0xb0] sm:$0xff] }
  0x4a   : > { %9876 = vmatprep.mubr.msk.f32.mxu0 %vm919_vm1, %v11618_v33  ;;  %v14340_v33 = vmov 0 }
  0x4d   : > { %9877 = vmatmul.mubr.msk.f32.gmra.mrb[28].mxu0 %vm919_vm1, %v11627_v36  ;;  %v300_v36 = vadd.s32 192, %v11608_v31 }
  0x4e   : > { %9879 = vmatprep.mubr.msk.f32.mxu0 %vm919_vm1, %v11630_v37  ;;  %v11811_v37 = vld [vmem:[%s11473_s10 + $0xa0] sm:$0xff] }
  0x51   : > { %9880 = vmatmul.mubr.msk.f32.gmra.mrb[30].mxu0 %vm919_vm1, %v11643_v42  ;;  %v14338_v42 = vmov 0 }
  0x52   : > { %9884 = vmatprep.mubr.msk.f32.mxu0 %vm919_vm1, %v852_v43  ;;  %v14330_v43 = vmov 0 }
  0x53   : > { %v14331_v43 = vsel %vm11738_vm8, 4294967295, %v14330_v43 }
  0x55   : > { %9885 = vmatmul.mubr.msk.f32.vlgmr.msra.gmra.mrb[0].mxu0 %vm919_vm1, %v757_v48  ;;  %v292_v48 = vadd.s32 128, %v11608_v31 }
  0x56   : > { %9933 = vmatpush3.msk.msra.mxu0 %vm14036_vm0, %v11484_v5  ;;  %9887 = vmatprep.mubr.msk.f32.mxu0 %vm919_vm1, %v854_v49  ;;  %v860_v5 = vsel %vm11704_vm6, %v11709_v0, 0.0  ;;  %v11750_v49 = vld [vmem:[%s11473_s10 + $0x58] sm:$0xff] }
  0x57   : > { %9982 = vmatprep.subr.msk.mxu0 %vm14036_vm0, %v11673_v54  ;;  %v424_v59 = vand.u32 15, %v292_v48  ;;  %v14336_v48 = vmov 0 }
  0x58   : > { %v14337_v48 = vsel %vm11789_vm11, 4294967295, %v14336_v48 }
  0x59   : > { %9888 = vmatmul.mubr.msk.f32.gmra.mrb[2].mxu0 %vm919_vm1, %v11680_v55  ;;  %vm11772_vm10 = vcmp.ne.s32.totalorder %v424_v59, 0  ;;  %v452_v59 = vand.u32 15, %v296_v39  ;;  %v466_v39 = vand.u32 15, %v298_v60  ;;  %v480_v60 = vand.u32 15, %v300_v36 }
  0x5a   : > { %9890 = vmatprep.mubr.msk.f32.mxu0 %vm919_vm1, %v856_v56  ;;  %v11760_v56 = vld [vmem:[%s11473_s10 + $0x70] sm:$0xff]  ;;  %v14335_v2 = vsel %vm11772_vm10, 4294967295, %v14334_v2  ;;  %v494_v36 = vand.u32 15, %v302_v30  ;;  %v508_v30 = vand.u32 15, %v304_v26  ;;  %v522_v26 = vand.u32 15, %v306_v23 }
  0x5b   : > { %v866_v1 = vsel %vm11755_vm9, %v11760_v56, 0.0  ;;  %vm11806_vm12 = vcmp.ne.s32.totalorder %v452_v59, 0  ;;  %vm11823_vm13 = vcmp.ne.s32.totalorder %v466_v39, 0  ;;  %vm11840_vm14 = vcmp.ne.s32.totalorder %v480_v60, 0  ;;  %v11896_v23 = vld [vmem:[%s11473_s10 + $0xf0] sm:$0xff] }
  0x5c   : > { %v14339_v42 = vsel %vm11806_vm12, 4294967295, %v14338_v42  ;;  %v872_v59 = vsel %vm11806_vm12, %v11811_v37, 0.0  ;;  %v14341_v33 = vsel %vm11823_vm13, 4294967295, %v14340_v33  ;;  %v874_v39 = vsel %vm11823_vm13, %v11828_v32, 0.0 }
  0x5d   : > { %9891 = vmatmul.mubr.msk.f32.gmra.mrb[4].mxu0 %vm919_vm1, %v11699_v61  ;;  %14342 = vst [vmem:[#allocation29_spill] sm:$0xff] %v14341_v33  ;;  %v14344_v29 = vsel %vm11840_vm14, 4294967295, %v14343_v29  ;;  %v876_v60 = vsel %vm11840_vm14, %v11845_v27, 0.0  ;;  %vm11857_vm15 = vcmp.ne.s32.totalorder %v494_v36, 0  ;;  %vm11874_vm0 = vcmp.ne.s32.totalorder %v508_v30, 0 }
  0x5e   : > { %9893 = vmatprep.mubr.msk.f32.mxu0 %vm919_vm1, %v858_v62  ;;  %v11767_v62 = vld [vmem:[%s11473_s10 + $0x68] sm:$0xff]  ;;  %14345 = vst [vmem:[#allocation30_spill] sm:$0xff] %v14344_v29  ;;  %v14347_v25 = vsel %vm11857_vm15, 4294967295, %v14346_v25  ;;  %v878_v36 = vsel %vm11857_vm15, %v11862_v24, 0.0  ;;  %v14350_v22 = vsel %vm11874_vm0, 4294967295, %v14349_v22  ;;  %v880_v30 = vsel %vm11874_vm0, %v11879_v21, 0.0 }
  0x5f   : > { %14348 = vst [vmem:[#allocation31_spill] sm:$0xff] %v14347_v25  ;;  %14351 = vst [vmem:[#allocation32_spill] sm:$0xff] %v14350_v22  ;;  %vm11891_vm15 = vcmp.ne.s32.totalorder %v522_v26, 0  ;;  %v279_v26 = vadd.s32 24, %v11608_v31  ;;  %vm11915_vm0 = vcmp.ne.s32.totalorder %v319_v17, 15  ;;  %v14358_v17 = vmov 0 }
  0x60   : > { %v14353_v19 = vsel %vm11891_vm15, 4294967295, %v14352_v19  ;;  %v882_v18 = vsel %vm11891_vm15, %v11896_v23, 0.0 }
  0x61   : > { %9894 = vmatmul.mubr.msk.f32.gmra.mrb[6].mxu0 %vm919_vm1, %v11716_v3  ;;  %14354 = vst [vmem:[#allocation33_spill] sm:$0xff] %v14353_v19  ;;  %v333_v13 = vand.u32 15, %v279_v26  ;;  %v347_v26 = vand.u32 15, %v281_v12 }
  0x62   : > { %9896 = vmatprep.mubr.msk.f32.mxu0 %vm919_vm1, %v860_v5  ;;  %v11777_v5 = vld [vmem:[%s11473_s10 + $0x80] sm:$0xff] }
  0x63   : > { %v868_v47 = vsel %vm11772_vm10, %v11777_v5, 0.0  ;;  %vm11929_vm15 = vcmp.ne.s32.totalorder %v333_v13, 15  ;;  %v11951_v13 = vld [vmem:[%s11473_s10 + $0x22] sm:$0xff]  ;;  %vm11953_vm14 = vcmp.ne.s32.totalorder %v347_v26, 15 }
  0x64   : > { %v14359_v17 = vsel %vm11929_vm15, 4294967295, %v14358_v17  ;;  %v1668_v12 = vsel %vm11929_vm15, %v11934_v11, 0.0  ;;  %14363 = vst [vmem:[#allocation37_spill] sm:$0xff] %v11951_v13 }
  0x65   : > { %9897 = vmatmul.mubr.msk.f32.gmra.mrb[8].mxu0 %vm919_vm1, %v11733_v40  ;;  %14360 = vst [vmem:[#allocation35_spill] sm:$0xff] %v14359_v17  ;;  %v11970_v17 = vld [vmem:[%s11473_s10 + $0x32] sm:$0xff] }
  0x66   : > { %9899 = vmatprep.mubr.msk.f32.mxu0 %vm919_vm1, %v862_v41  ;;  %v11784_v41 = vld [vmem:[%s11473_s10 + $0x78] sm:$0xff]  ;;  %14368 = vst [vmem:[#allocation40_spill] sm:$0xff] %v11970_v17 }
  0x69   : > { %9900 = vmatmul.mubr.msk.f32.gmra.mrb[10].mxu0 %vm919_vm1, %v11750_v49 }
  0x6a   : > { %9902 = vmatprep.mubr.msk.f32.mxu0 %vm919_vm1, %v864_v52  ;;  %v11794_v52 = vld [vmem:[%s11473_s10 + $0x90] sm:$0xff] }
  0x6b   : > { %v870_v35 = vsel %vm11789_vm11, %v11794_v52, 0.0 }
  0x6d   : > { %9903 = vmatmul.mubr.msk.f32.gmra.mrb[12].mxu0 %vm919_vm1, %v11767_v62 }
  0x6e   : > { %9905 = vmatprep.mubr.msk.f32.mxu0 %vm919_vm1, %v866_v1  ;;  %v11801_v1 = vld [vmem:[%s11473_s10 + $0x88] sm:$0xff] }
  0x71   : > { %9906 = vmatmul.mubr.msk.f32.gmra.mrb[14].mxu0 %vm919_vm1, %v11784_v41 }
  0x72   : > { %9908 = vmatprep.mubr.msk.f32.mxu0 %vm919_vm1, %v868_v47  ;;  %v11818_v47 = vld [vmem:[%s11473_s10 + $0x98] sm:$0xff] }
  0x75   : > { %9909 = vmatmul.mubr.msk.f32.gmra.mrb[16].mxu0 %vm919_vm1, %v11801_v1 }
  0x76   : > { %9911 = vmatprep.mubr.msk.f32.mxu0 %vm919_vm1, %v870_v35  ;;  %v11835_v35 = vld [vmem:[%s11473_s10 + $0xa8] sm:$0xff] }
  0x79   : > { %9912 = vmatmul.mubr.msk.f32.gmra.mrb[18].mxu0 %vm919_vm1, %v11818_v47 }
  0x7a   : > { %9914 = vmatprep.mubr.msk.f32.mxu0 %vm919_vm1, %v872_v59  ;;  %v11852_v59 = vld [vmem:[%s11473_s10 + $0xb8] sm:$0xff] }
  0x7d   : > { %9915 = vmatmul.mubr.msk.f32.gmra.mrb[20].mxu0 %vm919_vm1, %v11835_v35 }
  0x7e   : > { %9917 = vmatprep.mubr.msk.f32.mxu0 %vm919_vm1, %v874_v39  ;;  %v11869_v39 = vld [vmem:[%s11473_s10 + $0xc8] sm:$0xff] }
  0x81   : > { %9918 = vmatmul.mubr.msk.f32.gmra.mrb[22].mxu0 %vm919_vm1, %v11852_v59 }
  0x82   : > { %9920 = vmatprep.mubr.msk.f32.mxu0 %vm919_vm1, %v876_v60  ;;  %v11885_v60 = vld [vmem:[%s11473_s10 + $0xd8] sm:$0xff] }
  0x85   : > { %9921 = vmatmul.mubr.msk.f32.gmra.mrb[24].mxu0 %vm919_vm1, %v11869_v39 }
  0x86   : > { %9923 = vmatprep.mubr.msk.f32.mxu0 %vm919_vm1, %v878_v36  ;;  %v11902_v36 = vld [vmem:[%s11473_s10 + $0xe8] sm:$0xff] }
  0x89   : > { %9924 = vmatmul.mubr.msk.f32.gmra.mrb[26].mxu0 %vm919_vm1, %v11885_v60 }
  0x8a   : > { %9926 = vmatprep.mubr.msk.f32.mxu0 %vm919_vm1, %v880_v30  ;;  %v14355_v30 = vmov 0 }
  0x8b   : > { %v14356_v30 = vsel %vm11915_vm0, 4294967295, %v14355_v30 }
  0x8c   : > { %14357 = vst [vmem:[#allocation34_spill] sm:$0xff] %v14356_v30  ;;  %v11977_v30 = vld [vmem:[%s11473_s10 + $0x3a] sm:$0xff] }
  0x8d   : > { %9927 = vmatmul.mubr.msk.f32.gmra.mrb[28].mxu0 %vm919_vm1, %v11902_v36  ;;  %14372 = vst [vmem:[#allocation42_spill] sm:$0xff] %v11977_v30 }
  0x8e   : > { %9929 = vmatprep.mubr.msk.f32.mxu0 %vm919_vm1, %v882_v18  ;;  %v1666_v18 = vsel %vm11915_vm0, %v1570_v14, 0.0  ;;  %vm14362_vm0 = vcmask 1043456   ;;  %v14364_v14 = vmov 0 }
  0x8f   : > { %v14365_v14 = vsel %vm11953_vm14, 4294967295, %v14364_v14 }
  0x90   : > { %14366 = vst [vmem:[#allocation38_spill] sm:$0xff] %v14365_v14 }
  0x91   : > { %9930 = vmatmul.mubr.msk.f32.gmra.mrb[30].mxu0 %vm919_vm1, %v11912_v16 }
  0x92   : > { %9934 = vmatprep.mubr.msk.f32.mxu0 %vm919_vm1, %v1569_v15  ;;  %v11958_v15 = vld [vmem:[%s11473_s10 + $0x2a] sm:$0xff] }
  0x93   : > { %14367 = vst [vmem:[#allocation39_spill] sm:$0xff] %v11958_v15  ;;  %v1670_v26 = vsel %vm11953_vm14, %v11958_v15, 0.0  ;;  %v11987_v15 = vld [vmem:[%s11473_s10 + $0x42] sm:$0xff] }
  0x94   : > { %14373 = vst [vmem:[#allocation43_spill] sm:$0xff] %v11987_v15 }
  0x95   : > { %9935 = vmatmul.mubr.msk.f32.vlgmr.msra.gmra.mrb[0].mxu0 %vm919_vm1, %v1666_v18  ;;  %v361_v18 = vand.u32 15, %v283_v10  ;;  %v14369_v10 = vmov 0 }
  0x96   : > { %9983 = vmatpush3.msk.msra.mxu0 %vm14362_vm0, %v11673_v54  ;;  %9937 = vmatprep.mubr.msk.f32.mxu0 %vm919_vm1, %v11927_v20  ;;  %v285_v54 = vadd.s32 72, %v11608_v31 }
  0x97   : > { %10032 = vmatprep.subr.msk.mxu0 %vm14362_vm0, %v11940_v9  ;;  %vm11972_vm15 = vcmp.ne.s32.totalorder %v361_v18, 15  ;;  %v14374_v18 = vmov 0 }
  0x98   : > { %v14370_v10 = vsel %vm11972_vm15, 4294967295, %v14369_v10  ;;  %v375_v11 = vand.u32 15, %v285_v54  ;;  %v1672_v14 = vsel %vm11972_vm15, %v11977_v30, 0.0  ;;  %v12004_v30 = vld [vmem:[%s11473_s10 + $0x52] sm:$0xff] }
  0x99   : > { %9938 = vmatmul.mubr.msk.f32.gmra.mrb[2].mxu0 %vm919_vm1, %v1668_v12  ;;  %14371 = vst [vmem:[#allocation41_spill] sm:$0xff] %v14370_v10  ;;  %v287_v12 = vadd.s32 88, %v11608_v31  ;;  %14378 = vst [vmem:[#allocation46_spill] sm:$0xff] %v12004_v30 }
  0x9a   : > { %9940 = vmatprep.mubr.msk.f32.mxu0 %vm919_vm1, %v11951_v13  ;;  %vm11989_vm0 = vcmp.ne.s32.totalorder %v375_v11, 15  ;;  %v11994_v13 = vld [vmem:[%s11473_s10 + $0x4a] sm:$0xff]  ;;  %v14379_v11 = vmov 0 }
  0x9b   : > { %v14375_v18 = vsel %vm11989_vm0, 4294967295, %v14374_v18  ;;  %14377 = vst [vmem:[#allocation45_spill] sm:$0xff] %v11994_v13  ;;  %v389_v54 = vand.u32 15, %v287_v12  ;;  %v1674_v10 = vsel %vm11989_vm0, %v11994_v13, 0.0  ;;  %v12021_v13 = vld [vmem:[%s11473_s10 + $0x62] sm:$0xff] }
  0x9c   : > { %14376 = vst [vmem:[#allocation44_spill] sm:$0xff] %v14375_v18  ;;  %14383 = vst [vmem:[#allocation49_spill] sm:$0xff] %v12021_v13 }
  0x9d   : > { %9941 = vmatmul.mubr.msk.f32.gmra.mrb[4].mxu0 %vm919_vm1, %v1670_v26  ;;  %v289_v26 = vadd.s32 104, %v11608_v31  ;;  %vm12006_vm15 = vcmp.ne.s32.totalorder %v389_v54, 15  ;;  %v14384_v54 = vmov 0 }
  0x9e   : > { %9943 = vmatprep.mubr.msk.f32.mxu0 %vm919_vm1, %v11970_v17  ;;  %v14380_v11 = vsel %vm12006_vm15, 4294967295, %v14379_v11  ;;  %v12011_v17 = vld [vmem:[%s11473_s10 + $0x5a] sm:$0xff] }
  0x9f   : > { %14381 = vst [vmem:[#allocation47_spill] sm:$0xff] %v14380_v11  ;;  %14382 = vst [vmem:[#allocation48_spill] sm:$0xff] %v12011_v17  ;;  %v403_v12 = vand.u32 15, %v289_v26  ;;  %v1676_v18 = vsel %vm12006_vm15, %v12011_v17, 0.0  ;;  %v12038_v17 = vld [vmem:[%s11473_s10 + $0x72] sm:$0xff] }
  0xa0   : > { %14388 = vst [vmem:[#allocation52_spill] sm:$0xff] %v12038_v17 }
  0xa1   : > { %9944 = vmatmul.mubr.msk.f32.gmra.mrb[6].mxu0 %vm919_vm1, %v1672_v14  ;;  %v291_v14 = vadd.s32 120, %v11608_v31  ;;  %vm12023_vm0 = vcmp.ne.s32.totalorder %v403_v12, 15  ;;  %v14389_v12 = vmov 0 }
  0xa2   : > { %9946 = vmatprep.mubr.msk.f32.mxu0 %vm919_vm1, %v11987_v15  ;;  %v14385_v54 = vsel %vm12023_vm0, 4294967295, %v14384_v54  ;;  %v12028_v15 = vld [vmem:[%s11473_s10 + $0x6a] sm:$0xff] }
  0xa3   : > { %14386 = vst [vmem:[#allocation50_spill] sm:$0xff] %v14385_v54  ;;  %14387 = vst [vmem:[#allocation51_spill] sm:$0xff] %v12028_v15  ;;  %v417_v26 = vand.u32 15, %v291_v14  ;;  %v1678_v11 = vsel %vm12023_vm0, %v12028_v15, 0.0  ;;  %v12055_v15 = vld [vmem:[%s11473_s10 + $0x82] sm:$0xff] }
  0xa4   : > { %14393 = vst [vmem:[#allocation55_spill] sm:$0xff] %v12055_v15 }
  0xa5   : > { %9947 = vmatmul.mubr.msk.f32.gmra.mrb[8].mxu0 %vm919_vm1, %v1674_v10  ;;  %v293_v10 = vadd.s32 136, %v11608_v31  ;;  %vm12040_vm15 = vcmp.ne.s32.totalorder %v417_v26, 15  ;;  %v14394_v26 = vmov 0 }
  0xa6   : > { %9949 = vmatprep.mubr.msk.f32.mxu0 %vm919_vm1, %v12004_v30  ;;  %v14390_v12 = vsel %vm12040_vm15, 4294967295, %v14389_v12  ;;  %v12045_v30 = vld [vmem:[%s11473_s10 + $0x7a] sm:$0xff] }
  0xa7   : > { %14391 = vst [vmem:[#allocation53_spill] sm:$0xff] %v14390_v12  ;;  %14392 = vst [vmem:[#allocation54_spill] sm:$0xff] %v12045_v30  ;;  %v431_v14 = vand.u32 15, %v293_v10  ;;  %v1680_v54 = vsel %vm12040_vm15, %v12045_v30, 0.0  ;;  %v12072_v30 = vld [vmem:[%s11473_s10 + $0x92] sm:$0xff] }
  0xa8   : > { %14398 = vst [vmem:[#allocation58_spill] sm:$0xff] %v12072_v30 }
  0xa9   : > { %9950 = vmatmul.mubr.msk.f32.gmra.mrb[10].mxu0 %vm919_vm1, %v1676_v18  ;;  %v295_v18 = vadd.s32 152, %v11608_v31  ;;  %vm12057_vm0 = vcmp.ne.s32.totalorder %v431_v14, 15  ;;  %v14399_v14 = vmov 0 }
  0xaa   : > { %9952 = vmatprep.mubr.msk.f32.mxu0 %vm919_vm1, %v12021_v13  ;;  %v14395_v26 = vsel %vm12057_vm0, 4294967295, %v14394_v26  ;;  %v12062_v13 = vld [vmem:[%s11473_s10 + $0x8a] sm:$0xff] }
  0xab   : > { %14396 = vst [vmem:[#allocation56_spill] sm:$0xff] %v14395_v26  ;;  %14397 = vst [vmem:[#allocation57_spill] sm:$0xff] %v12062_v13  ;;  %v445_v10 = vand.u32 15, %v295_v18  ;;  %v1682_v12 = vsel %vm12057_vm0, %v12062_v13, 0.0  ;;  %v12089_v13 = vld [vmem:[%s11473_s10 + $0xa2] sm:$0xff] }
  0xac   : > { %14403 = vst [vmem:[#allocation61_spill] sm:$0xff] %v12089_v13 }
  0xad   : > { %9953 = vmatmul.mubr.msk.f32.gmra.mrb[12].mxu0 %vm919_vm1, %v1678_v11  ;;  %v297_v11 = vadd.s32 168, %v11608_v31  ;;  %vm12074_vm15 = vcmp.ne.s32.totalorder %v445_v10, 15  ;;  %v14404_v10 = vmov 0 }
  0xae   : > { %9955 = vmatprep.mubr.msk.f32.mxu0 %vm919_vm1, %v12038_v17  ;;  %v14400_v14 = vsel %vm12074_vm15, 4294967295, %v14399_v14  ;;  %v12079_v17 = vld [vmem:[%s11473_s10 + $0x9a] sm:$0xff] }
  0xaf   : > { %14401 = vst [vmem:[#allocation59_spill] sm:$0xff] %v14400_v14  ;;  %14402 = vst [vmem:[#allocation60_spill] sm:$0xff] %v12079_v17  ;;  %v459_v18 = vand.u32 15, %v297_v11  ;;  %v1684_v26 = vsel %vm12074_vm15, %v12079_v17, 0.0  ;;  %v12106_v17 = vld [vmem:[%s11473_s10 + $0xb2] sm:$0xff] }
  0xb0   : > { %14408 = vst [vmem:[#allocation64_spill] sm:$0xff] %v12106_v17 }
  0xb1   : > { %9956 = vmatmul.mubr.msk.f32.gmra.mrb[14].mxu0 %vm919_vm1, %v1680_v54  ;;  %v299_v54 = vadd.s32 184, %v11608_v31  ;;  %vm12091_vm0 = vcmp.ne.s32.totalorder %v459_v18, 15  ;;  %v14409_v18 = vmov 0 }
  0xb2   : > { %9958 = vmatprep.mubr.msk.f32.mxu0 %vm919_vm1, %v12055_v15  ;;  %v14405_v10 = vsel %vm12091_vm0, 4294967295, %v14404_v10  ;;  %v12096_v15 = vld [vmem:[%s11473_s10 + $0xaa] sm:$0xff] }
  0xb3   : > { %14406 = vst [vmem:[#allocation62_spill] sm:$0xff] %v14405_v10  ;;  %14407 = vst [vmem:[#allocation63_spill] sm:$0xff] %v12096_v15  ;;  %v473_v11 = vand.u32 15, %v299_v54  ;;  %v1686_v14 = vsel %vm12091_vm0, %v12096_v15, 0.0  ;;  %v12123_v15 = vld [vmem:[%s11473_s10 + $0xc2] sm:$0xff] }
  0xb4   : > { %14413 = vst [vmem:[#allocation67_spill] sm:$0xff] %v12123_v15 }
  0xb5   : > { %9959 = vmatmul.mubr.msk.f32.gmra.mrb[16].mxu0 %vm919_vm1, %v1682_v12  ;;  %v301_v12 = vadd.s32 200, %v11608_v31  ;;  %vm12108_vm15 = vcmp.ne.s32.totalorder %v473_v11, 15  ;;  %v14414_v11 = vmov 0 }
  0xb6   : > { %9961 = vmatprep.mubr.msk.f32.mxu0 %vm919_vm1, %v12072_v30  ;;  %v14410_v18 = vsel %vm12108_vm15, 4294967295, %v14409_v18  ;;  %v12113_v30 = vld [vmem:[%s11473_s10 + $0xba] sm:$0xff] }
  0xb7   : > { %14411 = vst [vmem:[#allocation65_spill] sm:$0xff] %v14410_v18  ;;  %14412 = vst [vmem:[#allocation66_spill] sm:$0xff] %v12113_v30  ;;  %v487_v54 = vand.u32 15, %v301_v12  ;;  %v1688_v10 = vsel %vm12108_vm15, %v12113_v30, 0.0  ;;  %v14418_v30 = vmov 0 }
  0xb9   : > { %9962 = vmatmul.mubr.msk.f32.gmra.mrb[18].mxu0 %vm919_vm1, %v1684_v26  ;;  %v303_v26 = vadd.s32 216, %v11608_v31  ;;  %vm12125_vm0 = vcmp.ne.s32.totalorder %v487_v54, 15  ;;  %v12140_v54 = vld [vmem:[%s11473_s10 + $0xd2] sm:$0xff] }
  0xba   : > { %9964 = vmatprep.mubr.msk.f32.mxu0 %vm919_vm1, %v12089_v13  ;;  %v14415_v11 = vsel %vm12125_vm0, 4294967295, %v14414_v11  ;;  %v12130_v13 = vld [vmem:[%s11473_s10 + $0xca] sm:$0xff] }
  0xbb   : > { %14416 = vst [vmem:[#allocation68_spill] sm:$0xff] %v14415_v11  ;;  %14417 = vst [vmem:[#allocation69_spill] sm:$0xff] %v12130_v13  ;;  %v501_v12 = vand.u32 15, %v303_v26  ;;  %v1690_v18 = vsel %vm12125_vm0, %v12130_v13, 0.0  ;;  %v12147_v26 = vld [vmem:[%s11473_s10 + $0xda] sm:$0xff]  ;;  %v12157_v13 = vld [vmem:[%s11473_s10 + $0xe2] sm:$0xff] }
  0xbd   : > { %9965 = vmatmul.mubr.msk.f32.gmra.mrb[20].mxu0 %vm919_vm1, %v1686_v14  ;;  %v305_v14 = vadd.s32 232, %v11608_v31  ;;  %vm12142_vm15 = vcmp.ne.s32.totalorder %v501_v12, 15  ;;  %v14421_v12 = vmov 0 }
  0xbe   : > { %9967 = vmatprep.mubr.msk.f32.mxu0 %vm919_vm1, %v12106_v17  ;;  %v14419_v30 = vsel %vm12142_vm15, 4294967295, %v14418_v30  ;;  %v1692_v11 = vsel %vm12142_vm15, %v12147_v26, 0.0 }
  0xbf   : > { %14420 = vst [vmem:[#allocation70_spill] sm:$0xff] %v14419_v30  ;;  %v515_v17 = vand.u32 15, %v305_v14  ;;  %v14424_v30 = vmov 0 }
  0xc1   : > { %9968 = vmatmul.mubr.msk.f32.gmra.mrb[22].mxu0 %vm919_vm1, %v1688_v10  ;;  %v307_v10 = vadd.s32 248, %v11608_v31  ;;  %vm12159_vm0 = vcmp.ne.s32.totalorder %v515_v17, 15  ;;  %v12180_v17 = vld [vmem:[%s11473_s10 + $0xfa] sm:$0xff] }
  0xc2   : > { %9970 = vmatprep.mubr.msk.f32.mxu0 %vm919_vm1, %v12123_v15  ;;  %v14422_v12 = vsel %vm12159_vm0, 4294967295, %v14421_v12  ;;  %v12164_v15 = vld [vmem:[%s11473_s10 + $0xea] sm:$0xff] }
  0xc3   : > { %14423 = vst [vmem:[#allocation71_spill] sm:$0xff] %v14422_v12  ;;  %v529_v14 = vand.u32 15, %v307_v10  ;;  %v1694_v31 = vsel %vm12159_vm0, %v12164_v15, 0.0  ;;  %v2087_v10 = vsel %vm11632_vm2, %v11652_v45, 0.0  ;;  %v2091_v45 = vsel %vm11662_vm4, %v11692_v58, 0.0 }
  0xc4   : > { %v3323_v12 = vsel %vm11647_vm3, %v11692_v58, 0.0  ;;  %v3327_v58 = vsel %vm11687_vm5, %v11726_v34, 0.0 }
  0xc5   : > { %9971 = vmatmul.mubr.msk.f32.gmra.mrb[24].mxu0 %vm919_vm1, %v1690_v18  ;;  %v12173_v18 = vld [vmem:[%s11473_s10 + $0xf2] sm:$0xff]  ;;  %vm12175_vm15 = vcmp.ne.s32.totalorder %v529_v14, 15  ;;  %v2089_v14 = vsel %vm11647_vm3, %v11667_v51, 0.0 }
  0xc6   : > { %9973 = vmatprep.mubr.msk.f32.mxu0 %vm919_vm1, %v12140_v54  ;;  %v14425_v30 = vsel %vm12175_vm15, 4294967295, %v14424_v30 }
  0xc7   : > { %14426 = vst [vmem:[#allocation72_spill] sm:$0xff] %v14425_v30 }
  0xc9   : > { %9974 = vmatmul.mubr.msk.f32.gmra.mrb[26].mxu0 %vm919_vm1, %v1692_v11  ;;  %v1696_v11 = vsel %vm12175_vm15, %v12180_v17, 0.0  ;;  %vm14427_vm15 = vcmask 1043456  }
  0xca   : > { %9976 = vmatprep.mubr.msk.f32.mxu0 %vm919_vm1, %v12157_v13  ;;  %vm14428_vm2 = vmmov %vm14427_vm15 }
  0xcd   : > { %9977 = vmatmul.mubr.msk.f32.gmra.mrb[28].mxu0 %vm919_vm1, %v1694_v31  ;;  %v8745_v31 = vld [vmem:[%s14017_s1 + $0x14] sm:$0xf] }
  0xce   : > { %9979 = vmatprep.mubr.msk.f32.mxu0 %vm919_vm1, %v12173_v18 }
  0xd1   : > { %9980 = vmatmul.mubr.msk.f32.gmra.mrb[30].mxu0 %vm919_vm1, %v1696_v11  ;;  %v2097_v11 = vsel %vm11721_vm7, %v11743_v46, 0.0 }
  0xd2   : > { %9984 = vmatprep.mubr.msk.f32.mxu0 %vm919_vm1, %v2087_v10  ;;  %v2099_v10 = vsel %vm11738_vm8, %v11760_v56, 0.0 }
  0xd5   : > { %9985 = vmatmul.mubr.msk.f32.vlgmr.msra.gmra.mrb[0].mxu0 %vm919_vm1, %v11680_v55  ;;  %v2093_v55 = vsel %vm11687_vm5, %v11709_v0, 0.0 }
  0xd6   : > { %10033 = vmatpush3.msk.msra.mxu0 %vm14427_vm15, %v11940_v9  ;;  %9987 = vmatprep.mubr.msk.f32.mxu0 %vm919_vm1, %v2089_v14  ;;  %v2095_v9 = vsel %vm11704_vm6, %v11726_v34, 0.0  ;;  %v2101_v14 = vsel %vm11755_vm9, %v11777_v5, 0.0  ;;  %vm14430_vm15 = vnez %v14347_v25  ;;  %v3335_v34 = vsel %vm11755_vm9, %v11794_v52, 0.0 }
  0xd7   : > { %10082 = vmatprep.subr.msk.mxu0 %vm14428_vm2, %v8745_v31  ;;  %vm14429_vm2 = vnez %v14344_v29 }
  0xd9   : > { %9988 = vmatmul.mubr.msk.f32.gmra.mrb[2].mxu0 %vm919_vm1, %v11699_v61 }
  0xda   : > { %9990 = vmatprep.mubr.msk.f32.mxu0 %vm919_vm1, %v2091_v45  ;;  %v2103_v45 = vsel %vm11772_vm10, %v11794_v52, 0.0  ;;  %v3711_v52 = vld [vmem:[%s11473_s10 + $0x21] sm:$0xff] }
  0xdd   : > { %9991 = vmatmul.mubr.msk.f32.gmra.mrb[4].mxu0 %vm919_vm1, %v11716_v3 }
  0xde   : > { %9993 = vmatprep.mubr.msk.f32.mxu0 %vm919_vm1, %v2093_v55  ;;  %v2105_v55 = vsel %vm11789_vm11, %v11811_v37, 0.0 }
  0xe1   : > { %9994 = vmatmul.mubr.msk.f32.gmra.mrb[6].mxu0 %vm919_vm1, %v11733_v40 }
  0xe2   : > { %9996 = vmatprep.mubr.msk.f32.mxu0 %vm919_vm1, %v2095_v9  ;;  %v2107_v9 = vsel %vm11806_vm12, %v11828_v32, 0.0 }
  0xe5   : > { %9997 = vmatmul.mubr.msk.f32.gmra.mrb[8].mxu0 %vm919_vm1, %v11750_v49 }
  0xe6   : > { %9999 = vmatprep.mubr.msk.f32.mxu0 %vm919_vm1, %v2097_v11  ;;  %v2109_v11 = vsel %vm11823_vm13, %v11845_v27, 0.0  ;;  %vm14431_vm13 = vnez %v14350_v22 }
  0xe9   : > { %10000 = vmatmul.mubr.msk.f32.gmra.mrb[10].mxu0 %vm919_vm1, %v11767_v62 }
  0xea   : > { %10002 = vmatprep.mubr.msk.f32.mxu0 %vm919_vm1, %v2099_v10  ;;  %v2111_v10 = vsel %vm14429_vm2, %v11862_v24, 0.0  ;;  %vm14432_vm2 = vnez %v14353_v19 }
  0xed   : > { %10003 = vmatmul.mubr.msk.f32.gmra.mrb[12].mxu0 %vm919_vm1, %v11784_v41 }
  0xee   : > { %10005 = vmatprep.mubr.msk.f32.mxu0 %vm919_vm1, %v2101_v14  ;;  %v2113_v14 = vsel %vm14430_vm15, %v11879_v21, 0.0 }
  0xf1   : > { %10006 = vmatmul.mubr.msk.f32.gmra.mrb[14].mxu0 %vm919_vm1, %v11801_v1 }
  0xf2   : > { %10008 = vmatprep.mubr.msk.f32.mxu0 %vm919_vm1, %v2103_v45  ;;  %v2115_v45 = vsel %vm14431_vm13, %v11896_v23, 0.0 }
  0xf5   : > { %10009 = vmatmul.mubr.msk.f32.gmra.mrb[16].mxu0 %vm919_vm1, %v11818_v47 }
  0xf6   : > { %10011 = vmatprep.mubr.msk.f32.mxu0 %vm919_vm1, %v2105_v55  ;;  %v12281_v55 = vld [vmem:[%s11473_s10 + $0x100] sm:$0xff] }
  0xf9   : > { %10012 = vmatmul.mubr.msk.f32.gmra.mrb[18].mxu0 %vm919_vm1, %v11835_v35 }
  0xfa   : > { %10014 = vmatprep.mubr.msk.f32.mxu0 %vm919_vm1, %v2107_v9  ;;  %v2117_v9 = vsel %vm14432_vm2, %v12281_v55, 0.0  ;;  %vm14434_vm2 = vcmask 1043456  }
  0xfb   : > { %vm14435_vm13 = vmmov %vm14434_vm2 }
  0xfc   : > { %vm14471_vm12 = vmmov %vm14434_vm2 }
  0xfd   : > { %10015 = vmatmul.mubr.msk.f32.gmra.mrb[20].mxu0 %vm919_vm1, %v11852_v59 }
  0xfe   : > { %10017 = vmatprep.mubr.msk.f32.mxu0 %vm919_vm1, %v2109_v11  ;;  %v12293_v11 = vld [vmem:[%s11473_s10 + $0x108] sm:$0xff] }
  0xff   : > { %14433 = vst [vmem:[#allocation73_spill] sm:$0xff] %v12293_v11 }
 0x101   : > { %10018 = vmatmul.mubr.msk.f32.gmra.mrb[22].mxu0 %vm919_vm1, %v11869_v39 }
 0x102   : > { %10020 = vmatprep.mubr.msk.f32.mxu0 %vm919_vm1, %v2111_v10  ;;  %v8779_v10 = vld [vmem:[%s14017_s1 + $0x18] sm:$0xf] }
 0x105   : > { %10021 = vmatmul.mubr.msk.f32.gmra.mrb[24].mxu0 %vm919_vm1, %v11885_v60 }
 0x106   : > { %10023 = vmatprep.mubr.msk.f32.mxu0 %vm919_vm1, %v2113_v14  ;;  %v14436_v14 = vld [vmem:[#allocation3_spill] sm:$0xff] }
 0x109   : > { %10024 = vmatmul.mubr.msk.f32.gmra.mrb[26].mxu0 %vm919_vm1, %v11902_v36 }
 0x10a   : > { %10026 = vmatprep.mubr.msk.f32.mxu0 %vm919_vm1, %v2115_v45  ;;  %v14438_v45 = vld [vmem:[#allocation5_spill] sm:$0xff] }
 0x10d   : > { %10027 = vmatmul.mubr.msk.f32.gmra.mrb[28].mxu0 %vm919_vm1, %v11912_v16 }
 0x10e   : > { %10029 = vmatprep.mubr.msk.f32.mxu0 %vm919_vm1, %v2117_v9  ;;  %v14442_v9 = vld [vmem:[#allocation9_spill] sm:$0xff] }
 0x111   : > { %10030 = vmatmul.mubr.msk.f32.gmra.mrb[30].mxu0 %vm919_vm1, %v12293_v11  ;;  %v14477_v11 = vld [vmem:[#allocation41_spill] sm:$0xff] }
 0x112   : > { %10034 = vmatprep.mubr.msk.f32.mxu0 %vm919_vm1, %v11478_v4  ;;  %v14437_v4 = vld [vmem:[#allocation4_spill] sm:$0xff] }
 0x115   : > { %10035 = vmatmul.mubr.msk.f32.vlgmr.msra.gmra.mrb[0].mxu0 %vm919_vm1, %v11491_v6  ;;  %v14439_v6 = vld [vmem:[#allocation6_spill] sm:$0xff] }
 0x116   : > { %10083 = vmatpush3.msk.msra.mxu0 %vm14434_vm2, %v8745_v31  ;;  %10037 = vmatprep.mubr.msk.f32.mxu0 %vm919_vm1, %v11494_v7  ;;  %v14440_v31 = vld [vmem:[#allocation7_spill] sm:$0xff]  ;;  %v14441_v7 = vld [vmem:[#allocation8_spill] sm:$0xff] }
 0x117   : > { %10132 = vmatprep.subr.msk.mxu0 %vm14435_vm13, %v8779_v10 }
 0x119   : > { %10038 = vmatmul.mubr.msk.f32.gmra.mrb[2].mxu0 %vm919_vm1, %v11503_v8  ;;  %v14443_v8 = vld [vmem:[#allocation10_spill] sm:$0xff] }
 0x11a   : > { %10040 = vmatprep.mubr.msk.f32.mxu0 %vm919_vm1, %v14436_v14  ;;  %v14444_v14 = vld [vmem:[#allocation11_spill] sm:$0xff] }
 0x11d   : > { %10041 = vmatmul.mubr.msk.f32.gmra.mrb[4].mxu0 %vm919_vm1, %v14437_v4  ;;  %v14445_v4 = vld [vmem:[#allocation12_spill] sm:$0xff] }
 0x11e   : > { %10043 = vmatprep.mubr.msk.f32.mxu0 %vm919_vm1, %v14438_v45  ;;  %v14446_v45 = vld [vmem:[#allocation13_spill] sm:$0xff] }
 0x121   : > { %10044 = vmatmul.mubr.msk.f32.gmra.mrb[6].mxu0 %vm919_vm1, %v14439_v6  ;;  %v14447_v6 = vld [vmem:[#allocation14_spill] sm:$0xff] }
 0x122   : > { %10046 = vmatprep.mubr.msk.f32.mxu0 %vm919_vm1, %v14440_v31  ;;  %v14448_v31 = vld [vmem:[#allocation15_spill] sm:$0xff] }
 0x125   : > { %10047 = vmatmul.mubr.msk.f32.gmra.mrb[8].mxu0 %vm919_vm1, %v14441_v7  ;;  %v14449_v7 = vld [vmem:[#allocation16_spill] sm:$0xff] }
 0x126   : > { %10049 = vmatprep.mubr.msk.f32.mxu0 %vm919_vm1, %v14442_v9  ;;  %v14450_v9 = vld [vmem:[#allocation17_spill] sm:$0xff] }
 0x129   : > { %10050 = vmatmul.mubr.msk.f32.gmra.mrb[10].mxu0 %vm919_vm1, %v14443_v8  ;;  %v14451_v8 = vld [vmem:[#allocation18_spill] sm:$0xff] }
 0x12a   : > { %10052 = vmatprep.mubr.msk.f32.mxu0 %vm919_vm1, %v14444_v14  ;;  %v14452_v14 = vld [vmem:[#allocation19_spill] sm:$0xff] }
 0x12d   : > { %10053 = vmatmul.mubr.msk.f32.gmra.mrb[12].mxu0 %vm919_vm1, %v14445_v4  ;;  %v14453_v4 = vld [vmem:[#allocation20_spill] sm:$0xff] }
 0x12e   : > { %10055 = vmatprep.mubr.msk.f32.mxu0 %vm919_vm1, %v14446_v45  ;;  %v14454_v45 = vld [vmem:[#allocation21_spill] sm:$0xff] }
 0x131   : > { %10056 = vmatmul.mubr.msk.f32.gmra.mrb[14].mxu0 %vm919_vm1, %v14447_v6  ;;  %v14455_v6 = vld [vmem:[#allocation22_spill] sm:$0xff] }
 0x132   : > { %10058 = vmatprep.mubr.msk.f32.mxu0 %vm919_vm1, %v14448_v31  ;;  %v14456_v31 = vld [vmem:[#allocation23_spill] sm:$0xff] }
 0x135   : > { %10059 = vmatmul.mubr.msk.f32.gmra.mrb[16].mxu0 %vm919_vm1, %v14449_v7  ;;  %v14457_v7 = vld [vmem:[#allocation24_spill] sm:$0xff] }
 0x136   : > { %10061 = vmatprep.mubr.msk.f32.mxu0 %vm919_vm1, %v14450_v9  ;;  %v14458_v9 = vld [vmem:[#allocation25_spill] sm:$0xff] }
 0x139   : > { %10062 = vmatmul.mubr.msk.f32.gmra.mrb[18].mxu0 %vm919_vm1, %v14451_v8  ;;  %v14459_v8 = vld [vmem:[#allocation26_spill] sm:$0xff] }
 0x13a   : > { %10064 = vmatprep.mubr.msk.f32.mxu0 %vm919_vm1, %v14452_v14  ;;  %v14460_v14 = vld [vmem:[#allocation27_spill] sm:$0xff] }
 0x13d   : > { %10065 = vmatmul.mubr.msk.f32.gmra.mrb[20].mxu0 %vm919_vm1, %v14453_v4  ;;  %v12361_v4 = vld [vmem:[%s11473_s10 + $0x101] sm:$0xff] }
 0x13e   : > { %10067 = vmatprep.mubr.msk.f32.mxu0 %vm919_vm1, %v14454_v45  ;;  %14461 = vst [vmem:[#allocation3_spill] sm:$0xff] %v12361_v4  ;;  %v14462_v45 = vld [vmem:[#allocation28_spill] sm:$0xff] }
 0x141   : > { %10068 = vmatmul.mubr.msk.f32.gmra.mrb[22].mxu0 %vm919_vm1, %v14455_v6  ;;  %v12368_v6 = vld [vmem:[%s11473_s10 + $0x109] sm:$0xff] }
 0x142   : > { %10070 = vmatprep.mubr.msk.f32.mxu0 %vm919_vm1, %v14456_v31  ;;  %14463 = vst [vmem:[#allocation4_spill] sm:$0xff] %v12368_v6  ;;  %v14464_v31 = vld [vmem:[#allocation36_spill] sm:$0xff] }
 0x145   : > { %10071 = vmatmul.mubr.msk.f32.gmra.mrb[24].mxu0 %vm919_vm1, %v14457_v7  ;;  %v14465_v7 = vld [vmem:[#allocation34_spill] sm:$0xff] }
 0x146   : > { %10073 = vmatprep.mubr.msk.f32.mxu0 %vm919_vm1, %v14458_v9  ;;  %vm14466_vm13 = vnez %v14465_v7  ;;  %v14483_v7 = vld [vmem:[#allocation49_spill] sm:$0xff] }
 0x147   : > { %v2900_v9 = vsel %vm14466_vm13, %v14464_v31, 0.0  ;;  %v14473_v31 = vld [vmem:[#allocation42_spill] sm:$0xff] }
 0x149   : > { %10074 = vmatmul.mubr.msk.f32.gmra.mrb[26].mxu0 %vm919_vm1, %v14459_v8  ;;  %v8813_v8 = vld [vmem:[%s14017_s1 + $0x1c] sm:$0xf] }
 0x14a   : > { %10076 = vmatprep.mubr.msk.f32.mxu0 %vm919_vm1, %v14460_v14  ;;  %v14467_v14 = vld [vmem:[#allocation37_spill] sm:$0xff] }
 0x14d   : > { %10077 = vmatmul.mubr.msk.f32.gmra.mrb[28].mxu0 %vm919_vm1, %v14462_v45  ;;  %v14468_v45 = vld [vmem:[#allocation39_spill] sm:$0xff] }
 0x14e   : > { %10079 = vmatprep.mubr.msk.f32.mxu0 %vm919_vm1, %v12361_v4 }
 0x151   : > { %10080 = vmatmul.mubr.msk.f32.gmra.mrb[30].mxu0 %vm919_vm1, %v12368_v6  ;;  %v14469_v6 = vld [vmem:[#allocation35_spill] sm:$0xff] }
 0x152   : > { %10084 = vmatprep.mubr.msk.f32.mxu0 %vm919_vm1, %v11927_v20  ;;  %vm14470_vm15 = vnez %v14469_v6  ;;  %v14472_v20 = vld [vmem:[#allocation40_spill] sm:$0xff] }
 0x153   : > { %v2902_v4 = vsel %vm14470_vm15, %v14468_v45, 0.0  ;;  %v14479_v45 = vld [vmem:[#allocation46_spill] sm:$0xff] }
 0x155   : > { %10085 = vmatmul.mubr.msk.f32.vlgmr.msra.gmra.mrb[0].mxu0 %vm919_vm1, %v2900_v9  ;;  %v2904_v9 = vsel %vm11953_vm14, %v14473_v31, 0.0 }
 0x156   : > { %10133 = vmatpush3.msk.msra.mxu0 %vm14434_vm2, %v8779_v10  ;;  %10087 = vmatprep.mubr.msk.f32.mxu0 %vm919_vm1, %v14467_v14  ;;  %v14475_v10 = vld [vmem:[#allocation43_spill] sm:$0xff]  ;;  %v14476_v14 = vld [vmem:[#allocation45_spill] sm:$0xff]  ;;  %vm14478_vm2 = vnez %v14477_v11  ;;  %v14487_v11 = vld [vmem:[#allocation52_spill] sm:$0xff] }
 0x157   : > { %10182 = vmatprep.subr.msk.mxu0 %vm14471_vm12, %v8813_v8  ;;  %v2906_v6 = vsel %vm14478_vm2, %v14476_v14, 0.0 }
 0x159   : > { %10088 = vmatmul.mubr.msk.f32.gmra.mrb[2].mxu0 %vm919_vm1, %v2902_v4  ;;  %v14480_v4 = vld [vmem:[#allocation48_spill] sm:$0xff] }
 0x15a   : > { %10090 = vmatprep.mubr.msk.f32.mxu0 %vm919_vm1, %v14472_v20  ;;  %v14481_v20 = vld [vmem:[#allocation44_spill] sm:$0xff] }
 0x15b   : > { %vm14482_vm12 = vnez %v14481_v20  ;;  %v14491_v20 = vld [vmem:[#allocation55_spill] sm:$0xff] }
 0x15c   : > { %v2908_v19 = vsel %vm14482_vm12, %v14480_v4, 0.0 }
 0x15d   : > { %10091 = vmatmul.mubr.msk.f32.gmra.mrb[4].mxu0 %vm919_vm1, %v2904_v9  ;;  %v14484_v9 = vld [vmem:[#allocation51_spill] sm:$0xff] }
 0x15e   : > { %10093 = vmatprep.mubr.msk.f32.mxu0 %vm919_vm1, %v14475_v10  ;;  %v14485_v10 = vld [vmem:[#allocation47_spill] sm:$0xff] }
 0x15f   : > { %vm14486_vm14 = vnez %v14485_v10  ;;  %v14495_v10 = vld [vmem:[#allocation58_spill] sm:$0xff] }
 0x160   : > { %v2910_v31 = vsel %vm14486_vm14, %v14484_v9, 0.0 }
 0x161   : > { %10094 = vmatmul.mubr.msk.f32.gmra.mrb[6].mxu0 %vm919_vm1, %v2906_v6  ;;  %v14488_v6 = vld [vmem:[#allocation54_spill] sm:$0xff] }
 0x162   : > { %10096 = vmatprep.mubr.msk.f32.mxu0 %vm919_vm1, %v14479_v45  ;;  %v14489_v45 = vld [vmem:[#allocation50_spill] sm:$0xff] }
 0x163   : > { %vm14490_vm2 = vnez %v14489_v45  ;;  %v14499_v45 = vld [vmem:[#allocation61_spill] sm:$0xff] }
 0x164   : > { %v2912_v14 = vsel %vm14490_vm2, %v14488_v6, 0.0 }
 0x165   : > { %10097 = vmatmul.mubr.msk.f32.gmra.mrb[8].mxu0 %vm919_vm1, %v2908_v19  ;;  %v14492_v19 = vld [vmem:[#allocation57_spill] sm:$0xff] }
 0x166   : > { %10099 = vmatprep.mubr.msk.f32.mxu0 %vm919_vm1, %v14483_v7  ;;  %v14493_v7 = vld [vmem:[#allocation53_spill] sm:$0xff] }
 0x167   : > { %vm14494_vm12 = vnez %v14493_v7  ;;  %v14504_v7 = vld [vmem:[#allocation66_spill] sm:$0xff] }
 0x168   : > { %v2914_v4 = vsel %vm14494_vm12, %v14492_v19, 0.0 }
 0x169   : > { %10100 = vmatmul.mubr.msk.f32.gmra.mrb[10].mxu0 %vm919_vm1, %v2910_v31  ;;  %v14496_v31 = vld [vmem:[#allocation60_spill] sm:$0xff] }
 0x16a   : > { %10102 = vmatprep.mubr.msk.f32.mxu0 %vm919_vm1, %v14487_v11  ;;  %v14497_v11 = vld [vmem:[#allocation56_spill] sm:$0xff] }
 0x16b   : > { %vm14498_vm14 = vnez %v14497_v11 }
 0x16c   : > { %v2916_v9 = vsel %vm14498_vm14, %v14496_v31, 0.0  ;;  %v14509_v31 = vld [vmem:[#allocation65_spill] sm:$0xff] }
 0x16d   : > { %10103 = vmatmul.mubr.msk.f32.gmra.mrb[12].mxu0 %vm919_vm1, %v2912_v14  ;;  %v14500_v14 = vld [vmem:[#allocation63_spill] sm:$0xff]  ;;  %vm14510_vm14 = vnez %v14509_v31 }
 0x16e   : > { %10105 = vmatprep.mubr.msk.f32.mxu0 %vm919_vm1, %v14491_v20  ;;  %v14501_v20 = vld [vmem:[#allocation59_spill] sm:$0xff] }
 0x16f   : > { %vm14502_vm2 = vnez %v14501_v20  ;;  %v12470_v31 = vld [vmem:[%s11473_s10 + $0x10a] sm:$0xff] }
 0x170   : > { %v2918_v6 = vsel %vm14502_vm2, %v14500_v14, 0.0 }
 0x171   : > { %10106 = vmatmul.mubr.msk.f32.gmra.mrb[14].mxu0 %vm919_vm1, %v2914_v4  ;;  %v14503_v4 = vld [vmem:[#allocation64_spill] sm:$0xff] }
 0x172   : > { %10108 = vmatprep.mubr.msk.f32.mxu0 %vm919_vm1, %v14495_v10  ;;  %v14505_v10 = vld [vmem:[#allocation62_spill] sm:$0xff] }
 0x173   : > { %vm14506_vm12 = vnez %v14505_v10 }
 0x174   : > { %v2920_v11 = vsel %vm14506_vm12, %v14504_v7, 0.0 }
 0x175   : > { %10109 = vmatmul.mubr.msk.f32.gmra.mrb[16].mxu0 %vm919_vm1, %v2916_v9  ;;  %v14507_v9 = vld [vmem:[#allocation67_spill] sm:$0xff] }
 0x176   : > { %10111 = vmatprep.mubr.msk.f32.mxu0 %vm919_vm1, %v14499_v45  ;;  %v14508_v45 = vld [vmem:[#allocation69_spill] sm:$0xff] }
 0x177   : > { %v2922_v20 = vsel %vm14510_vm14, %v14508_v45, 0.0 }
 0x179   : > { %10112 = vmatmul.mubr.msk.f32.gmra.mrb[18].mxu0 %vm919_vm1, %v2918_v6  ;;  %v14511_v6 = vld [vmem:[#allocation68_spill] sm:$0xff] }
 0x17a   : > { %10114 = vmatprep.mubr.msk.f32.mxu0 %vm919_vm1, %v14503_v4  ;;  %vm14512_vm2 = vnez %v14511_v6  ;;  %v12467_v6 = vld [vmem:[%s11473_s10 + $0x102] sm:$0xff] }
 0x17b   : > { %v2924_v4 = vsel %vm14512_vm2, %v12147_v26, 0.0  ;;  %vm14516_vm2 = vnez %v14318_v38 }
 0x17d   : > { %10115 = vmatmul.mubr.msk.f32.gmra.mrb[20].mxu0 %vm919_vm1, %v2920_v11  ;;  %v14513_v11 = vld [vmem:[#allocation70_spill] sm:$0xff] }
 0x17e   : > { %10117 = vmatprep.mubr.msk.f32.mxu0 %vm919_vm1, %v14507_v9  ;;  %vm14514_vm12 = vnez %v14513_v11 }
 0x17f   : > { %v2926_v10 = vsel %vm14514_vm12, %v12164_v15, 0.0  ;;  %vm14515_vm12 = vnez %v14425_v30 }
 0x181   : > { %10118 = vmatmul.mubr.msk.f32.gmra.mrb[22].mxu0 %vm919_vm1, %v2922_v20  ;;  %v2928_v20 = vsel %vm12159_vm0, %v12180_v17, 0.0 }
 0x182   : > { %10120 = vmatprep.mubr.msk.f32.mxu0 %vm919_vm1, %v12140_v54 }
 0x185   : > { %10121 = vmatmul.mubr.msk.f32.gmra.mrb[24].mxu0 %vm919_vm1, %v2924_v4  ;;  %v3321_v4 = vsel %vm14516_vm2, %v11667_v51, 0.0  ;;  %v3325_v51 = vsel %vm11662_vm4, %v11709_v0, 0.0  ;;  %v3331_v0 = vsel %vm11721_vm7, %v11760_v56, 0.0  ;;  %v14524_v56 = vld [vmem:[#allocation33_spill] sm:$0xff] }
 0x186   : > { %10123 = vmatprep.mubr.msk.f32.mxu0 %vm919_vm1, %v12157_v13 }
 0x189   : > { %10124 = vmatmul.mubr.msk.f32.gmra.mrb[26].mxu0 %vm919_vm1, %v2926_v10  ;;  %v2930_v10 = vsel %vm14515_vm12, %v12470_v31, 0.0  ;;  %vm14517_vm12 = vcmask 1043456  }
 0x18a   : > { %10126 = vmatprep.mubr.msk.f32.mxu0 %vm919_vm1, %v12173_v18  ;;  %vm14518_vm2 = vmmov %vm14517_vm12 }
 0x18d   : > { %10127 = vmatmul.mubr.msk.f32.gmra.mrb[28].mxu0 %vm919_vm1, %v2928_v20  ;;  %v8847_v20 = vld [vmem:[%s14017_s1 + $0x20] sm:$0xf] }
 0x18e   : > { %10129 = vmatprep.mubr.msk.f32.mxu0 %vm919_vm1, %v12467_v6 }
 0x191   : > { %10130 = vmatmul.mubr.msk.f32.gmra.mrb[30].mxu0 %vm919_vm1, %v2930_v10  ;;  %v3724_v10 = vld [vmem:[%s11473_s10 + $0x89] sm:$0xff] }
 0x192   : > { %10134 = vmatprep.mubr.msk.f32.mxu0 %vm919_vm1, %v3321_v4  ;;  %v3725_v4 = vld [vmem:[%s11473_s10 + $0x91] sm:$0xff] }
 0x195   : > { %10135 = vmatmul.mubr.msk.f32.vlgmr.msra.gmra.mrb[0].mxu0 %vm919_vm1, %v11699_v61  ;;  %v3329_v61 = vsel %vm11704_vm6, %v11743_v46, 0.0  ;;  %v3339_v46 = vsel %vm11789_vm11, %v11828_v32, 0.0  ;;  %vm14521_vm11 = vnez %v14344_v29  ;;  %v3319_v32 = vld [vmem:[%s11473_s10 + $0x110] sm:$0xff] }
 0x196   : > { %10183 = vmatpush3.msk.msra.mxu0 %vm14517_vm12, %v8813_v8  ;;  %10137 = vmatprep.mubr.msk.f32.mxu0 %vm919_vm1, %v3323_v12  ;;  %vm14520_vm12 = vnez %v14341_v33  ;;  %v3721_v12 = vld [vmem:[%s11473_s10 + $0x71] sm:$0xff]  ;;  %v3723_v8 = vld [vmem:[%s11473_s10 + $0x81] sm:$0xff] }
 0x197   : > { %10232 = vmatprep.subr.msk.mxu0 %vm14518_vm2, %v8847_v20  ;;  %vm14519_vm2 = vnez %v14339_v42 }
 0x199   : > { %10138 = vmatmul.mubr.msk.f32.gmra.mrb[2].mxu0 %vm919_vm1, %v11716_v3  ;;  %v3333_v3 = vsel %vm11738_vm8, %v11777_v5, 0.0  ;;  %v14526_v5 = vld [vmem:[#allocation73_spill] sm:$0xff] }
 0x19a   : > { %10140 = vmatprep.mubr.msk.f32.mxu0 %vm919_vm1, %v3325_v51  ;;  %v3727_v51 = vld [vmem:[%s11473_s10 + $0xa1] sm:$0xff] }
 0x19d   : > { %10141 = vmatmul.mubr.msk.f32.gmra.mrb[4].mxu0 %vm919_vm1, %v11733_v40  ;;  %v3337_v40 = vsel %vm11772_vm10, %v11811_v37, 0.0  ;;  %v3343_v37 = vsel %vm14520_vm12, %v11862_v24, 0.0  ;;  %vm14522_vm12 = vnez %v14347_v25 }
 0x19e   : > { %10143 = vmatprep.mubr.msk.f32.mxu0 %vm919_vm1, %v3327_v58  ;;  %v3347_v24 = vsel %vm14522_vm12, %v11896_v23, 0.0  ;;  %v3719_v23 = vld [vmem:[%s11473_s10 + $0x61] sm:$0xff]  ;;  %v3728_v58 = vld [vmem:[%s11473_s10 + $0xa9] sm:$0xff] }
 0x1a1   : > { %10144 = vmatmul.mubr.msk.f32.gmra.mrb[6].mxu0 %vm919_vm1, %v11750_v49  ;;  %v3341_v49 = vsel %vm14519_vm2, %v11845_v27, 0.0  ;;  %v3345_v27 = vsel %vm14521_vm11, %v11879_v21, 0.0  ;;  %vm14523_vm2 = vnez %v14350_v22  ;;  %vm14525_vm11 = vnez %v14524_v56  ;;  %v8989_v22 = vld [vmem:[%s14019_s3 + $0x78] sm:$0xff] }
 0x1a2   : > { %10146 = vmatprep.mubr.msk.f32.mxu0 %vm919_vm1, %v3329_v61  ;;  %v3349_v21 = vsel %vm14523_vm2, %v12281_v55, 0.0  ;;  %v3722_v55 = vld [vmem:[%s11473_s10 + $0x79] sm:$0xff]  ;;  %v3729_v61 = vld [vmem:[%s11473_s10 + $0xb1] sm:$0xff] }
 0x1a5   : > { %10147 = vmatmul.mubr.msk.f32.gmra.mrb[8].mxu0 %vm919_vm1, %v11767_v62  ;;  %v3351_v62 = vsel %vm14525_vm11, %v3319_v32, 0.0  ;;  %vm14527_vm11 = vcmask 1043456   ;;  %v3741_v32 = vld [vmem:[%s11473_s10 + $0x111] sm:$0xff] }
 0x1a6   : > { %10149 = vmatprep.mubr.msk.f32.mxu0 %vm919_vm1, %v3331_v0  ;;  %v3730_v0 = vld [vmem:[%s11473_s10 + $0xb9] sm:$0xff] }
 0x1a9   : > { %10150 = vmatmul.mubr.msk.f32.gmra.mrb[10].mxu0 %vm919_vm1, %v11784_v41  ;;  %v3320_v41 = vld [vmem:[%s11473_s10 + $0x118] sm:$0xff] }
 0x1aa   : > { %10152 = vmatprep.mubr.msk.f32.mxu0 %vm919_vm1, %v3333_v3  ;;  %v3731_v3 = vld [vmem:[%s11473_s10 + $0xc1] sm:$0xff] }
 0x1ad   : > { %10153 = vmatmul.mubr.msk.f32.gmra.mrb[12].mxu0 %vm919_vm1, %v11801_v1  ;;  %v3713_v1 = vld [vmem:[%s11473_s10 + $0x31] sm:$0xff] }
 0x1ae   : > { %10155 = vmatprep.mubr.msk.f32.mxu0 %vm919_vm1, %v3335_v34  ;;  %v3732_v34 = vld [vmem:[%s11473_s10 + $0xc9] sm:$0xff] }
 0x1b1   : > { %10156 = vmatmul.mubr.msk.f32.gmra.mrb[14].mxu0 %vm919_vm1, %v11818_v47  ;;  %v3714_v47 = vld [vmem:[%s11473_s10 + $0x39] sm:$0xff] }
 0x1b2   : > { %10158 = vmatprep.mubr.msk.f32.mxu0 %vm919_vm1, %v3337_v40  ;;  %v3733_v40 = vld [vmem:[%s11473_s10 + $0xd1] sm:$0xff] }
 0x1b5   : > { %10159 = vmatmul.mubr.msk.f32.gmra.mrb[16].mxu0 %vm919_vm1, %v11835_v35  ;;  %v3715_v35 = vld [vmem:[%s11473_s10 + $0x41] sm:$0xff] }
 0x1b6   : > { %10161 = vmatprep.mubr.msk.f32.mxu0 %vm919_vm1, %v3339_v46  ;;  %v3734_v46 = vld [vmem:[%s11473_s10 + $0xd9] sm:$0xff] }
 0x1b9   : > { %10162 = vmatmul.mubr.msk.f32.gmra.mrb[18].mxu0 %vm919_vm1, %v11852_v59  ;;  %v3716_v59 = vld [vmem:[%s11473_s10 + $0x49] sm:$0xff] }
 0x1ba   : > { %10164 = vmatprep.mubr.msk.f32.mxu0 %vm919_vm1, %v3341_v49  ;;  %v3735_v49 = vld [vmem:[%s11473_s10 + $0xe1] sm:$0xff] }
 0x1bd   : > { %10165 = vmatmul.mubr.msk.f32.gmra.mrb[20].mxu0 %vm919_vm1, %v11869_v39  ;;  %v3717_v39 = vld [vmem:[%s11473_s10 + $0x51] sm:$0xff] }
 0x1be   : > { %10167 = vmatprep.mubr.msk.f32.mxu0 %vm919_vm1, %v3343_v37  ;;  %v3736_v37 = vld [vmem:[%s11473_s10 + $0xe9] sm:$0xff] }
 0x1c1   : > { %10168 = vmatmul.mubr.msk.f32.gmra.mrb[22].mxu0 %vm919_vm1, %v11885_v60  ;;  %v3718_v60 = vld [vmem:[%s11473_s10 + $0x59] sm:$0xff] }
 0x1c2   : > { %10170 = vmatprep.mubr.msk.f32.mxu0 %vm919_vm1, %v3345_v27  ;;  %v3737_v27 = vld [vmem:[%s11473_s10 + $0xf1] sm:$0xff] }
 0x1c5   : > { %10171 = vmatmul.mubr.msk.f32.gmra.mrb[24].mxu0 %vm919_vm1, %v11902_v36  ;;  %v3720_v36 = vld [vmem:[%s11473_s10 + $0x69] sm:$0xff] }
 0x1c6   : > { %10173 = vmatprep.mubr.msk.f32.mxu0 %vm919_vm1, %v3347_v24  ;;  %v3738_v24 = vld [vmem:[%s11473_s10 + $0xf9] sm:$0xff] }
 0x1c9   : > { %10174 = vmatmul.mubr.msk.f32.gmra.mrb[26].mxu0 %vm919_vm1, %v11912_v16  ;;  %v3712_v16 = vld [vmem:[%s11473_s10 + $0x29] sm:$0xff] }
 0x1ca   : > { %10176 = vmatprep.mubr.msk.f32.mxu0 %vm919_vm1, %v3349_v21  ;;  %v14528_v21 = vld [vmem:[#allocation3_spill] sm:$0xff] }
 0x1cd   : > { %10177 = vmatmul.mubr.msk.f32.gmra.mrb[28].mxu0 %vm919_vm1, %v14526_v5  ;;  %v3742_v5 = vld [vmem:[%s11473_s10 + $0x119] sm:$0xff] }
 0x1ce   : > { %10179 = vmatprep.mubr.msk.f32.mxu0 %vm919_vm1, %v3351_v62  ;;  %v14529_v62 = vld [vmem:[#allocation4_spill] sm:$0xff] }
 0x1d1   : > { %10180 = vmatmul.mubr.msk.f32.gmra.mrb[30].mxu0 %vm919_vm1, %v3320_v41  ;;  %v14530_v41 = vld [vmem:[#allocation37_spill] sm:$0xff] }
 0x1d2   : > { %10184 = vmatprep.mubr.msk.f32.mxu0 %vm919_vm1, %v3711_v52  ;;  %v14531_v52 = vld [vmem:[#allocation39_spill] sm:$0xff] }
 0x1d5   : > { %10185 = vmatmul.mubr.msk.f32.vlgmr.msra.gmra.mrb[0].mxu0 %vm919_vm1, %v3712_v16  ;;  %v14532_v16 = vld [vmem:[#allocation34_spill] sm:$0xff] }
 0x1d6   : > { %10233 = vmatpush3.msk.msra.mxu0 %vm14527_vm11, %v8847_v20  ;;  %10187 = vmatprep.mubr.msk.f32.mxu0 %vm919_vm1, %v3713_v1  ;;  %v3726_v20 = vld [vmem:[%s11473_s10 + $0x99] sm:$0xff]  ;;  %v4134_v1 = vsel %vm14466_vm13, %v14531_v52, 0.0  ;;  %v14563_v52 = vld [vmem:[#allocation59_spill] sm:$0xff] }
 0x1d9   : > { %10188 = vmatmul.mubr.msk.f32.gmra.mrb[2].mxu0 %vm919_vm1, %v3714_v47  ;;  %v14533_v47 = vld [vmem:[#allocation40_spill] sm:$0xff] }
 0x1da   : > { %10190 = vmatprep.mubr.msk.f32.mxu0 %vm919_vm1, %v3715_v35  ;;  %v14534_v35 = vld [vmem:[#allocation42_spill] sm:$0xff] }
 0x1dd   : > { %10191 = vmatmul.mubr.msk.f32.gmra.mrb[4].mxu0 %vm919_vm1, %v3716_v59  ;;  %v14535_v59 = vld [vmem:[#allocation35_spill] sm:$0xff] }
 0x1de   : > { %10193 = vmatprep.mubr.msk.f32.mxu0 %vm919_vm1, %v3717_v39  ;;  %v4136_v39 = vsel %vm14470_vm15, %v14534_v35, 0.0 }
 0x1e1   : > { %10194 = vmatmul.mubr.msk.f32.gmra.mrb[6].mxu0 %vm919_vm1, %v3718_v60  ;;  %v14536_v60 = vld [vmem:[#allocation43_spill] sm:$0xff] }
 0x1e2   : > { %10196 = vmatprep.mubr.msk.f32.mxu0 %vm919_vm1, %v3719_v23  ;;  %v14537_v23 = vld [vmem:[#allocation45_spill] sm:$0xff] }
 0x1e5   : > { %10197 = vmatmul.mubr.msk.f32.gmra.mrb[8].mxu0 %vm919_vm1, %v3720_v36  ;;  %v14538_v36 = vld [vmem:[#allocation38_spill] sm:$0xff] }
 0x1e6   : > { %10199 = vmatprep.mubr.msk.f32.mxu0 %vm919_vm1, %v3721_v12  ;;  %vm14539_vm11 = vnez %v14538_v36 }
 0x1e7   : > { %v4138_v12 = vsel %vm14539_vm11, %v14537_v23, 0.0  ;;  %v8884_v23 = vld [vmem:[%s14019_s3 + $0x30] sm:$0xff] }
 0x1e9   : > { %10200 = vmatmul.mubr.msk.f32.gmra.mrb[10].mxu0 %vm919_vm1, %v3722_v55  ;;  %v14540_v55 = vld [vmem:[#allocation46_spill] sm:$0xff] }
 0x1ea   : > { %10202 = vmatprep.mubr.msk.f32.mxu0 %vm919_vm1, %v3723_v8  ;;  %v14541_v8 = vld [vmem:[#allocation48_spill] sm:$0xff] }
 0x1ed   : > { %10203 = vmatmul.mubr.msk.f32.gmra.mrb[12].mxu0 %vm919_vm1, %v3724_v10  ;;  %v14542_v10 = vld [vmem:[#allocation41_spill] sm:$0xff] }
 0x1ee   : > { %10205 = vmatprep.mubr.msk.f32.mxu0 %vm919_vm1, %v3725_v4  ;;  %vm14543_vm13 = vnez %v14542_v10 }
 0x1ef   : > { %v4140_v4 = vsel %vm14543_vm13, %v14541_v8, 0.0 }
 0x1f1   : > { %10206 = vmatmul.mubr.msk.f32.gmra.mrb[14].mxu0 %vm919_vm1, %v3726_v20  ;;  %v14544_v20 = vld [vmem:[#allocation49_spill] sm:$0xff] }
 0x1f2   : > { %10208 = vmatprep.mubr.msk.f32.mxu0 %vm919_vm1, %v3727_v51  ;;  %v14545_v51 = vld [vmem:[#allocation51_spill] sm:$0xff] }
 0x1f5   : > { %10209 = vmatmul.mubr.msk.f32.gmra.mrb[16].mxu0 %vm919_vm1, %v3728_v58  ;;  %v14546_v58 = vld [vmem:[#allocation44_spill] sm:$0xff] }
 0x1f6   : > { %10211 = vmatprep.mubr.msk.f32.mxu0 %vm919_vm1, %v3729_v61  ;;  %vm14547_vm15 = vnez %v14546_v58 }
 0x1f7   : > { %v4142_v61 = vsel %vm14547_vm15, %v14545_v51, 0.0  ;;  %v4730_v51 = vld [vmem:[%s14019_s3 + $0x8] sm:$0xff] }
 0x1f9   : > { %10212 = vmatmul.mubr.msk.f32.gmra.mrb[18].mxu0 %vm919_vm1, %v3730_v0  ;;  %v14548_v0 = vld [vmem:[#allocation52_spill] sm:$0xff] }
 0x1fa   : > { %10214 = vmatprep.mubr.msk.f32.mxu0 %vm919_vm1, %v3731_v3  ;;  %v14549_v3 = vld [vmem:[#allocation54_spill] sm:$0xff] }
 0x1fd   : > { %10215 = vmatmul.mubr.msk.f32.gmra.mrb[20].mxu0 %vm919_vm1, %v3732_v34  ;;  %v14550_v34 = vld [vmem:[#allocation47_spill] sm:$0xff] }
 0x1fe   : > { %10217 = vmatprep.mubr.msk.f32.mxu0 %vm919_vm1, %v3733_v40  ;;  %vm14551_vm11 = vnez %v14550_v34 }
 0x1ff   : > { %v4144_v40 = vsel %vm14551_vm11, %v14549_v3, 0.0  ;;  %v4732_v3 = vld [vmem:[%s14019_s3 + $0x18] sm:$0xff] }
 0x201   : > { %10218 = vmatmul.mubr.msk.f32.gmra.mrb[22].mxu0 %vm919_vm1, %v3734_v46  ;;  %v14552_v46 = vld [vmem:[#allocation55_spill] sm:$0xff] }
 0x202   : > { %10220 = vmatprep.mubr.msk.f32.mxu0 %vm919_vm1, %v3735_v49  ;;  %v14553_v49 = vld [vmem:[#allocation50_spill] sm:$0xff] }
 0x203   : > { %vm14554_vm13 = vnez %v14553_v49 }
 0x205   : > { %10221 = vmatmul.mubr.msk.f32.gmra.mrb[24].mxu0 %vm919_vm1, %v3736_v37  ;;  %v4146_v37 = vsel %vm14554_vm13, %v14492_v19, 0.0  ;;  %v14562_v19 = vld [vmem:[#allocation64_spill] sm:$0xff]  ;;  %vm14564_vm13 = vnez %v14563_v52 }
 0x206   : > { %10223 = vmatprep.mubr.msk.f32.mxu0 %vm919_vm1, %v3737_v27  ;;  %v14555_v27 = vld [vmem:[#allocation58_spill] sm:$0xff] }
 0x209   : > { %10224 = vmatmul.mubr.msk.f32.gmra.mrb[26].mxu0 %vm919_vm1, %v3738_v24  ;;  %v14556_v24 = vld [vmem:[#allocation60_spill] sm:$0xff] }
 0x20a   : > { %10226 = vmatprep.mubr.msk.f32.mxu0 %vm919_vm1, %v14528_v21  ;;  %v14557_v21 = vld [vmem:[#allocation53_spill] sm:$0xff] }
 0x20b   : > { %vm14558_vm15 = vnez %v14557_v21 }
 0x20d   : > { %10227 = vmatmul.mubr.msk.f32.gmra.mrb[28].mxu0 %vm919_vm1, %v14529_v62  ;;  %v14559_v62 = vld [vmem:[#allocation61_spill] sm:$0xff] }
 0x20e   : > { %10229 = vmatprep.mubr.msk.f32.mxu0 %vm919_vm1, %v3741_v32  ;;  %v4148_v32 = vsel %vm14558_vm15, %v14556_v24, 0.0  ;;  %v12851_v24 = vld [vmem:[%s14018_s2] ss:$0 sm:$0xff] }
 0x211   : > { %10230 = vmatmul.mubr.msk.f32.gmra.mrb[30].mxu0 %vm919_vm1, %v3742_v5  ;;  %v14560_v5 = vld [vmem:[#allocation56_spill] sm:$0xff] }
 0x212   : > { %10234 = vmatprep.mubr.msk.f32.mxu0 %vm919_vm1, %v14530_v41  ;;  %vm14561_vm11 = vnez %v14560_v5 }
 0x213   : > { %v4150_v41 = vsel %vm14561_vm11, %v14500_v14, 0.0 }
 0x215   : > { %10235 = vmatmul.mubr.msk.f32.vlgmr.msra.gmra.mrb[0].mxu0 %vm919_vm1, %v4134_v1  ;;  %v4152_v1 = vsel %vm14564_vm13, %v14504_v7, 0.0  ;;  %v4156_v7 = vsel %vm14510_vm14, %v12147_v26, 0.0  ;;  %v4162_v26 = vsel %vm12159_vm0, %v12470_v31, 0.0  ;;  %vm4594_vm0 = vcmask 261120  }
 0x216   : > { %10237 = vmatprep.mubr.msk.f32.mxu0 %vm919_vm1, %v14533_v47  ;;  %v14565_v47 = vld [vmem:[#allocation62_spill] sm:$0xff] }
 0x217   : > { %vm14566_vm15 = vnez %v14565_v47 }
 0x218   : > { %v4154_v14 = vsel %vm14566_vm15, %v14508_v45, 0.0  ;;  %vm14570_vm15 = vnez %v14513_v11  ;;  %v4131_v45 = vld [vmem:[%s11473_s10 + $0x112] sm:$0xff] }
 0x219   : > { %10238 = vmatmul.mubr.msk.f32.gmra.mrb[2].mxu0 %vm919_vm1, %v4136_v39  ;;  %v9024_v11 = vld [vmem:[%s14019_s3 + $0x90] sm:$0xff] }
 0x21a   : > { %10240 = vmatprep.mubr.msk.f32.mxu0 %vm919_vm1, %v14536_v60  ;;  %v14181_v60 = vmov 0.0  }
 0x21b   : > { %4598 = vst.msk [vmem:[#allocation2 + $0x18] sm:$0xff] %vm4594_vm0, %v14181_v60  ;;  %4599 = vst.msk [vmem:[#allocation2 + $0x20] sm:$0xff] %vm4594_vm0, %v14181_v60 }
 0x21c   : > { %4595 = vst.msk [vmem:[#allocation2] sm:$0xff] %vm4594_vm0, %v14181_v60  ;;  %4596 = vst.msk [vmem:[#allocation2 + $0x8] sm:$0xff] %vm4594_vm0, %v14181_v60 }
 0x21d   : > { %10241 = vmatmul.mubr.msk.f32.gmra.mrb[4].mxu0 %vm919_vm1, %v4138_v12  ;;  %4597 = vst.msk [vmem:[#allocation2 + $0x10] sm:$0xff] %vm4594_vm0, %v14181_v60  ;;  %4600 = vst.msk [vmem:[#allocation2 + $0x28] sm:$0xff] %vm4594_vm0, %v14181_v60  ;;  %v8885_v12 = vld [vmem:[%s14019_s3 + $0x38] sm:$0xff] }
 0x21e   : > { %10243 = vmatprep.mubr.msk.f32.mxu0 %vm919_vm1, %v14540_v55  ;;  %4601 = vst.msk [vmem:[#allocation2 + $0x30] sm:$0xff] %vm4594_vm0, %v14181_v60  ;;  %4602 = vst.msk [vmem:[#allocation2 + $0x38] sm:$0xff] %vm4594_vm0, %v14181_v60  ;;  %v10801_v55 = vpack.c.bf16 %v8885_v12, %v8884_v23 }
 0x21f   : > { %4603 = vst.msk [vmem:[#allocation2 + $0x40] sm:$0xff] %vm4594_vm0, %v14181_v60  ;;  %4604 = vst.msk [vmem:[#allocation2 + $0x48] sm:$0xff] %vm4594_vm0, %v14181_v60 }
 0x220   : > { %4605 = vst.msk [vmem:[#allocation2 + $0x50] sm:$0xff] %vm4594_vm0, %v14181_v60  ;;  %4606 = vst.msk [vmem:[#allocation2 + $0x58] sm:$0xff] %vm4594_vm0, %v14181_v60 }
 0x221   : > { %10244 = vmatmul.mubr.msk.f32.gmra.mrb[6].mxu0 %vm919_vm1, %v4140_v4  ;;  %4607 = vst.msk [vmem:[#allocation2 + $0x60] sm:$0xff] %vm4594_vm0, %v14181_v60  ;;  %4608 = vst.msk [vmem:[#allocation2 + $0x68] sm:$0xff] %vm4594_vm0, %v14181_v60 }
 0x222   : > { %10246 = vmatprep.mubr.msk.f32.mxu0 %vm919_vm1, %v14544_v20  ;;  %4609 = vst.msk [vmem:[#allocation2 + $0x70] sm:$0xff] %vm4594_vm0, %v14181_v60  ;;  %4610 = vst.msk [vmem:[#allocation2 + $0x78] sm:$0xff] %vm4594_vm0, %v14181_v60  ;;  %v4729_v20 = vld [vmem:[%s14019_s3] sm:$0xff] }
 0x223   : > { %4611 = vst.msk [vmem:[#allocation2 + $0x80] sm:$0xff] %vm4594_vm0, %v14181_v60  ;;  %4612 = vst.msk [vmem:[#allocation2 + $0x88] sm:$0xff] %vm4594_vm0, %v14181_v60  ;;  %v4733_v8 = vld [vmem:[#allocation2 + $0x1] sm:$0xff] }
 0x224   : > { %4613 = vst.msk [vmem:[#allocation2 + $0x90] sm:$0xff] %vm4594_vm0, %v14181_v60  ;;  %4614 = vst.msk [vmem:[#allocation2 + $0x98] sm:$0xff] %vm4594_vm0, %v14181_v60  ;;  %10290 = vmatprep.mubr.msk.f32.mxu1 %vm4594_vm0, %v4733_v8  ;;  %v4734_v4 = vld [vmem:[#allocation2 + $0x9] sm:$0xff] }
 0x225   : > { %10247 = vmatmul.mubr.msk.f32.gmra.mrb[8].mxu0 %vm919_vm1, %v4142_v61  ;;  %4615 = vst.msk [vmem:[#allocation2 + $0xa0] sm:$0xff] %vm4594_vm0, %v14181_v60  ;;  %4616 = vst.msk [vmem:[#allocation2 + $0xa8] sm:$0xff] %vm4594_vm0, %v14181_v60  ;;  %v10805_v61 = vpack.c.bf16 %v4730_v51, %v4729_v20  ;;  %v5412_v25 = vld [vmem:[#allocation2 + $0x2] sm:$0xff] }
 0x226   : > { %10249 = vmatprep.mubr.msk.f32.mxu0 %vm919_vm1, %v14548_v0  ;;  %4617 = vst.msk [vmem:[#allocation2 + $0xb0] sm:$0xff] %vm4594_vm0, %v14181_v60  ;;  %4618 = vst.msk [vmem:[#allocation2 + $0xb8] sm:$0xff] %vm4594_vm0, %v14181_v60  ;;  %v4731_v0 = vld [vmem:[%s14019_s3 + $0x10] sm:$0xff] }
 0x227   : > { %4619 = vst.msk [vmem:[#allocation2 + $0xc0] sm:$0xff] %vm4594_vm0, %v14181_v60  ;;  %4620 = vst.msk [vmem:[#allocation2 + $0xc8] sm:$0xff] %vm4594_vm0, %v14181_v60 }
 0x228   : > { %4621 = vst.msk [vmem:[#allocation2 + $0xd0] sm:$0xff] %vm4594_vm0, %v14181_v60  ;;  %4622 = vst.msk [vmem:[#allocation2 + $0xd8] sm:$0xff] %vm4594_vm0, %v14181_v60 }
 0x229   : > { %10250 = vmatmul.mubr.msk.f32.gmra.mrb[10].mxu0 %vm919_vm1, %v4144_v40  ;;  %4623 = vst.msk [vmem:[#allocation2 + $0xe0] sm:$0xff] %vm4594_vm0, %v14181_v60  ;;  %4624 = vst.msk [vmem:[#allocation2 + $0xe8] sm:$0xff] %vm4594_vm0, %v14181_v60  ;;  %v10809_v40 = vpack.c.bf16 %v4732_v3, %v4731_v0 }
 0x22a   : > { %10252 = vmatprep.mubr.msk.f32.mxu0 %vm919_vm1, %v14552_v46  ;;  %4625 = vst.msk [vmem:[#allocation2 + $0xf0] sm:$0xff] %vm4594_vm0, %v14181_v60  ;;  %4626 = vst.msk [vmem:[#allocation2 + $0xf8] sm:$0xff] %vm4594_vm0, %v14181_v60  ;;  %v8950_v46 = vld [vmem:[%s14019_s3 + $0x40] sm:$0xff] }
 0x22b   : > { %4627 = vst.msk [vmem:[#allocation2 + $0x100] sm:$0xff] %vm4594_vm0, %v14181_v60  ;;  %4628 = vst.msk [vmem:[#allocation2 + $0x108] sm:$0xff] %vm4594_vm0, %v14181_v60 }
 0x22c   : > { %4629 = vst.msk [vmem:[#allocation2 + $0x110] sm:$0xff] %vm4594_vm0, %v14181_v60  ;;  %4630 = vst.msk [vmem:[#allocation2 + $0x118] sm:$0xff] %vm4594_vm0, %v14181_v60 }
 0x22d   : > { %10253 = vmatmul.mubr.msk.f32.gmra.mrb[12].mxu0 %vm919_vm1, %v4146_v37  ;;  %v8951_v37 = vld [vmem:[%s14019_s3 + $0x48] sm:$0xff] }
 0x22e   : > { %10255 = vmatprep.mubr.msk.f32.mxu0 %vm919_vm1, %v14555_v27  ;;  %v12845_v27 = vpack.c.bf16 %v8951_v37, %v8950_v46 }
 0x231   : > { %10256 = vmatmul.mubr.msk.f32.gmra.mrb[14].mxu0 %vm919_vm1, %v4148_v32 }
 0x232   : > { %10258 = vmatprep.mubr.msk.f32.mxu0 %vm919_vm1, %v14559_v62 }
 0x235   : > { %10259 = vmatmul.mubr.msk.f32.gmra.mrb[16].mxu0 %vm919_vm1, %v4150_v41 }
 0x236   : > { %10261 = vmatprep.mubr.msk.f32.mxu0 %vm919_vm1, %v14562_v19 }
 0x239   : > { %10262 = vmatmul.mubr.msk.f32.gmra.mrb[18].mxu0 %vm919_vm1, %v4152_v1 }
 0x23a   : > { %10264 = vmatprep.mubr.msk.f32.mxu0 %vm919_vm1, %v14507_v9  ;;  %v14568_v9 = vld [vmem:[#allocation68_spill] sm:$0xff] }
 0x23b   : > { %vm14569_vm13 = vnez %v14568_v9 }
 0x23c   : > { %v4158_v39 = vsel %vm14569_vm13, %v12164_v15, 0.0  ;;  %v4132_v15 = vld [vmem:[%s11473_s10 + $0x11a] sm:$0xff]  ;;  %vm14572_vm13 = vnez %v14425_v30 }
 0x23d   : > { %10265 = vmatmul.mubr.msk.f32.gmra.mrb[20].mxu0 %vm919_vm1, %v4154_v14  ;;  %v9058_v30 = vld [vmem:[%s14019_s3 + $0xa0] sm:$0xff] }
 0x23e   : > { %10267 = vmatprep.mubr.msk.f32.mxu0 %vm919_vm1, %v12140_v54  ;;  %v4160_v54 = vsel %vm14570_vm15, %v12180_v17, 0.0  ;;  %v8882_v17 = vld [vmem:[%s14019_s3 + $0x20] sm:$0xff] }
 0x241   : > { %10268 = vmatmul.mubr.msk.f32.gmra.mrb[22].mxu0 %vm919_vm1, %v4156_v7 }
 0x242   : > { %10270 = vmatprep.mubr.msk.f32.mxu0 %vm919_vm1, %v12157_v13  ;;  %v14571_v13 = vld [vmem:[#allocation71_spill] sm:$0xff] }
 0x245   : > { %10271 = vmatmul.mubr.msk.f32.gmra.mrb[24].mxu0 %vm919_vm1, %v4158_v39 }
 0x246   : > { %10273 = vmatprep.mubr.msk.f32.mxu0 %vm919_vm1, %v12173_v18  ;;  %v4164_v18 = vsel %vm14572_vm13, %v4132_v15, 0.0 }
 0x249   : > { %10274 = vmatmul.mubr.msk.f32.gmra.mrb[26].mxu0 %vm919_vm1, %v4160_v54 }
 0x24a   : > { %10276 = vmatprep.mubr.msk.f32.mxu0 %vm919_vm1, %v12467_v6  ;;  %v8883_v6 = vld [vmem:[%s14019_s3 + $0x28] sm:$0xff] }
 0x24b   : > { %v10797_v31 = vpack.c.bf16 %v8883_v6, %v8882_v17 }
 0x24d   : > { %10277 = vmatmul.mubr.msk.f32.gmra.mrb[28].mxu0 %vm919_vm1, %v4162_v26  ;;  %10798 = vmatprep.subr.bf16.mxu1 %v10797_v31 }
 0x24e   : > { %10279 = vmatprep.mubr.msk.f32.mxu0 %vm919_vm1, %v4131_v45  ;;  %10800 = vmatpush3.bf16.msra.mxu1 %v10797_v31 }
 0x24f   : > { %10802 = vmatprep.subr.bf16.mxu1 %v10801_v55 }
 0x251   : > { %10280 = vmatmul.mubr.msk.f32.gmra.mrb[30].mxu0 %vm919_vm1, %v4164_v18  ;;  %vm14602_vm1 = vnez %v14318_v38 }
 0x252   : > { %10804 = vmatpush3.bf16.msra.mxu1 %v10801_v55 }
 0x253   : > { %10806 = vmatprep.subr.bf16.mxu1 %v10805_v61 }
 0x255   : > { %10291 = vmatmul.mubr.msk.f32.vlgmr.msra.gmra.mrb[0].mxu1 %vm4594_vm0, %v4734_v4 }
 0x256   : > { %10808 = vmatpush3.bf16.msra.mxu1 %v10805_v61 }
 0x257   : > { %10810 = vmatprep.subr.bf16.mxu1 %v10809_v40 }
 0x25a   : > { %10812 = vmatpush3.bf16.msra.mxu1 %v10809_v40 }
 0x25b   : > { %10814 = vmatprep.subr.bf16.mxu1 %v12845_v27 }
 0x2e8   : > { %v10236_v32 = vpop.f32.mrb[0].mxu0 }
 0x2e9   : > { %v4531_v62 = vadd.f32 %v10236_v32, %v12851_v24  ;;  %v4332_v41 = vpop.f32.mrb[1].mxu0 }
 0x2ea   : > { %v4530_v19 = vadd.f32 %v12851_v24, %v4332_v41 }
 0x2eb   : > { %v4563_v1 = vmax.f32 %v4531_v62, 0.0 }
 0x2ec   : > { %v4562_v14 = vmax.f32 %v4530_v19, 0.0  ;;  %v10239_v7 = vpop.f32.mrb[2].mxu0 }
 0x2ed   : > { %4634 = vst.msk [vmem:[#allocation2 + $0x19] sm:$0xff] %vm4594_vm0, %v4563_v1  ;;  %v4533_v39 = vadd.f32 %v10239_v7, %v12851_v24  ;;  %v4342_v54 = vpop.f32.mrb[3].mxu0 }
 0x2ee   : > { %4633 = vst.msk [vmem:[#allocation2 + $0x11] sm:$0xff] %vm4594_vm0, %v4562_v14  ;;  %v4532_v26 = vadd.f32 %v12851_v24, %v4342_v54 }
 0x2ef   : > { %v4565_v45 = vmax.f32 %v4533_v39, 0.0 }
 0x2f0   : > { %v4564_v15 = vmax.f32 %v4532_v26, 0.0  ;;  %v10242_v18 = vpop.f32.mrb[4].mxu0 }
 0x2f1   : > { %4636 = vst.msk [vmem:[#allocation2 + $0x29] sm:$0xff] %vm4594_vm0, %v4565_v45  ;;  %v4535_v17 = vadd.f32 %v10242_v18, %v12851_v24  ;;  %v4352_v6 = vpop.f32.mrb[5].mxu0 }
 0x2f2   : > { %4635 = vst.msk [vmem:[#allocation2 + $0x21] sm:$0xff] %vm4594_vm0, %v4564_v15  ;;  %v4534_v31 = vadd.f32 %v12851_v24, %v4352_v6 }
 0x2f3   : > { %v4567_v23 = vmax.f32 %v4535_v17, 0.0 }
 0x2f4   : > { %v4566_v12 = vmax.f32 %v4534_v31, 0.0  ;;  %v10245_v55 = vpop.f32.mrb[6].mxu0  ;;  %v12871_v61 = vld [vmem:[#allocation2 + $0x19] sm:$0xff] }
 0x2f5   : > { %4638 = vst.msk [vmem:[#allocation2 + $0x39] sm:$0xff] %vm4594_vm0, %v4567_v23  ;;  %v4537_v8 = vadd.f32 %v10245_v55, %v12851_v24  ;;  %v4362_v4 = vpop.f32.mrb[7].mxu0  ;;  %v12865_v20 = vld [vmem:[#allocation2 + $0x11] sm:$0xff]  ;;  %14574 = vst [vmem:[#allocation6_spill] sm:$0xff] %v12871_v61 }
 0x2f6   : > { %14573 = vst [vmem:[#allocation5_spill] sm:$0xff] %v12865_v20  ;;  %4637 = vst.msk [vmem:[#allocation2 + $0x31] sm:$0xff] %vm4594_vm0, %v4566_v12  ;;  %v4536_v51 = vadd.f32 %v12851_v24, %v4362_v4  ;;  %10293 = vmatprep.mubr.msk.f32.mxu1 %vm4594_vm0, %v12865_v20 }
 0x2f7   : > { %v4569_v0 = vmax.f32 %v4537_v8, 0.0  ;;  %10294 = vmatmul.mubr.msk.f32.gmra.mrb[2].mxu1 %vm4594_vm0, %v12871_v61 }
 0x2f8   : > { %v4568_v3 = vmax.f32 %v4536_v51, 0.0  ;;  %v10248_v40 = vpop.f32.mrb[8].mxu0  ;;  %v12883_v41 = vld [vmem:[#allocation2 + $0x29] sm:$0xff] }
 0x2f9   : > { %4640 = vst.msk [vmem:[#allocation2 + $0x49] sm:$0xff] %vm4594_vm0, %v4569_v0  ;;  %v4539_v46 = vadd.f32 %v10248_v40, %v12851_v24  ;;  %v4372_v37 = vpop.f32.mrb[9].mxu0  ;;  %v12877_v32 = vld [vmem:[#allocation2 + $0x21] sm:$0xff]  ;;  %14576 = vst [vmem:[#allocation8_spill] sm:$0xff] %v12883_v41 }
 0x2fa   : > { %14575 = vst [vmem:[#allocation7_spill] sm:$0xff] %v12877_v32  ;;  %4639 = vst.msk [vmem:[#allocation2 + $0x41] sm:$0xff] %vm4594_vm0, %v4568_v3  ;;  %v4538_v62 = vadd.f32 %v12851_v24, %v4372_v37  ;;  %10296 = vmatprep.mubr.msk.f32.mxu1 %vm4594_vm0, %v12877_v32 }
 0x2fb   : > { %v4571_v19 = vmax.f32 %v4539_v46, 0.0  ;;  %10297 = vmatmul.mubr.msk.f32.gmra.mrb[4].mxu1 %vm4594_vm0, %v12883_v41 }
 0x2fc   : > { %v4570_v1 = vmax.f32 %v4538_v62, 0.0  ;;  %v10251_v14 = vpop.f32.mrb[10].mxu0  ;;  %v12895_v45 = vld [vmem:[#allocation2 + $0x39] sm:$0xff] }
 0x2fd   : > { %4642 = vst.msk [vmem:[#allocation2 + $0x59] sm:$0xff] %vm4594_vm0, %v4571_v19  ;;  %v4541_v7 = vadd.f32 %v10251_v14, %v12851_v24  ;;  %v4382_v39 = vpop.f32.mrb[11].mxu0  ;;  %v12889_v54 = vld [vmem:[#allocation2 + $0x31] sm:$0xff]  ;;  %14578 = vst [vmem:[#allocation10_spill] sm:$0xff] %v12895_v45 }
 0x2fe   : > { %14577 = vst [vmem:[#allocation9_spill] sm:$0xff] %v12889_v54  ;;  %4641 = vst.msk [vmem:[#allocation2 + $0x51] sm:$0xff] %vm4594_vm0, %v4570_v1  ;;  %v4540_v26 = vadd.f32 %v12851_v24, %v4382_v39  ;;  %10299 = vmatprep.mubr.msk.f32.mxu1 %vm4594_vm0, %v12889_v54 }
 0x2ff   : > { %v4573_v15 = vmax.f32 %v4541_v7, 0.0  ;;  %10300 = vmatmul.mubr.msk.f32.gmra.mrb[6].mxu1 %vm4594_vm0, %v12895_v45 }
 0x300   : > { %v4572_v18 = vmax.f32 %v4540_v26, 0.0  ;;  %v10254_v17 = vpop.f32.mrb[12].mxu0  ;;  %v12907_v55 = vld [vmem:[#allocation2 + $0x49] sm:$0xff] }
 0x301   : > { %4644 = vst.msk [vmem:[#allocation2 + $0x69] sm:$0xff] %vm4594_vm0, %v4573_v15  ;;  %v4543_v6 = vadd.f32 %v10254_v17, %v12851_v24  ;;  %v4392_v31 = vpop.f32.mrb[13].mxu0  ;;  %v12901_v23 = vld [vmem:[#allocation2 + $0x41] sm:$0xff]  ;;  %14580 = vst [vmem:[#allocation12_spill] sm:$0xff] %v12907_v55 }
 0x302   : > { %14579 = vst [vmem:[#allocation11_spill] sm:$0xff] %v12901_v23  ;;  %4643 = vst.msk [vmem:[#allocation2 + $0x61] sm:$0xff] %vm4594_vm0, %v4572_v18  ;;  %v4542_v12 = vadd.f32 %v12851_v24, %v4392_v31  ;;  %10302 = vmatprep.mubr.msk.f32.mxu1 %vm4594_vm0, %v12901_v23 }
 0x303   : > { %v4575_v8 = vmax.f32 %v4543_v6, 0.0  ;;  %10303 = vmatmul.mubr.msk.f32.gmra.mrb[8].mxu1 %vm4594_vm0, %v12907_v55 }
 0x304   : > { %v4574_v4 = vmax.f32 %v4542_v12, 0.0  ;;  %v10257_v51 = vpop.f32.mrb[14].mxu0  ;;  %v12919_v37 = vld [vmem:[#allocation2 + $0x59] sm:$0xff] }
 0x305   : > { %4646 = vst.msk [vmem:[#allocation2 + $0x79] sm:$0xff] %vm4594_vm0, %v4575_v8  ;;  %v4545_v0 = vadd.f32 %v10257_v51, %v12851_v24  ;;  %v4402_v3 = vpop.f32.mrb[15].mxu0  ;;  %v12913_v40 = vld [vmem:[#allocation2 + $0x51] sm:$0xff]  ;;  %14582 = vst [vmem:[#allocation14_spill] sm:$0xff] %v12919_v37 }
 0x306   : > { %14581 = vst [vmem:[#allocation13_spill] sm:$0xff] %v12913_v40  ;;  %4645 = vst.msk [vmem:[#allocation2 + $0x71] sm:$0xff] %vm4594_vm0, %v4574_v4  ;;  %v4544_v46 = vadd.f32 %v12851_v24, %v4402_v3  ;;  %10305 = vmatprep.mubr.msk.f32.mxu1 %vm4594_vm0, %v12913_v40 }
 0x307   : > { %v4577_v62 = vmax.f32 %v4545_v0, 0.0  ;;  %10306 = vmatmul.mubr.msk.f32.gmra.mrb[10].mxu1 %vm4594_vm0, %v12919_v37 }
 0x308   : > { %v4576_v19 = vmax.f32 %v4544_v46, 0.0  ;;  %v10260_v1 = vpop.f32.mrb[16].mxu0  ;;  %v12931_v15 = vld [vmem:[#allocation2 + $0x69] sm:$0xff] }
 0x309   : > { %4648 = vst.msk [vmem:[#allocation2 + $0x89] sm:$0xff] %vm4594_vm0, %v4577_v62  ;;  %v4547_v14 = vadd.f32 %v10260_v1, %v12851_v24  ;;  %v4412_v7 = vpop.f32.mrb[17].mxu0  ;;  %v12925_v39 = vld [vmem:[#allocation2 + $0x61] sm:$0xff]  ;;  %14584 = vst [vmem:[#allocation16_spill] sm:$0xff] %v12931_v15 }
 0x30a   : > { %14583 = vst [vmem:[#allocation15_spill] sm:$0xff] %v12925_v39  ;;  %4647 = vst.msk [vmem:[#allocation2 + $0x81] sm:$0xff] %vm4594_vm0, %v4576_v19  ;;  %v4546_v26 = vadd.f32 %v12851_v24, %v4412_v7  ;;  %10308 = vmatprep.mubr.msk.f32.mxu1 %vm4594_vm0, %v12925_v39 }
 0x30b   : > { %v4579_v18 = vmax.f32 %v4547_v14, 0.0  ;;  %10309 = vmatmul.mubr.msk.f32.gmra.mrb[12].mxu1 %vm4594_vm0, %v12931_v15 }
 0x30c   : > { %v4578_v17 = vmax.f32 %v4546_v26, 0.0  ;;  %v10263_v6 = vpop.f32.mrb[18].mxu0  ;;  %v12943_v51 = vld [vmem:[#allocation2 + $0x79] sm:$0xff] }
 0x30d   : > { %4650 = vst.msk [vmem:[#allocation2 + $0x99] sm:$0xff] %vm4594_vm0, %v4579_v18  ;;  %v4549_v31 = vadd.f32 %v10263_v6, %v12851_v24  ;;  %v4422_v12 = vpop.f32.mrb[19].mxu0  ;;  %v12937_v8 = vld [vmem:[#allocation2 + $0x71] sm:$0xff]  ;;  %14586 = vst [vmem:[#allocation18_spill] sm:$0xff] %v12943_v51 }
 0x30e   : > { %14585 = vst [vmem:[#allocation17_spill] sm:$0xff] %v12937_v8  ;;  %4649 = vst.msk [vmem:[#allocation2 + $0x91] sm:$0xff] %vm4594_vm0, %v4578_v17  ;;  %v4548_v4 = vadd.f32 %v12851_v24, %v4422_v12  ;;  %10311 = vmatprep.mubr.msk.f32.mxu1 %vm4594_vm0, %v12937_v8 }
 0x30f   : > { %v4581_v0 = vmax.f32 %v4549_v31, 0.0  ;;  %10312 = vmatmul.mubr.msk.f32.gmra.mrb[14].mxu1 %vm4594_vm0, %v12943_v51 }
 0x310   : > { %v4580_v3 = vmax.f32 %v4548_v4, 0.0  ;;  %v10266_v46 = vpop.f32.mrb[20].mxu0  ;;  %v12955_v7 = vld [vmem:[#allocation2 + $0x89] sm:$0xff] }
 0x311   : > { %4652 = vst.msk [vmem:[#allocation2 + $0xa9] sm:$0xff] %vm4594_vm0, %v4581_v0  ;;  %v4551_v62 = vadd.f32 %v10266_v46, %v12851_v24  ;;  %v4432_v19 = vpop.f32.mrb[21].mxu0  ;;  %v12949_v1 = vld [vmem:[#allocation2 + $0x81] sm:$0xff]  ;;  %14588 = vst [vmem:[#allocation20_spill] sm:$0xff] %v12955_v7 }
 0x312   : > { %14587 = vst [vmem:[#allocation19_spill] sm:$0xff] %v12949_v1  ;;  %4651 = vst.msk [vmem:[#allocation2 + $0xa1] sm:$0xff] %vm4594_vm0, %v4580_v3  ;;  %v4550_v14 = vadd.f32 %v12851_v24, %v4432_v19  ;;  %10314 = vmatprep.mubr.msk.f32.mxu1 %vm4594_vm0, %v12949_v1  ;;  %v13125_v1 = vld [vmem:[#allocation2 + $0x78] sm:$0xff]  ;;  %v13135_v8 = vld [vmem:[#allocation2 + $0x88] sm:$0xff] }
 0x313   : > { %v4583_v26 = vmax.f32 %v4551_v62, 0.0  ;;  %10315 = vmatmul.mubr.msk.f32.gmra.mrb[16].mxu1 %vm4594_vm0, %v12955_v7  ;;  %v13123_v7 = vld [vmem:[#allocation2 + $0x80] sm:$0xff] }
 0x314   : > { %v4582_v18 = vmax.f32 %v4550_v14, 0.0  ;;  %v10269_v17 = vpop.f32.mrb[22].mxu0  ;;  %v12967_v0 = vld [vmem:[#allocation2 + $0x99] sm:$0xff] }
 0x315   : > { %4654 = vst.msk [vmem:[#allocation2 + $0xb9] sm:$0xff] %vm4594_vm0, %v4583_v26  ;;  %v4553_v6 = vadd.f32 %v10269_v17, %v12851_v24  ;;  %v4442_v31 = vpop.f32.mrb[23].mxu0  ;;  %v12961_v12 = vld [vmem:[#allocation2 + $0x91] sm:$0xff]  ;;  %14590 = vst [vmem:[#allocation22_spill] sm:$0xff] %v12967_v0 }
 0x316   : > { %14589 = vst [vmem:[#allocation21_spill] sm:$0xff] %v12961_v12  ;;  %4653 = vst.msk [vmem:[#allocation2 + $0xb1] sm:$0xff] %vm4594_vm0, %v4582_v18  ;;  %v4552_v4 = vadd.f32 %v12851_v24, %v4442_v31  ;;  %10317 = vmatprep.mubr.msk.f32.mxu1 %vm4594_vm0, %v12961_v12  ;;  %v13115_v12 = vld [vmem:[#allocation2 + $0x68] sm:$0xff]  ;;  %v13133_v51 = vld [vmem:[#allocation2 + $0x90] sm:$0xff] }
 0x317   : > { %v4585_v3 = vmax.f32 %v4553_v6, 0.0  ;;  %10318 = vmatmul.mubr.msk.f32.gmra.mrb[18].mxu1 %vm4594_vm0, %v12967_v0  ;;  %v13113_v0 = vld [vmem:[#allocation2 + $0x70] sm:$0xff]  ;;  %v13145_v39 = vld [vmem:[#allocation2 + $0x98] sm:$0xff] }
 0x318   : > { %v4584_v46 = vmax.f32 %v4552_v4, 0.0  ;;  %v10272_v62 = vpop.f32.mrb[24].mxu0  ;;  %v12979_v17 = vld [vmem:[#allocation2 + $0xa9] sm:$0xff] }
 0x319   : > { %4656 = vst.msk [vmem:[#allocation2 + $0xc9] sm:$0xff] %vm4594_vm0, %v4585_v3  ;;  %v4555_v19 = vadd.f32 %v10272_v62, %v12851_v24  ;;  %v4452_v14 = vpop.f32.mrb[25].mxu0  ;;  %v12973_v26 = vld [vmem:[#allocation2 + $0xa1] sm:$0xff]  ;;  %14592 = vst [vmem:[#allocation24_spill] sm:$0xff] %v12979_v17 }
 0x31a   : > { %14591 = vst [vmem:[#allocation23_spill] sm:$0xff] %v12973_v26  ;;  %4655 = vst.msk [vmem:[#allocation2 + $0xc1] sm:$0xff] %vm4594_vm0, %v4584_v46  ;;  %v4554_v18 = vadd.f32 %v12851_v24, %v4452_v14  ;;  %10320 = vmatprep.mubr.msk.f32.mxu1 %vm4594_vm0, %v12973_v26  ;;  %v13143_v15 = vld [vmem:[#allocation2 + $0xa0] sm:$0xff]  ;;  %v13155_v40 = vld [vmem:[#allocation2 + $0xa8] sm:$0xff] }
 0x31b   : > { %v4587_v6 = vmax.f32 %v4555_v19, 0.0  ;;  %10321 = vmatmul.mubr.msk.f32.gmra.mrb[20].mxu1 %vm4594_vm0, %v12979_v17 }
 0x31c   : > { %v4586_v31 = vmax.f32 %v4554_v18, 0.0  ;;  %v10275_v4 = vpop.f32.mrb[26].mxu0  ;;  %v12991_v19 = vld [vmem:[#allocation2 + $0xb9] sm:$0xff] }
 0x31d   : > { %4658 = vst.msk [vmem:[#allocation2 + $0xd9] sm:$0xff] %vm4594_vm0, %v4587_v6  ;;  %v4557_v3 = vadd.f32 %v10275_v4, %v12851_v24  ;;  %v4462_v62 = vpop.f32.mrb[27].mxu0  ;;  %v12985_v60 = vld [vmem:[#allocation2 + $0xb1] sm:$0xff]  ;;  %14594 = vst [vmem:[#allocation26_spill] sm:$0xff] %v12991_v19 }
 0x31e   : > { %14593 = vst [vmem:[#allocation25_spill] sm:$0xff] %v12985_v60  ;;  %4657 = vst.msk [vmem:[#allocation2 + $0xd1] sm:$0xff] %vm4594_vm0, %v4586_v31  ;;  %v4556_v46 = vadd.f32 %v12851_v24, %v4462_v62  ;;  %10323 = vmatprep.mubr.msk.f32.mxu1 %vm4594_vm0, %v12985_v60  ;;  %v13153_v37 = vld [vmem:[#allocation2 + $0xb0] sm:$0xff]  ;;  %v13165_v23 = vld [vmem:[#allocation2 + $0xb8] sm:$0xff] }
 0x31f   : > { %v4589_v14 = vmax.f32 %v4557_v3, 0.0  ;;  %10324 = vmatmul.mubr.msk.f32.gmra.mrb[22].mxu1 %vm4594_vm0, %v12991_v19  ;;  %v13327_v5 = vld [vmem:[#allocation2 + $0xb2] sm:$0xff] }
 0x320   : > { %v4588_v18 = vmax.f32 %v4556_v46, 0.0  ;;  %v10278_v6 = vpop.f32.mrb[28].mxu0  ;;  %v13003_v3 = vld [vmem:[#allocation2 + $0xc9] sm:$0xff]  ;;  %14632 = vst [vmem:[#allocation49_spill] sm:$0xff] %v13327_v5 }
 0x321   : > { %4660 = vst.msk [vmem:[#allocation2 + $0xe9] sm:$0xff] %vm4594_vm0, %v4589_v14  ;;  %v4559_v4 = vadd.f32 %v10278_v6, %v12851_v24  ;;  %v4472_v17 = vpop.f32.mrb[29].mxu0  ;;  %v12997_v26 = vld [vmem:[#allocation2 + $0xc1] sm:$0xff]  ;;  %14596 = vst [vmem:[#allocation28_spill] sm:$0xff] %v13003_v3 }
 0x322   : > { %14595 = vst [vmem:[#allocation27_spill] sm:$0xff] %v12997_v26  ;;  %4659 = vst.msk [vmem:[#allocation2 + $0xe1] sm:$0xff] %vm4594_vm0, %v4588_v18  ;;  %v4558_v31 = vadd.f32 %v12851_v24, %v4472_v17  ;;  %10326 = vmatprep.mubr.msk.f32.mxu1 %vm4594_vm0, %v12997_v26  ;;  %v13105_v26 = vld [vmem:[#allocation2 + $0x58] sm:$0xff]  ;;  %v13163_v55 = vld [vmem:[#allocation2 + $0xc0] sm:$0xff] }
 0x323   : > { %v4591_v62 = vmax.f32 %v4559_v4, 0.0  ;;  %10327 = vmatmul.mubr.msk.f32.gmra.mrb[24].mxu1 %vm4594_vm0, %v13003_v3  ;;  %v13103_v3 = vld [vmem:[#allocation2 + $0x60] sm:$0xff]  ;;  %v13175_v54 = vld [vmem:[#allocation2 + $0xc8] sm:$0xff] }
 0x324   : > { %v4590_v46 = vmax.f32 %v4558_v31, 0.0  ;;  %v10281_v14 = vpop.f32.mrb[30].mxu0  ;;  %v13015_v18 = vld [vmem:[#allocation2 + $0xd9] sm:$0xff] }
 0x325   : > { %4662 = vst.msk [vmem:[#allocation2 + $0xf9] sm:$0xff] %vm4594_vm0, %v4591_v62  ;;  %v4561_v6 = vadd.f32 %v10281_v14, %v12851_v24  ;;  %v4482_v19 = vpop.f32.mrb[31].mxu0  ;;  %v13009_v60 = vld [vmem:[#allocation2 + $0xd1] sm:$0xff]  ;;  %14598 = vst [vmem:[#allocation57_spill] sm:$0xff] %v13015_v18 }
 0x326   : > { %14597 = vst [vmem:[#allocation36_spill] sm:$0xff] %v13009_v60  ;;  %4661 = vst.msk [vmem:[#allocation2 + $0xf1] sm:$0xff] %vm4594_vm0, %v4590_v46  ;;  %v4560_v17 = vadd.f32 %v12851_v24, %v4482_v19  ;;  %10329 = vmatprep.mubr.msk.f32.mxu1 %vm4594_vm0, %v13009_v60  ;;  %v4665_v19 = vld [vmem:[#allocation2] sm:$0xff]  ;;  %v13095_v60 = vld [vmem:[#allocation2 + $0x48] sm:$0xff] }
 0x327   : > { %v4593_v4 = vmax.f32 %v4561_v6, 0.0  ;;  %10330 = vmatmul.mubr.msk.f32.gmra.mrb[26].mxu1 %vm4594_vm0, %v13015_v18  ;;  %v4697_v14 = vsel %vm14602_vm1, %v4665_v19, 0.0  ;;  %v13046_v19 = vld [vmem:[#allocation2 + $0x10] sm:$0xff]  ;;  %v13185_v32 = vld [vmem:[#allocation2 + $0xd8] sm:$0xff] }
 0x328   : > { %v4592_v31 = vmax.f32 %v4560_v17, 0.0  ;;  %v13025_v24 = vld [vmem:[#allocation2 + $0xe9] sm:$0xff]  ;;  %14609 = vst [vmem:[#allocation3_spill] sm:$0xff] %v13185_v32 }
 0x329   : > { %4664 = vst.msk [vmem:[#allocation2 + $0x109] sm:$0xff] %vm4594_vm0, %v4593_v4  ;;  %v13020_v62 = vld [vmem:[#allocation2 + $0xe1] sm:$0xff]  ;;  %14600 = vst [vmem:[#allocation66_spill] sm:$0xff] %v13025_v24  ;;  %v8952_v17 = vld [vmem:[%s14019_s3 + $0x50] sm:$0xff] }
 0x32a   : > { %14599 = vst [vmem:[#allocation63_spill] sm:$0xff] %v13020_v62  ;;  %4663 = vst.msk [vmem:[#allocation2 + $0x101] sm:$0xff] %vm4594_vm0, %v4592_v31  ;;  %10332 = vmatprep.mubr.msk.f32.mxu1 %vm4594_vm0, %v13020_v62  ;;  %v8953_v4 = vld [vmem:[%s14019_s3 + $0x58] sm:$0xff]  ;;  %v4666_v31 = vld [vmem:[#allocation2 + $0x8] sm:$0xff] }
 0x32b   : > { %10333 = vmatmul.mubr.msk.f32.gmra.mrb[28].mxu1 %vm4594_vm0, %v13025_v24  ;;  %v10817_v24 = vpack.c.bf16 %v8953_v4, %v8952_v17  ;;  %v8987_v62 = vld [vmem:[%s14019_s3 + $0x68] sm:$0xff]  ;;  %v13064_v4 = vld [vmem:[#allocation2 + $0x18] sm:$0xff]  ;;  %v13072_v18 = vld [vmem:[#allocation2 + $0x30] sm:$0xff] }
 0x32c   : > { %v13035_v6 = vld [vmem:[#allocation2 + $0xf9] sm:$0xff]  ;;  %v13173_v45 = vld [vmem:[#allocation2 + $0xd0] sm:$0xff]  ;;  %v13195_v20 = vld [vmem:[#allocation2 + $0xe8] sm:$0xff] }
 0x32d   : > { %v13029_v46 = vld [vmem:[#allocation2 + $0xf1] sm:$0xff]  ;;  %14603 = vst [vmem:[#allocation69_spill] sm:$0xff] %v13035_v6  ;;  %v13183_v41 = vld [vmem:[#allocation2 + $0xe0] sm:$0xff]  ;;  %14611 = vst [vmem:[#allocation37_spill] sm:$0xff] %v13195_v20 }
 0x32e   : > { %14601 = vst [vmem:[#allocation67_spill] sm:$0xff] %v13029_v46  ;;  %10335 = vmatprep.mubr.msk.f32.mxu1 %vm4594_vm0, %v13029_v46  ;;  %v8986_v46 = vld [vmem:[%s14019_s3 + $0x60] sm:$0xff]  ;;  %14608 = vst [vmem:[#allocation73_spill] sm:$0xff] %v13183_v41  ;;  %v13193_v61 = vld [vmem:[#allocation2 + $0xf0] sm:$0xff] }
 0x32f   : > { %10336 = vmatmul.mubr.msk.f32.gmra.mrb[30].mxu1 %vm4594_vm0, %v13035_v6  ;;  %v4699_v6 = vsel %vm11647_vm3, %v13046_v19, 0.0  ;;  %v13062_v17 = vpack.c.bf16 %v8987_v62, %v8986_v46  ;;  %v4703_v62 = vsel %vm11687_vm5, %v13072_v18, 0.0  ;;  %v13083_v46 = vld [vmem:[#allocation2 + $0x40] sm:$0xff]  ;;  %14610 = vst [vmem:[#allocation4_spill] sm:$0xff] %v13193_v61 }
 0x330   : > { %10346 = vmatprep.mubr.msk.f32.mxu1 %vm4594_vm0, %v4697_v14  ;;  %v13060_v14 = vld [vmem:[#allocation2 + $0x20] sm:$0xff] }
 0x331   : > { %v13357_v35 = vld [vmem:[#allocation2 + $0xe2] sm:$0xff] }
 0x332   : > { %14637 = vst [vmem:[#allocation55_spill] sm:$0xff] %v13357_v35 }
 0x333   : > { %10347 = vmatmul.mubr.msk.f32.vlgmr.msra.gmra.mrb[0].mxu1 %vm4594_vm0, %v4666_v31  ;;  %v4701_v31 = vsel %vm11662_vm4, %v13060_v14, 0.0 }
 0x334   : > { %10816 = vmatpush3.bf16.msra.mxu1 %v12845_v27  ;;  %10349 = vmatprep.mubr.msk.f32.mxu1 %vm4594_vm0, %v4699_v6  ;;  %v13075_v27 = vld [vmem:[#allocation2 + $0x28] sm:$0xff]  ;;  %v13085_v6 = vld [vmem:[#allocation2 + $0x38] sm:$0xff] }
 0x335   : > { %10818 = vmatprep.subr.bf16.mxu1 %v10817_v24 }
 0x337   : > { %10350 = vmatmul.mubr.msk.f32.gmra.mrb[2].mxu1 %vm4594_vm0, %v13064_v4 }
 0x338   : > { %10352 = vmatprep.mubr.msk.f32.mxu1 %vm4594_vm0, %v4701_v31  ;;  %10820 = vmatpush3.bf16.msra.mxu1 %v10817_v24  ;;  %v4705_v24 = vsel %vm11704_vm6, %v13083_v46, 0.0  ;;  %v13093_v31 = vld [vmem:[#allocation2 + $0x50] sm:$0xff] }
 0x339   : > { %10822 = vmatprep.subr.bf16.mxu1 %v13062_v17  ;;  %v7106_v44 = vsel %vm11687_vm5, %v13093_v31, 0.0 }
 0x33b   : > { %10353 = vmatmul.mubr.msk.f32.gmra.mrb[4].mxu1 %vm4594_vm0, %v13075_v27 }
 0x33c   : > { %10355 = vmatprep.mubr.msk.f32.mxu1 %vm4594_vm0, %v4703_v62  ;;  %v4707_v62 = vsel %vm11721_vm7, %v13093_v31, 0.0 }
 0x33f   : > { %10356 = vmatmul.mubr.msk.f32.gmra.mrb[6].mxu1 %vm4594_vm0, %v13085_v6 }
 0x340   : > { %10358 = vmatprep.mubr.msk.f32.mxu1 %vm4594_vm0, %v4705_v24  ;;  %v4709_v24 = vsel %vm11738_vm8, %v13103_v3, 0.0 }
 0x343   : > { %10359 = vmatmul.mubr.msk.f32.gmra.mrb[8].mxu1 %vm4594_vm0, %v13095_v60 }
 0x344   : > { %10361 = vmatprep.mubr.msk.f32.mxu1 %vm4594_vm0, %v4707_v62  ;;  %v4711_v62 = vsel %vm11755_vm9, %v13113_v0, 0.0  ;;  %vm14604_vm9 = vnez %v14337_v48 }
 0x347   : > { %10362 = vmatmul.mubr.msk.f32.gmra.mrb[10].mxu1 %vm4594_vm0, %v13105_v26 }
 0x348   : > { %10364 = vmatprep.mubr.msk.f32.mxu1 %vm4594_vm0, %v4709_v24  ;;  %v4713_v24 = vsel %vm11772_vm10, %v13123_v7, 0.0  ;;  %vm14605_vm10 = vnez %v14339_v42 }
 0x34b   : > { %10365 = vmatmul.mubr.msk.f32.gmra.mrb[12].mxu1 %vm4594_vm0, %v13115_v12 }
 0x34c   : > { %10367 = vmatprep.mubr.msk.f32.mxu1 %vm4594_vm0, %v4711_v62  ;;  %v4715_v62 = vsel %vm14604_vm9, %v13133_v51, 0.0  ;;  %vm14606_vm9 = vnez %v14341_v33 }
 0x34f   : > { %10368 = vmatmul.mubr.msk.f32.gmra.mrb[14].mxu1 %vm4594_vm0, %v13125_v1 }
 0x350   : > { %10370 = vmatprep.mubr.msk.f32.mxu1 %vm4594_vm0, %v4713_v24  ;;  %v4717_v24 = vsel %vm14605_vm10, %v13143_v15, 0.0  ;;  %vm14607_vm10 = vnez %v14344_v29  ;;  %v13223_v29 = vld [vmem:[#allocation2 + $0x12] sm:$0xff] }
 0x353   : > { %10371 = vmatmul.mubr.msk.f32.gmra.mrb[16].mxu1 %vm4594_vm0, %v13135_v8 }
 0x354   : > { %10373 = vmatprep.mubr.msk.f32.mxu1 %vm4594_vm0, %v4715_v62  ;;  %v4719_v62 = vsel %vm14606_vm9, %v13153_v37, 0.0 }
 0x357   : > { %10374 = vmatmul.mubr.msk.f32.gmra.mrb[18].mxu1 %vm4594_vm0, %v13145_v39 }
 0x358   : > { %10376 = vmatprep.mubr.msk.f32.mxu1 %vm4594_vm0, %v4717_v24  ;;  %v4721_v24 = vsel %vm14607_vm10, %v13163_v55, 0.0 }
 0x35b   : > { %10377 = vmatmul.mubr.msk.f32.gmra.mrb[20].mxu1 %vm4594_vm0, %v13155_v40 }
 0x35c   : > { %10379 = vmatprep.mubr.msk.f32.mxu1 %vm4594_vm0, %v4719_v62  ;;  %v4723_v62 = vsel %vm14522_vm12, %v13173_v45, 0.0  ;;  %vm14612_vm12 = vnez %v14524_v56 }
 0x35f   : > { %10380 = vmatmul.mubr.msk.f32.gmra.mrb[22].mxu1 %vm4594_vm0, %v13165_v23 }
 0x360   : > { %10382 = vmatprep.mubr.msk.f32.mxu1 %vm4594_vm0, %v4721_v24  ;;  %v4725_v24 = vsel %vm14523_vm2, %v13183_v41, 0.0  ;;  %v9023_v41 = vld [vmem:[%s14019_s3 + $0x88] sm:$0xff]  ;;  %vm14616_vm2 = vnez %v14538_v36  ;;  %v13267_v36 = vld [vmem:[#allocation2 + $0x52] sm:$0xff] }
 0x361   : > { %14621 = vst [vmem:[#allocation42_spill] sm:$0xff] %v13267_v36 }
 0x363   : > { %10383 = vmatmul.mubr.msk.f32.gmra.mrb[24].mxu1 %vm4594_vm0, %v13175_v54 }
 0x364   : > { %10385 = vmatprep.mubr.msk.f32.mxu1 %vm4594_vm0, %v4723_v62  ;;  %v4727_v62 = vsel %vm14612_vm12, %v13193_v61, 0.0  ;;  %vm14614_vm12 = vnez %v14532_v16  ;;  %v9022_v61 = vld [vmem:[%s14019_s3 + $0x80] sm:$0xff] }
 0x367   : > { %10386 = vmatmul.mubr.msk.f32.gmra.mrb[26].mxu1 %vm4594_vm0, %v13185_v32  ;;  %v13203_v32 = vld [vmem:[#allocation2 + $0xf8] sm:$0xff] }
 0x368   : > { %10388 = vmatprep.mubr.msk.f32.mxu1 %vm4594_vm0, %v4725_v24  ;;  %14613 = vst [vmem:[#allocation39_spill] sm:$0xff] %v13203_v32  ;;  %v8988_v24 = vld [vmem:[%s14019_s3 + $0x70] sm:$0xff] }
 0x369   : > { %v10825_v56 = vpack.c.bf16 %v8989_v22, %v8988_v24  ;;  %v13230_v22 = vpack.c.bf16 %v9023_v41, %v9022_v61  ;;  %v13238_v24 = vld [vmem:[#allocation2 + $0x2a] sm:$0xff]  ;;  %v13247_v41 = vld [vmem:[#allocation2 + $0x32] sm:$0xff] }
 0x36a   : > { %v5449_v61 = vsel %vm14616_vm2, %v13238_v24, 0.0  ;;  %14617 = vst [vmem:[#allocation34_spill] sm:$0xff] %v13247_v41  ;;  %vm14620_vm2 = vnez %v14546_v58  ;;  %v13287_v58 = vld [vmem:[#allocation2 + $0x72] sm:$0xff] }
 0x36b   : > { %10389 = vmatmul.mubr.msk.f32.gmra.mrb[28].mxu1 %vm4594_vm0, %v13195_v20  ;;  %v5413_v20 = vld [vmem:[#allocation2 + $0xa] sm:$0xff]  ;;  %14625 = vst [vmem:[#allocation43_spill] sm:$0xff] %v13287_v58 }
 0x36c   : > { %10391 = vmatprep.mubr.msk.f32.mxu1 %vm4594_vm0, %v4727_v62  ;;  %v5445_v62 = vsel %vm14614_vm12, %v5413_v20, 0.0  ;;  %vm14615_vm12 = vnez %v14535_v59  ;;  %v13236_v20 = vld [vmem:[#allocation2 + $0x22] sm:$0xff] }
 0x36f   : > { %10392 = vmatmul.mubr.msk.f32.gmra.mrb[30].mxu1 %vm4594_vm0, %v13203_v32  ;;  %v13225_v32 = vld [vmem:[#allocation2 + $0x1a] sm:$0xff] }
 0x370   : > { %10402 = vmatprep.mubr.msk.f32.mxu1 %vm4594_vm0, %v5412_v25  ;;  %v5447_v25 = vsel %vm14615_vm12, %v13225_v32, 0.0  ;;  %vm14618_vm12 = vnez %v14542_v10  ;;  %v13277_v10 = vld [vmem:[#allocation2 + $0x62] sm:$0xff] }
 0x371   : > { %14623 = vst [vmem:[#allocation35_spill] sm:$0xff] %v13277_v10 }
 0x373   : > { %10403 = vmatmul.mubr.msk.f32.vlgmr.msra.gmra.mrb[0].mxu1 %vm4594_vm0, %v5445_v62 }
 0x374   : > { %10824 = vmatpush3.bf16.msra.mxu1 %v13062_v17  ;;  %10405 = vmatprep.mubr.msk.f32.mxu1 %vm4594_vm0, %v13223_v29  ;;  %v13249_v17 = vld [vmem:[#allocation2 + $0x3a] sm:$0xff] }
 0x375   : > { %10826 = vmatprep.subr.bf16.mxu1 %v10825_v56  ;;  %v5451_v62 = vsel %vm14618_vm12, %v13249_v17, 0.0  ;;  %vm14622_vm12 = vnez %v14550_v34  ;;  %v13297_v34 = vld [vmem:[#allocation2 + $0x82] sm:$0xff] }
 0x376   : > { %14627 = vst [vmem:[#allocation45_spill] sm:$0xff] %v13297_v34 }
 0x377   : > { %10406 = vmatmul.mubr.msk.f32.gmra.mrb[2].mxu1 %vm4594_vm0, %v5447_v25  ;;  %v13259_v25 = vld [vmem:[#allocation2 + $0x4a] sm:$0xff] }
 0x378   : > { %10408 = vmatprep.mubr.msk.f32.mxu1 %vm4594_vm0, %v13236_v20  ;;  %10828 = vmatpush3.bf16.msra.mxu1 %v10825_v56  ;;  %v13257_v56 = vld [vmem:[#allocation2 + $0x42] sm:$0xff] }
 0x379   : > { %10830 = vmatprep.subr.bf16.mxu1 %v13230_v22  ;;  %14619 = vst [vmem:[#allocation40_spill] sm:$0xff] %v13257_v56 }
 0x37b   : > { %10409 = vmatmul.mubr.msk.f32.gmra.mrb[4].mxu1 %vm4594_vm0, %v5449_v61  ;;  %v5453_v61 = vsel %vm14620_vm2, %v13259_v25, 0.0  ;;  %vm14624_vm2 = vnez %v14553_v49  ;;  %v13307_v49 = vld [vmem:[#allocation2 + $0x92] sm:$0xff] }
 0x37c   : > { %10411 = vmatprep.mubr.msk.f32.mxu1 %vm4594_vm0, %v13247_v41  ;;  %v13269_v41 = vld [vmem:[#allocation2 + $0x5a] sm:$0xff]  ;;  %14628 = vst [vmem:[#allocation46_spill] sm:$0xff] %v13307_v49 }
 0x37f   : > { %10412 = vmatmul.mubr.msk.f32.gmra.mrb[6].mxu1 %vm4594_vm0, %v5451_v62  ;;  %v5455_v62 = vsel %vm14622_vm12, %v13269_v41, 0.0  ;;  %vm14626_vm12 = vnez %v14557_v21  ;;  %v13317_v21 = vld [vmem:[#allocation2 + $0xa2] sm:$0xff] }
 0x380   : > { %10414 = vmatprep.mubr.msk.f32.mxu1 %vm4594_vm0, %v13257_v56  ;;  %v13279_v56 = vld [vmem:[#allocation2 + $0x6a] sm:$0xff]  ;;  %14630 = vst [vmem:[#allocation48_spill] sm:$0xff] %v13317_v21 }
 0x383   : > { %10415 = vmatmul.mubr.msk.f32.gmra.mrb[8].mxu1 %vm4594_vm0, %v5453_v61  ;;  %v5457_v61 = vsel %vm14624_vm2, %v13279_v56, 0.0 }
 0x384   : > { %10417 = vmatprep.mubr.msk.f32.mxu1 %vm4594_vm0, %v13267_v36  ;;  %v13289_v36 = vld [vmem:[#allocation2 + $0x7a] sm:$0xff] }
 0x387   : > { %10418 = vmatmul.mubr.msk.f32.gmra.mrb[10].mxu1 %vm4594_vm0, %v5455_v62  ;;  %v5459_v62 = vsel %vm14626_vm12, %v13289_v36, 0.0  ;;  %vm14629_vm12 = vnez %v14563_v52  ;;  %v13337_v52 = vld [vmem:[#allocation2 + $0xc2] sm:$0xff] }
 0x388   : > { %10420 = vmatprep.mubr.msk.f32.mxu1 %vm4594_vm0, %v13277_v10  ;;  %v13299_v10 = vld [vmem:[#allocation2 + $0x8a] sm:$0xff]  ;;  %14633 = vst [vmem:[#allocation51_spill] sm:$0xff] %v13337_v52 }
 0x38b   : > { %10421 = vmatmul.mubr.msk.f32.gmra.mrb[12].mxu1 %vm4594_vm0, %v5457_v61  ;;  %v5461_v61 = vsel %vm14561_vm11, %v13299_v10, 0.0  ;;  %vm14631_vm11 = vnez %v14565_v47  ;;  %v13347_v47 = vld [vmem:[#allocation2 + $0xd2] sm:$0xff] }
 0x38c   : > { %10423 = vmatprep.mubr.msk.f32.mxu1 %vm4594_vm0, %v13287_v58  ;;  %v13309_v58 = vld [vmem:[#allocation2 + $0x9a] sm:$0xff]  ;;  %14635 = vst [vmem:[#allocation52_spill] sm:$0xff] %v13347_v47 }
 0x38f   : > { %10424 = vmatmul.mubr.msk.f32.gmra.mrb[14].mxu1 %vm4594_vm0, %v5459_v62  ;;  %v5463_v62 = vsel %vm14629_vm12, %v13309_v58, 0.0 }
 0x390   : > { %10426 = vmatprep.mubr.msk.f32.mxu1 %vm4594_vm0, %v13297_v34  ;;  %v13319_v34 = vld [vmem:[#allocation2 + $0xaa] sm:$0xff] }
 0x393   : > { %10427 = vmatmul.mubr.msk.f32.gmra.mrb[16].mxu1 %vm4594_vm0, %v5461_v61  ;;  %v5465_v61 = vsel %vm14631_vm11, %v13319_v34, 0.0  ;;  %vm14634_vm11 = vnez %v14568_v9  ;;  %v13367_v9 = vld [vmem:[#allocation2 + $0xf2] sm:$0xff] }
 0x394   : > { %10429 = vmatprep.mubr.msk.f32.mxu1 %vm4594_vm0, %v13307_v49  ;;  %v13329_v49 = vld [vmem:[#allocation2 + $0xba] sm:$0xff]  ;;  %14639 = vst [vmem:[#allocation58_spill] sm:$0xff] %v13367_v9 }
 0x397   : > { %10430 = vmatmul.mubr.msk.f32.gmra.mrb[18].mxu1 %vm4594_vm0, %v5463_v62  ;;  %v5467_v62 = vsel %vm14510_vm14, %v13329_v49, 0.0 }
 0x398   : > { %10432 = vmatprep.mubr.msk.f32.mxu1 %vm4594_vm0, %v13317_v21  ;;  %v13339_v21 = vld [vmem:[#allocation2 + $0xca] sm:$0xff] }
 0x39b   : > { %10433 = vmatmul.mubr.msk.f32.gmra.mrb[20].mxu1 %vm4594_vm0, %v5465_v61  ;;  %v5469_v61 = vsel %vm14634_vm11, %v13339_v21, 0.0  ;;  %vm14638_vm11 = vnez %v14571_v13  ;;  %v9025_v13 = vld [vmem:[%s14019_s3 + $0x98] sm:$0xff] }
 0x39c   : > { %10435 = vmatprep.mubr.msk.f32.mxu1 %vm4594_vm0, %v13327_v5  ;;  %v13349_v5 = vld [vmem:[#allocation2 + $0xda] sm:$0xff] }
 0x39d   : > { %14636 = vst [vmem:[#allocation54_spill] sm:$0xff] %v13349_v5 }
 0x39f   : > { %10436 = vmatmul.mubr.msk.f32.gmra.mrb[22].mxu1 %vm4594_vm0, %v5467_v62  ;;  %v5471_v62 = vsel %vm14570_vm15, %v13349_v5, 0.0 }
 0x3a0   : > { %10438 = vmatprep.mubr.msk.f32.mxu1 %vm4594_vm0, %v13337_v52  ;;  %v13359_v52 = vld [vmem:[#allocation2 + $0xea] sm:$0xff] }
 0x3a3   : > { %10439 = vmatmul.mubr.msk.f32.gmra.mrb[24].mxu1 %vm4594_vm0, %v5469_v61  ;;  %v5473_v61 = vsel %vm14638_vm11, %v13359_v52, 0.0 }
 0x3a4   : > { %10441 = vmatprep.mubr.msk.f32.mxu1 %vm4594_vm0, %v13347_v47  ;;  %v13369_v47 = vld [vmem:[#allocation2 + $0xfa] sm:$0xff] }
 0x3a5   : > { %14640 = vst [vmem:[#allocation60_spill] sm:$0xff] %v13369_v47 }
 0x3a7   : > { %10442 = vmatmul.mubr.msk.f32.gmra.mrb[26].mxu1 %vm4594_vm0, %v5471_v62  ;;  %v5475_v62 = vsel %vm14572_vm13, %v13369_v47, 0.0  ;;  %v9059_v47 = vld [vmem:[%s14019_s3 + $0xa8] sm:$0xff] }
 0x3a8   : > { %10444 = vmatprep.mubr.msk.f32.mxu1 %vm4594_vm0, %v13357_v35 }
 0x3ab   : > { %10445 = vmatmul.mubr.msk.f32.gmra.mrb[28].mxu1 %vm4594_vm0, %v5473_v61  ;;  %v5866_v61 = vsel %vm14602_vm1, %v13046_v19, 0.0  ;;  %v5872_v19 = vsel %vm11687_vm5, %v13083_v46, 0.0  ;;  %vm14731_vm5 = vnez %v14331_v43 }
 0x3ac   : > { %10447 = vmatprep.mubr.msk.f32.mxu1 %vm4594_vm0, %v13367_v9  ;;  %v10833_v9 = vpack.c.bf16 %v9025_v13, %v9024_v11  ;;  %v10837_v11 = vpack.c.bf16 %v9059_v47, %v9058_v30  ;;  %v5870_v13 = vsel %vm11662_vm4, %v13072_v18, 0.0  ;;  %v5874_v30 = vsel %vm11704_vm6, %v13093_v31, 0.0  ;;  %v7493_v31 = vld [vmem:[#allocation2 + $0x39] sm:$0xff] }
 0x3ad   : > { %v5876_v47 = vsel %vm11721_vm7, %v13103_v3, 0.0  ;;  %vm14641_vm6 = vnez %v14333_v53  ;;  %vm14642_vm7 = vnez %v14335_v2  ;;  %v7112_v57 = vsel %vm14731_vm5, %v13123_v7, 0.0  ;;  %v14734_v2 = vld [vmem:[#allocation29_spill] sm:$0xff] }
 0x3af   : > { %10448 = vmatmul.mubr.msk.f32.gmra.mrb[30].mxu1 %vm4594_vm0, %v5475_v62  ;;  %v5868_v62 = vsel %vm11647_vm3, %v13060_v14, 0.0 }
 0x3b0   : > { %10458 = vmatprep.mubr.msk.f32.mxu1 %vm4594_vm0, %v5866_v61 }
 0x3b3   : > { %10459 = vmatmul.mubr.msk.f32.vlgmr.msra.gmra.mrb[0].mxu1 %vm4594_vm0, %v13064_v4  ;;  %v5880_v4 = vsel %vm14641_vm6, %v13123_v7, 0.0  ;;  %vm14644_vm6 = vnez %v14339_v42 }
 0x3b4   : > { %10832 = vmatpush3.bf16.msra.mxu1 %v13230_v22  ;;  %10461 = vmatprep.mubr.msk.f32.mxu1 %vm4594_vm0, %v5868_v62  ;;  %v5882_v22 = vsel %vm14642_vm7, %v13133_v51, 0.0  ;;  %v5886_v62 = vsel %vm14644_vm6, %v13153_v37, 0.0 }
 0x3b5   : > { %10834 = vmatprep.subr.bf16.mxu1 %v10833_v9 }
 0x3b7   : > { %10462 = vmatmul.mubr.msk.f32.gmra.mrb[2].mxu1 %vm4594_vm0, %v13075_v27 }
 0x3b8   : > { %10464 = vmatprep.mubr.msk.f32.mxu1 %vm4594_vm0, %v5870_v13  ;;  %10836 = vmatpush3.bf16.msra.mxu1 %v10833_v9  ;;  %v5878_v9 = vsel %vm11738_vm8, %v13113_v0, 0.0  ;;  %vm14643_vm8 = vnez %v14337_v48  ;;  %v5888_v13 = vsel %vm14606_vm9, %v13163_v55, 0.0  ;;  %v14736_v48 = vld [vmem:[#allocation3_spill] sm:$0xff] }
 0x3b9   : > { %10838 = vmatprep.subr.bf16.mxu1 %v10837_v11  ;;  %v5884_v61 = vsel %vm14643_vm8, %v13143_v15, 0.0  ;;  %v7118_v43 = vsel %vm14643_vm8, %v13153_v37, 0.0 }
 0x3bb   : > { %10465 = vmatmul.mubr.msk.f32.gmra.mrb[4].mxu1 %vm4594_vm0, %v13085_v6 }
 0x3bc   : > { %10467 = vmatprep.mubr.msk.f32.mxu1 %vm4594_vm0, %v5872_v19  ;;  %v13478_v19 = vld [vmem:[#allocation2 + $0x100] sm:$0xff] }
 0x3bd   : > { %14654 = vst [vmem:[#allocation61_spill] sm:$0xff] %v13478_v19 }
 0x3bf   : > { %10468 = vmatmul.mubr.msk.f32.gmra.mrb[6].mxu1 %vm4594_vm0, %v13095_v60 }
 0x3c0   : > { %10470 = vmatprep.mubr.msk.f32.mxu1 %vm4594_vm0, %v5874_v30  ;;  %v5890_v30 = vsel %vm14607_vm10, %v13173_v45, 0.0 }
 0x3c3   : > { %10471 = vmatmul.mubr.msk.f32.gmra.mrb[8].mxu1 %vm4594_vm0, %v13105_v26 }
 0x3c4   : > { %10473 = vmatprep.mubr.msk.f32.mxu1 %vm4594_vm0, %v5876_v47  ;;  %v14646_v47 = vld [vmem:[#allocation3_spill] sm:$0xff] }
 0x3c7   : > { %10474 = vmatmul.mubr.msk.f32.gmra.mrb[10].mxu1 %vm4594_vm0, %v13115_v12 }
 0x3c8   : > { %10476 = vmatprep.mubr.msk.f32.mxu1 %vm4594_vm0, %v5878_v9  ;;  %v14647_v9 = vld [vmem:[#allocation73_spill] sm:$0xff] }
 0x3cb   : > { %10477 = vmatmul.mubr.msk.f32.gmra.mrb[12].mxu1 %vm4594_vm0, %v13125_v1 }
 0x3cc   : > { %10479 = vmatprep.mubr.msk.f32.mxu1 %vm4594_vm0, %v5880_v4  ;;  %v14648_v4 = vld [vmem:[#allocation31_spill] sm:$0xff] }
 0x3cd   : > { %vm14649_vm6 = vnez %v14648_v4 }
 0x3cf   : > { %10480 = vmatmul.mubr.msk.f32.gmra.mrb[14].mxu1 %vm4594_vm0, %v13135_v8 }
 0x3d0   : > { %10482 = vmatprep.mubr.msk.f32.mxu1 %vm4594_vm0, %v5882_v22  ;;  %v5892_v22 = vsel %vm14649_vm6, %v14647_v9, 0.0  ;;  %v14662_v9 = vld [vmem:[#allocation8_spill] sm:$0xff] }
 0x3d3   : > { %10483 = vmatmul.mubr.msk.f32.gmra.mrb[16].mxu1 %vm4594_vm0, %v13145_v39 }
 0x3d4   : > { %10485 = vmatprep.mubr.msk.f32.mxu1 %vm4594_vm0, %v5884_v61  ;;  %v14650_v61 = vld [vmem:[#allocation37_spill] sm:$0xff] }
 0x3d7   : > { %10486 = vmatmul.mubr.msk.f32.gmra.mrb[18].mxu1 %vm4594_vm0, %v13155_v40 }
 0x3d8   : > { %10488 = vmatprep.mubr.msk.f32.mxu1 %vm4594_vm0, %v5886_v62  ;;  %v14651_v62 = vld [vmem:[#allocation4_spill] sm:$0xff] }
 0x3db   : > { %10489 = vmatmul.mubr.msk.f32.gmra.mrb[20].mxu1 %vm4594_vm0, %v13165_v23 }
 0x3dc   : > { %10491 = vmatprep.mubr.msk.f32.mxu1 %vm4594_vm0, %v5888_v13  ;;  %v14652_v13 = vld [vmem:[#allocation32_spill] sm:$0xff] }
 0x3dd   : > { %vm14653_vm9 = vnez %v14652_v13  ;;  %v9060_v13 = vld [vmem:[%s14019_s3 + $0xb0] sm:$0xff] }
 0x3de   : > { %v5894_v33 = vsel %vm14653_vm9, %v14651_v62, 0.0  ;;  %v14660_v62 = vld [vmem:[#allocation6_spill] sm:$0xff]  ;;  %vm14690_vm9 = vnez %v14535_v59 }
 0x3df   : > { %10492 = vmatmul.mubr.msk.f32.gmra.mrb[22].mxu1 %vm4594_vm0, %v13175_v54 }
 0x3e0   : > { %10494 = vmatprep.mubr.msk.f32.mxu1 %vm4594_vm0, %v5890_v30  ;;  %v14655_v30 = vld [vmem:[#allocation39_spill] sm:$0xff] }
 0x3e3   : > { %10495 = vmatmul.mubr.msk.f32.gmra.mrb[24].mxu1 %vm4594_vm0, %v14646_v47  ;;  %v14656_v47 = vld [vmem:[#allocation33_spill] sm:$0xff] }
 0x3e4   : > { %10497 = vmatprep.mubr.msk.f32.mxu1 %vm4594_vm0, %v5892_v22  ;;  %vm14657_vm10 = vnez %v14656_v47  ;;  %v13486_v22 = vld [vmem:[#allocation2 + $0x108] sm:$0xff] }
 0x3e5   : > { %v5896_v4 = vsel %vm14657_vm10, %v13478_v19, 0.0  ;;  %14658 = vst [vmem:[#allocation64_spill] sm:$0xff] %v13486_v22  ;;  %v9095_v19 = vld [vmem:[%s14019_s3 + $0xc8] sm:$0xff]  ;;  %vm14689_vm10 = vnez %v14532_v16 }
 0x3e7   : > { %10498 = vmatmul.mubr.msk.f32.gmra.mrb[26].mxu1 %vm4594_vm0, %v14650_v61  ;;  %v14661_v61 = vld [vmem:[#allocation7_spill] sm:$0xff] }
 0x3e8   : > { %10500 = vmatprep.mubr.msk.f32.mxu1 %vm4594_vm0, %v5894_v33  ;;  %v9061_v33 = vld [vmem:[%s14019_s3 + $0xb8] sm:$0xff] }
 0x3e9   : > { %v10841_v47 = vpack.c.bf16 %v9061_v33, %v9060_v13  ;;  %v14663_v13 = vld [vmem:[#allocation9_spill] sm:$0xff]  ;;  %v14665_v33 = vld [vmem:[#allocation11_spill] sm:$0xff] }
 0x3eb   : > { %10501 = vmatmul.mubr.msk.f32.gmra.mrb[28].mxu1 %vm4594_vm0, %v14655_v30  ;;  %v14659_v30 = vld [vmem:[#allocation5_spill] sm:$0xff] }
 0x3ec   : > { %10503 = vmatprep.mubr.msk.f32.mxu1 %vm4594_vm0, %v5896_v4  ;;  %v9094_v4 = vld [vmem:[%s14019_s3 + $0xc0] sm:$0xff]  ;;  %v14748_v7 = vld [vmem:[#allocation64_spill] sm:$0xff] }
 0x3ef   : > { %10504 = vmatmul.mubr.msk.f32.gmra.mrb[30].mxu1 %vm4594_vm0, %v13486_v22  ;;  %v10845_v22 = vpack.c.bf16 %v9095_v19, %v9094_v4  ;;  %v14668_v19 = vld [vmem:[#allocation14_spill] sm:$0xff] }
 0x3f0   : > { %10514 = vmatprep.mubr.msk.f32.mxu1 %vm4594_vm0, %v14659_v30  ;;  %v14664_v30 = vld [vmem:[#allocation10_spill] sm:$0xff] }
 0x3f1   : > { %v14672_v4 = vld [vmem:[#allocation18_spill] sm:$0xff] }
 0x3f3   : > { %10515 = vmatmul.mubr.msk.f32.vlgmr.msra.gmra.mrb[0].mxu1 %vm4594_vm0, %v14660_v62  ;;  %v14671_v62 = vld [vmem:[#allocation17_spill] sm:$0xff] }
 0x3f4   : > { %10840 = vmatpush3.bf16.msra.mxu1 %v10837_v11  ;;  %10517 = vmatprep.mubr.msk.f32.mxu1 %vm4594_vm0, %v14661_v61  ;;  %v14666_v11 = vld [vmem:[#allocation12_spill] sm:$0xff]  ;;  %v14667_v61 = vld [vmem:[#allocation13_spill] sm:$0xff] }
 0x3f5   : > { %10842 = vmatprep.subr.bf16.mxu1 %v10841_v47 }
 0x3f7   : > { %10518 = vmatmul.mubr.msk.f32.gmra.mrb[2].mxu1 %vm4594_vm0, %v14662_v9  ;;  %v14669_v9 = vld [vmem:[#allocation15_spill] sm:$0xff] }
 0x3f8   : > { %10520 = vmatprep.mubr.msk.f32.mxu1 %vm4594_vm0, %v14663_v13  ;;  %10844 = vmatpush3.bf16.msra.mxu1 %v10841_v47  ;;  %v14670_v47 = vld [vmem:[#allocation16_spill] sm:$0xff]  ;;  %v14673_v13 = vld [vmem:[#allocation19_spill] sm:$0xff] }
 0x3f9   : > { %10846 = vmatprep.subr.bf16.mxu1 %v10845_v22 }
 0x3fb   : > { %10521 = vmatmul.mubr.msk.f32.gmra.mrb[4].mxu1 %vm4594_vm0, %v14664_v30  ;;  %v14674_v30 = vld [vmem:[#allocation20_spill] sm:$0xff] }
 0x3fc   : > { %10523 = vmatprep.mubr.msk.f32.mxu1 %vm4594_vm0, %v14665_v33  ;;  %v14675_v33 = vld [vmem:[#allocation21_spill] sm:$0xff] }
 0x3ff   : > { %10524 = vmatmul.mubr.msk.f32.gmra.mrb[6].mxu1 %vm4594_vm0, %v14666_v11  ;;  %v14676_v11 = vld [vmem:[#allocation22_spill] sm:$0xff] }
 0x400   : > { %10526 = vmatprep.mubr.msk.f32.mxu1 %vm4594_vm0, %v14667_v61  ;;  %v14677_v61 = vld [vmem:[#allocation23_spill] sm:$0xff] }
 0x403   : > { %10527 = vmatmul.mubr.msk.f32.gmra.mrb[8].mxu1 %vm4594_vm0, %v14668_v19  ;;  %v14678_v19 = vld [vmem:[#allocation24_spill] sm:$0xff] }
 0x404   : > { %10529 = vmatprep.mubr.msk.f32.mxu1 %vm4594_vm0, %v14669_v9  ;;  %v14679_v9 = vld [vmem:[#allocation25_spill] sm:$0xff] }
 0x407   : > { %10530 = vmatmul.mubr.msk.f32.gmra.mrb[10].mxu1 %vm4594_vm0, %v14670_v47  ;;  %v14680_v47 = vld [vmem:[#allocation26_spill] sm:$0xff] }
 0x408   : > { %10532 = vmatprep.mubr.msk.f32.mxu1 %vm4594_vm0, %v14671_v62  ;;  %v14681_v62 = vld [vmem:[#allocation27_spill] sm:$0xff] }
 0x40b   : > { %10533 = vmatmul.mubr.msk.f32.gmra.mrb[12].mxu1 %vm4594_vm0, %v14672_v4  ;;  %v14682_v4 = vld [vmem:[#allocation28_spill] sm:$0xff] }
 0x40c   : > { %10535 = vmatprep.mubr.msk.f32.mxu1 %vm4594_vm0, %v14673_v13  ;;  %v14683_v13 = vld [vmem:[#allocation36_spill] sm:$0xff] }
 0x40f   : > { %10536 = vmatmul.mubr.msk.f32.gmra.mrb[14].mxu1 %vm4594_vm0, %v14674_v30  ;;  %v14684_v30 = vld [vmem:[#allocation57_spill] sm:$0xff] }
 0x410   : > { %10538 = vmatprep.mubr.msk.f32.mxu1 %vm4594_vm0, %v14675_v33  ;;  %v14685_v33 = vld [vmem:[#allocation63_spill] sm:$0xff] }
 0x413   : > { %10539 = vmatmul.mubr.msk.f32.gmra.mrb[16].mxu1 %vm4594_vm0, %v14676_v11  ;;  %v14686_v11 = vld [vmem:[#allocation66_spill] sm:$0xff] }
 0x414   : > { %10541 = vmatprep.mubr.msk.f32.mxu1 %vm4594_vm0, %v14677_v61  ;;  %v14687_v61 = vld [vmem:[#allocation67_spill] sm:$0xff] }
 0x417   : > { %10542 = vmatmul.mubr.msk.f32.gmra.mrb[18].mxu1 %vm4594_vm0, %v14678_v19  ;;  %v14688_v19 = vld [vmem:[#allocation69_spill] sm:$0xff] }
 0x418   : > { %10544 = vmatprep.mubr.msk.f32.mxu1 %vm4594_vm0, %v14679_v9  ;;  %v13562_v9 = vld [vmem:[#allocation2 + $0x101] sm:$0xff] }
 0x41b   : > { %10545 = vmatmul.mubr.msk.f32.gmra.mrb[20].mxu1 %vm4594_vm0, %v14680_v47  ;;  %v13566_v47 = vld [vmem:[#allocation2 + $0x109] sm:$0xff] }
 0x41c   : > { %10547 = vmatprep.mubr.msk.f32.mxu1 %vm4594_vm0, %v14681_v62  ;;  %v9096_v62 = vld [vmem:[%s14019_s3 + $0xd0] sm:$0xff] }
 0x41f   : > { %10548 = vmatmul.mubr.msk.f32.gmra.mrb[22].mxu1 %vm4594_vm0, %v14682_v4  ;;  %v9097_v4 = vld [vmem:[%s14019_s3 + $0xd8] sm:$0xff] }
 0x420   : > { %10550 = vmatprep.mubr.msk.f32.mxu1 %vm4594_vm0, %v14683_v13  ;;  %v10849_v13 = vpack.c.bf16 %v9097_v4, %v9096_v62  ;;  %v14694_v62 = vld [vmem:[#allocation40_spill] sm:$0xff]  ;;  %v14695_v4 = vld [vmem:[#allocation41_spill] sm:$0xff] }
 0x421   : > { %vm14696_vm6 = vnez %v14695_v4  ;;  %v14703_v4 = vld [vmem:[#allocation43_spill] sm:$0xff] }
 0x423   : > { %10551 = vmatmul.mubr.msk.f32.gmra.mrb[24].mxu1 %vm4594_vm0, %v14684_v30  ;;  %v6679_v30 = vsel %vm14689_vm10, %v13225_v32, 0.0  ;;  %v6681_v32 = vsel %vm14690_vm9, %v13238_v24, 0.0 }
 0x424   : > { %10553 = vmatprep.mubr.msk.f32.mxu1 %vm4594_vm0, %v14685_v33  ;;  %v9130_v33 = vld [vmem:[%s14019_s3 + $0xe0] sm:$0xff] }
 0x427   : > { %10554 = vmatmul.mubr.msk.f32.gmra.mrb[26].mxu1 %vm4594_vm0, %v14686_v11  ;;  %v9131_v11 = vld [vmem:[%s14019_s3 + $0xe8] sm:$0xff] }
 0x428   : > { %10556 = vmatprep.mubr.msk.f32.mxu1 %vm4594_vm0, %v14687_v61  ;;  %v14691_v61 = vld [vmem:[#allocation34_spill] sm:$0xff] }
 0x42b   : > { %10557 = vmatmul.mubr.msk.f32.gmra.mrb[28].mxu1 %vm4594_vm0, %v14688_v19  ;;  %v14692_v19 = vld [vmem:[#allocation38_spill] sm:$0xff] }
 0x42c   : > { %10559 = vmatprep.mubr.msk.f32.mxu1 %vm4594_vm0, %v13562_v9  ;;  %vm14693_vm10 = vnez %v14692_v19 }
 0x42f   : > { %10560 = vmatmul.mubr.msk.f32.gmra.mrb[30].mxu1 %vm4594_vm0, %v13566_v47 }
 0x430   : > { %10570 = vmatprep.mubr.msk.f32.mxu1 %vm4594_vm0, %v13223_v29  ;;  %v10853_v29 = vpack.c.bf16 %v9131_v11, %v9130_v33  ;;  %v14697_v33 = vld [vmem:[#allocation42_spill] sm:$0xff] }
 0x433   : > { %10571 = vmatmul.mubr.msk.f32.vlgmr.msra.gmra.mrb[0].mxu1 %vm4594_vm0, %v6679_v30  ;;  %v6685_v30 = vsel %vm14696_vm6, %v13259_v25, 0.0 }
 0x434   : > { %10848 = vmatpush3.bf16.msra.mxu1 %v10845_v22  ;;  %10573 = vmatprep.mubr.msk.f32.mxu1 %vm4594_vm0, %v13236_v20  ;;  %v6683_v22 = vsel %vm14693_vm10, %v13249_v17, 0.0 }
 0x435   : > { %10850 = vmatprep.subr.bf16.mxu1 %v10849_v13 }
 0x437   : > { %10574 = vmatmul.mubr.msk.f32.gmra.mrb[2].mxu1 %vm4594_vm0, %v6681_v32  ;;  %v14700_v32 = vld [vmem:[#allocation35_spill] sm:$0xff] }
 0x438   : > { %10576 = vmatprep.mubr.msk.f32.mxu1 %vm4594_vm0, %v14691_v61  ;;  %10852 = vmatpush3.bf16.msra.mxu1 %v10849_v13  ;;  %v14698_v13 = vld [vmem:[#allocation44_spill] sm:$0xff] }
 0x439   : > { %10854 = vmatprep.subr.bf16.mxu1 %v10853_v29  ;;  %vm14699_vm9 = vnez %v14698_v13  ;;  %v14705_v13 = vld [vmem:[#allocation45_spill] sm:$0xff] }
 0x43a   : > { %v6687_v11 = vsel %vm14699_vm9, %v13269_v41, 0.0 }
 0x43b   : > { %10577 = vmatmul.mubr.msk.f32.gmra.mrb[4].mxu1 %vm4594_vm0, %v6683_v22  ;;  %v14701_v22 = vld [vmem:[#allocation47_spill] sm:$0xff] }
 0x43c   : > { %10579 = vmatprep.mubr.msk.f32.mxu1 %vm4594_vm0, %v14694_v62  ;;  %vm14702_vm10 = vnez %v14701_v22  ;;  %v14708_v22 = vld [vmem:[#allocation46_spill] sm:$0xff] }
 0x43d   : > { %v6689_v19 = vsel %vm14702_vm10, %v13279_v56, 0.0 }
 0x43f   : > { %10580 = vmatmul.mubr.msk.f32.gmra.mrb[6].mxu1 %vm4594_vm0, %v6685_v30  ;;  %v14711_v30 = vld [vmem:[#allocation48_spill] sm:$0xff] }
 0x440   : > { %10582 = vmatprep.mubr.msk.f32.mxu1 %vm4594_vm0, %v14697_v33  ;;  %v6691_v33 = vsel %vm14624_vm2, %v13289_v36, 0.0 }
 0x443   : > { %10583 = vmatmul.mubr.msk.f32.gmra.mrb[8].mxu1 %vm4594_vm0, %v6687_v11  ;;  %v14706_v11 = vld [vmem:[#allocation53_spill] sm:$0xff] }
 0x444   : > { %10585 = vmatprep.mubr.msk.f32.mxu1 %vm4594_vm0, %v14700_v32  ;;  %vm14707_vm9 = vnez %v14706_v11  ;;  %v14713_v11 = vld [vmem:[#allocation49_spill] sm:$0xff] }
 0x445   : > { %v6693_v32 = vsel %vm14707_vm9, %v13299_v10, 0.0 }
 0x447   : > { %10586 = vmatmul.mubr.msk.f32.gmra.mrb[10].mxu1 %vm4594_vm0, %v6689_v19  ;;  %v14709_v19 = vld [vmem:[#allocation56_spill] sm:$0xff] }
 0x448   : > { %10588 = vmatprep.mubr.msk.f32.mxu1 %vm4594_vm0, %v14703_v4  ;;  %vm14710_vm10 = vnez %v14709_v19  ;;  %v14716_v19 = vld [vmem:[#allocation51_spill] sm:$0xff] }
 0x449   : > { %v6695_v4 = vsel %vm14710_vm10, %v13309_v58, 0.0 }
 0x44b   : > { %10589 = vmatmul.mubr.msk.f32.gmra.mrb[12].mxu1 %vm4594_vm0, %v6691_v33  ;;  %v14718_v33 = vld [vmem:[#allocation52_spill] sm:$0xff] }
 0x44c   : > { %10591 = vmatprep.mubr.msk.f32.mxu1 %vm4594_vm0, %v14705_v13  ;;  %v6697_v13 = vsel %vm14629_vm12, %v13319_v34, 0.0 }
 0x44f   : > { %10592 = vmatmul.mubr.msk.f32.gmra.mrb[14].mxu1 %vm4594_vm0, %v6693_v32  ;;  %v14714_v32 = vld [vmem:[#allocation62_spill] sm:$0xff] }
 0x450   : > { %10594 = vmatprep.mubr.msk.f32.mxu1 %vm4594_vm0, %v14708_v22  ;;  %vm14715_vm9 = vnez %v14714_v32  ;;  %v6705_v32 = vsel %vm14570_vm15, %v13359_v52, 0.0 }
 0x451   : > { %v6699_v22 = vsel %vm14715_vm9, %v13329_v49, 0.0 }
 0x453   : > { %10595 = vmatmul.mubr.msk.f32.gmra.mrb[16].mxu1 %vm4594_vm0, %v6695_v4  ;;  %v14722_v4 = vld [vmem:[#allocation58_spill] sm:$0xff] }
 0x454   : > { %10597 = vmatprep.mubr.msk.f32.mxu1 %vm4594_vm0, %v14711_v30  ;;  %v6701_v30 = vsel %vm14510_vm14, %v13339_v21, 0.0  ;;  %vm4631_vm14 = vcmask 254976  }
 0x457   : > { %10598 = vmatmul.mubr.msk.f32.gmra.mrb[18].mxu1 %vm4594_vm0, %v6697_v13  ;;  %v14719_v13 = vld [vmem:[#allocation68_spill] sm:$0xff] }
 0x458   : > { %10600 = vmatprep.mubr.msk.f32.mxu1 %vm4594_vm0, %v14713_v11  ;;  %vm14720_vm12 = vnez %v14719_v13 }
 0x459   : > { %v6703_v11 = vsel %vm14720_vm12, %v13349_v5, 0.0  ;;  %v14725_v5 = vmov 0.0  }
 0x45a   : > { %4632 = vst.msk [vmem:[#allocation2 + $0x120] sm:$0x3] %vm4631_vm14, %v14725_v5  ;;  %v9133_v5 = vld [vmem:[%s14019_s3 + $0xf8] sm:$0xff]  ;;  %vm14732_vm14 = vnez %v14333_v53 }
 0x45b   : > { %10601 = vmatmul.mubr.msk.f32.gmra.mrb[20].mxu1 %vm4594_vm0, %v6699_v22 }
 0x45c   : > { %10603 = vmatprep.mubr.msk.f32.mxu1 %vm4594_vm0, %v14716_v19 }
 0x45f   : > { %10604 = vmatmul.mubr.msk.f32.gmra.mrb[22].mxu1 %vm4594_vm0, %v6701_v30  ;;  %v14723_v30 = vld [vmem:[#allocation60_spill] sm:$0xff] }
 0x460   : > { %10606 = vmatprep.mubr.msk.f32.mxu1 %vm4594_vm0, %v14718_v33  ;;  %v6707_v13 = vsel %vm14638_vm11, %v14723_v30, 0.0  ;;  %v9132_v33 = vld [vmem:[%s14019_s3 + $0xf0] sm:$0xff] }
 0x463   : > { %10607 = vmatmul.mubr.msk.f32.gmra.mrb[24].mxu1 %vm4594_vm0, %v6703_v11  ;;  %v13673_v11 = vld [vmem:[#allocation2 + $0x102] sm:$0xff] }
 0x464   : > { %10609 = vmatprep.mubr.msk.f32.mxu1 %vm4594_vm0, %v13357_v35  ;;  %14726 = vst [vmem:[#allocation5_spill] sm:$0xff] %v13673_v11  ;;  %v13675_v35 = vld [vmem:[#allocation2 + $0x10a] sm:$0xff] }
 0x465   : > { %14727 = vst [vmem:[#allocation6_spill] sm:$0xff] %v13675_v35  ;;  %v6709_v22 = vsel %vm14572_vm13, %v13675_v35, 0.0  ;;  %v9167_v35 = vld [vmem:[%s14019_s3 + $0x108] sm:$0xff] }
 0x467   : > { %10610 = vmatmul.mubr.msk.f32.gmra.mrb[26].mxu1 %vm4594_vm0, %v6705_v32  ;;  %v9166_v32 = vld [vmem:[%s14019_s3 + $0x100] sm:$0xff] }
 0x468   : > { %10612 = vmatprep.mubr.msk.f32.mxu1 %vm4594_vm0, %v14722_v4  ;;  %v10861_v38 = vpack.c.bf16 %v9167_v35, %v9166_v32  ;;  %v7497_v32 = vld [vmem:[#allocation2 + $0x59] sm:$0xff] }
 0x46b   : > { %10613 = vmatmul.mubr.msk.f32.gmra.mrb[28].mxu1 %vm4594_vm0, %v6707_v13  ;;  %v7100_v13 = vsel %vm14602_vm1, %v13060_v14, 0.0  ;;  %vm14733_vm1 = vnez %v14339_v42  ;;  %v14740_v42 = vld [vmem:[#allocation37_spill] sm:$0xff]  ;;  %v7490_v14 = vld [vmem:[#allocation2 + $0x21] sm:$0xff] }
 0x46c   : > { %10615 = vmatprep.mubr.msk.f32.mxu1 %vm4594_vm0, %v13673_v11  ;;  %v10857_v11 = vpack.c.bf16 %v9133_v5, %v9132_v33  ;;  %v7104_v5 = vsel %vm11662_vm4, %v13083_v46, 0.0  ;;  %vm14730_vm4 = vnez %v14329_v28  ;;  %v7116_v28 = vsel %vm14642_vm7, %v13143_v15, 0.0  ;;  %v14745_v15 = vld [vmem:[#allocation61_spill] sm:$0xff]  ;;  %v7491_v46 = vld [vmem:[#allocation2 + $0x29] sm:$0xff] }
 0x46d   : > { %v7110_v35 = vsel %vm14730_vm4, %v13113_v0, 0.0  ;;  %v7120_v53 = vsel %vm14733_vm1, %v13163_v55, 0.0  ;;  %vm14735_vm7 = vnez %v14734_v2  ;;  %v14741_v55 = vld [vmem:[#allocation4_spill] sm:$0xff]  ;;  %v7510_v2 = vld [vmem:[#allocation2 + $0xc1] sm:$0xff]  ;;  %vm14752_vm1 = vnez %v14535_v59 }
 0x46e   : > { %v7495_v33 = vld [vmem:[#allocation2 + $0x49] sm:$0xff] }
 0x46f   : > { %10616 = vmatmul.mubr.msk.f32.gmra.mrb[30].mxu1 %vm4594_vm0, %v6709_v22  ;;  %v7102_v22 = vsel %vm11647_vm3, %v13072_v18, 0.0  ;;  %vm14729_vm3 = vnez %v14327_v63  ;;  %v7114_v63 = vsel %vm14732_vm14, %v13133_v51, 0.0  ;;  %v9169_v18 = vld [vmem:[%s14019_s3 + $0x118] sm:$0xff]  ;;  %vm14751_vm14 = vnez %v14532_v16  ;;  %v14755_v16 = vld [vmem:[#allocation42_spill] sm:$0xff]  ;;  %v14757_v59 = vld [vmem:[#allocation35_spill] sm:$0xff] }
 0x470   : > { %10626 = vmatprep.mubr.msk.f32.mxu1 %vm4594_vm0, %v7100_v13  ;;  %v7108_v50 = vsel %vm14729_vm3, %v13103_v3, 0.0  ;;  %v9168_v3 = vld [vmem:[%s14019_s3 + $0x110] sm:$0xff]  ;;  %v7498_v13 = vld [vmem:[#allocation2 + $0x61] sm:$0xff] }
 0x473   : > { %10627 = vmatmul.mubr.msk.f32.vlgmr.msra.gmra.mrb[0].mxu1 %vm4594_vm0, %v13075_v27  ;;  %v10865_v27 = vpack.c.bf16 %v9169_v18, %v9168_v3  ;;  %v14771_v3 = vld [vmem:[#allocation59_spill] sm:$0xff] }
 0x474   : > { %10856 = vmatpush3.bf16.msra.mxu1 %v10853_v29  ;;  %10629 = vmatprep.mubr.msk.f32.mxu1 %vm4594_vm0, %v7102_v22  ;;  %v7494_v29 = vld [vmem:[#allocation2 + $0x41] sm:$0xff]  ;;  %v7499_v22 = vld [vmem:[#allocation2 + $0x69] sm:$0xff] }
 0x475   : > { %10858 = vmatprep.subr.bf16.mxu1 %v10857_v11 }
 0x477   : > { %10630 = vmatmul.mubr.msk.f32.gmra.mrb[2].mxu1 %vm4594_vm0, %v13085_v6  ;;  %v7492_v6 = vld [vmem:[#allocation2 + $0x31] sm:$0xff] }
 0x478   : > { %10632 = vmatprep.mubr.msk.f32.mxu1 %vm4594_vm0, %v7104_v5  ;;  %10860 = vmatpush3.bf16.msra.mxu1 %v10857_v11  ;;  %v7496_v11 = vld [vmem:[#allocation2 + $0x51] sm:$0xff]  ;;  %v7501_v5 = vld [vmem:[#allocation2 + $0x79] sm:$0xff] }
 0x479   : > { %10862 = vmatprep.subr.bf16.mxu1 %v10861_v38 }
 0x47b   : > { %10633 = vmatmul.mubr.msk.f32.gmra.mrb[4].mxu1 %vm4594_vm0, %v13095_v60  ;;  %v7122_v60 = vsel %vm14735_vm7, %v13173_v45, 0.0  ;;  %v14744_v45 = vld [vmem:[#allocation39_spill] sm:$0xff] }
 0x47c   : > { %10635 = vmatprep.mubr.msk.f32.mxu1 %vm4594_vm0, %v7106_v44  ;;  %v7502_v44 = vld [vmem:[#allocation2 + $0x81] sm:$0xff] }
 0x47f   : > { %10636 = vmatmul.mubr.msk.f32.gmra.mrb[6].mxu1 %vm4594_vm0, %v13105_v26  ;;  %v7099_v26 = vld [vmem:[#allocation2 + $0x118] sm:$0xff] }
 0x480   : > { %10638 = vmatprep.mubr.msk.f32.mxu1 %vm4594_vm0, %v7108_v50  ;;  %v7503_v50 = vld [vmem:[#allocation2 + $0x89] sm:$0xff] }
 0x483   : > { %10639 = vmatmul.mubr.msk.f32.gmra.mrb[8].mxu1 %vm4594_vm0, %v13115_v12  ;;  %v14749_v12 = vld [vmem:[#allocation33_spill] sm:$0xff] }
 0x484   : > { %10641 = vmatprep.mubr.msk.f32.mxu1 %vm4594_vm0, %v7110_v35  ;;  %vm14750_vm5 = vnez %v14749_v12  ;;  %v7504_v35 = vld [vmem:[#allocation2 + $0x91] sm:$0xff] }
 0x487   : > { %10642 = vmatmul.mubr.msk.f32.gmra.mrb[10].mxu1 %vm4594_vm0, %v13125_v1  ;;  %v7098_v1 = vld [vmem:[#allocation2 + $0x110] sm:$0xff] }
 0x488   : > { %10644 = vmatprep.mubr.msk.f32.mxu1 %vm4594_vm0, %v7112_v57  ;;  %v7130_v0 = vsel %vm14750_vm5, %v7098_v1, 0.0  ;;  %v7505_v57 = vld [vmem:[#allocation2 + $0x99] sm:$0xff]  ;;  %v7925_v1 = vsel %vm14624_vm2, %v13299_v10, 0.0  ;;  %vm14772_vm2 = vnez %v14771_v3 }
 0x489   : > { %v14770_v10 = vld [vmem:[#allocation49_spill] sm:$0xff]  ;;  %v7931_v18 = vsel %vm14772_vm2, %v13329_v49, 0.0  ;;  %v14778_v49 = vld [vmem:[#allocation55_spill] sm:$0xff] }
 0x48b   : > { %10645 = vmatmul.mubr.msk.f32.gmra.mrb[12].mxu1 %vm4594_vm0, %v13135_v8  ;;  %v14746_v8 = vld [vmem:[#allocation32_spill] sm:$0xff] }
 0x48c   : > { %10647 = vmatprep.mubr.msk.f32.mxu1 %vm4594_vm0, %v7114_v63  ;;  %vm14747_vm4 = vnez %v14746_v8  ;;  %v7506_v63 = vld [vmem:[#allocation2 + $0xa1] sm:$0xff] }
 0x48d   : > { %v7128_v51 = vsel %vm14747_vm4, %v14745_v15, 0.0  ;;  %v14761_v15 = vld [vmem:[#allocation47_spill] sm:$0xff] }
 0x48f   : > { %10648 = vmatmul.mubr.msk.f32.gmra.mrb[14].mxu1 %vm4594_vm0, %v13145_v39 }
 0x490   : > { %10650 = vmatprep.mubr.msk.f32.mxu1 %vm4594_vm0, %v7116_v28  ;;  %v7507_v28 = vld [vmem:[#allocation2 + $0xa9] sm:$0xff] }
 0x493   : > { %10651 = vmatmul.mubr.msk.f32.gmra.mrb[16].mxu1 %vm4594_vm0, %v13155_v40  ;;  %v14737_v40 = vld [vmem:[#allocation73_spill] sm:$0xff] }
 0x494   : > { %10653 = vmatprep.mubr.msk.f32.mxu1 %vm4594_vm0, %v7118_v43  ;;  %v7508_v43 = vld [vmem:[#allocation2 + $0xb1] sm:$0xff] }
 0x497   : > { %10654 = vmatmul.mubr.msk.f32.gmra.mrb[18].mxu1 %vm4594_vm0, %v13165_v23  ;;  %v14738_v23 = vld [vmem:[#allocation30_spill] sm:$0xff] }
 0x498   : > { %10656 = vmatprep.mubr.msk.f32.mxu1 %vm4594_vm0, %v7120_v53  ;;  %vm14739_vm8 = vnez %v14738_v23  ;;  %v7509_v53 = vld [vmem:[#allocation2 + $0xb9] sm:$0xff]  ;;  %v7514_v23 = vld [vmem:[#allocation2 + $0xe1] sm:$0xff] }
 0x499   : > { %v7124_v37 = vsel %vm14739_vm8, %v14737_v40, 0.0  ;;  %v7513_v40 = vld [vmem:[#allocation2 + $0xd9] sm:$0xff] }
 0x49b   : > { %10657 = vmatmul.mubr.msk.f32.gmra.mrb[20].mxu1 %vm4594_vm0, %v13175_v54  ;;  %v14742_v54 = vld [vmem:[#allocation31_spill] sm:$0xff] }
 0x49c   : > { %10659 = vmatprep.mubr.msk.f32.mxu1 %vm4594_vm0, %v7122_v60  ;;  %vm14743_vm3 = vnez %v14742_v54  ;;  %v7511_v60 = vld [vmem:[#allocation2 + $0xc9] sm:$0xff]  ;;  %v7520_v54 = vld [vmem:[#allocation2 + $0x111] sm:$0xff] }
 0x49d   : > { %v7126_v39 = vsel %vm14743_vm3, %v14741_v55, 0.0  ;;  %v7517_v55 = vld [vmem:[#allocation2 + $0xf9] sm:$0xff]  ;;  %vm14762_vm3 = vnez %v14761_v15 }
 0x49e   : > { %v7923_v8 = vsel %vm14762_vm3, %v13289_v36, 0.0  ;;  %v14768_v36 = vld [vmem:[#allocation48_spill] sm:$0xff] }
 0x49f   : > { %10660 = vmatmul.mubr.msk.f32.gmra.mrb[22].mxu1 %vm4594_vm0, %v14736_v48  ;;  %v7512_v48 = vld [vmem:[#allocation2 + $0xd1] sm:$0xff] }
 0x4a0   : > { %10662 = vmatprep.mubr.msk.f32.mxu1 %vm4594_vm0, %v7124_v37  ;;  %v7515_v37 = vld [vmem:[#allocation2 + $0xe9] sm:$0xff] }
 0x4a3   : > { %10663 = vmatmul.mubr.msk.f32.gmra.mrb[24].mxu1 %vm4594_vm0, %v14740_v42  ;;  %v7516_v42 = vld [vmem:[#allocation2 + $0xf1] sm:$0xff] }
 0x4a4   : > { %10665 = vmatprep.mubr.msk.f32.mxu1 %vm4594_vm0, %v7126_v39  ;;  %v7521_v39 = vld [vmem:[#allocation2 + $0x119] sm:$0xff] }
 0x4a7   : > { %10666 = vmatmul.mubr.msk.f32.gmra.mrb[26].mxu1 %vm4594_vm0, %v14744_v45  ;;  %v7913_v45 = vsel %vm14751_vm14, %v13238_v24, 0.0 }
 0x4a8   : > { %10668 = vmatprep.mubr.msk.f32.mxu1 %vm4594_vm0, %v7128_v51 }
 0x4ab   : > { %10669 = vmatmul.mubr.msk.f32.gmra.mrb[28].mxu1 %vm4594_vm0, %v14748_v7  ;;  %v14766_v7 = vld [vmem:[#allocation53_spill] sm:$0xff] }
 0x4ac   : > { %10671 = vmatprep.mubr.msk.f32.mxu1 %vm4594_vm0, %v7130_v0 }
 0x4af   : > { %10672 = vmatmul.mubr.msk.f32.gmra.mrb[30].mxu1 %vm4594_vm0, %v7099_v26  ;;  %v7929_v26 = vsel %vm14710_vm10, %v13319_v34, 0.0  ;;  %v14774_v34 = vld [vmem:[#allocation52_spill] sm:$0xff] }
 0x4b0   : > { %10682 = vmatprep.mubr.msk.f32.mxu1 %vm4594_vm0, %v7490_v14  ;;  %v7933_v14 = vsel %vm14715_vm9, %v13339_v21, 0.0  ;;  %vm11409_vm9 = vmmov 0  }
 0x4b3   : > { %10683 = vmatmul.mubr.msk.f32.vlgmr.msra.gmra.mrb[0].mxu1 %vm4594_vm0, %v7491_v46  ;;  %v14776_v46 = vld [vmem:[#allocation65_spill] sm:$0xff] }
 0x4b4   : > { %10864 = vmatpush3.bf16.msra.mxu1 %v10861_v38  ;;  %10685 = vmatprep.mubr.msk.f32.mxu1 %vm4594_vm0, %v7492_v6  ;;  %v7500_v38 = vld [vmem:[#allocation2 + $0x71] sm:$0xff]  ;;  %vm14777_vm10 = vnez %v14776_v46 }
 0x4b5   : > { %10866 = vmatprep.subr.bf16.mxu1 %v10865_v27 }
 0x4b7   : > { %10686 = vmatmul.mubr.msk.f32.gmra.mrb[2].mxu1 %vm4594_vm0, %v7493_v31  ;;  %v7937_v31 = vsel %vm14720_vm12, %v13359_v52, 0.0 }
 0x4b8   : > { %10688 = vmatprep.mubr.msk.f32.mxu1 %vm4594_vm0, %v7494_v29  ;;  %10868 = vmatpush3.bf16.msra.mxu1 %v10865_v27  ;;  %v14775_v27 = vld [vmem:[#allocation54_spill] sm:$0xff]  ;;  %v7939_v29 = vsel %vm14570_vm15, %v14723_v30, 0.0  ;;  %v11408_v30 = vmov 0.0|0.0   ;;  %vm8521_vm15 = vcmask 188416  }
 0x4b9   : > { %v7935_v6 = vsel %vm14777_vm10, %v14775_v27, 0.0  ;;  %10869 = vmatprep.subr.bf16.mxu0 %v11408_v30 }
 0x4bb   : > { %10689 = vmatmul.mubr.msk.f32.gmra.mrb[4].mxu1 %vm4594_vm0, %v7495_v33  ;;  %v14781_v33 = vld [vmem:[#allocation5_spill] sm:$0xff] }
 0x4bc   : > { %10691 = vmatprep.mubr.msk.f32.mxu1 %vm4594_vm0, %v7496_v11  ;;  %v7910_v11 = vld [vmem:[#allocation2 + $0x112] sm:$0xff] }
 0x4bf   : > { %10692 = vmatmul.mubr.msk.f32.gmra.mrb[6].mxu1 %vm4594_vm0, %v7497_v32  ;;  %v7911_v32 = vld [vmem:[#allocation2 + $0x11a] sm:$0xff] }
 0x4c0   : > { %10694 = vmatprep.mubr.msk.f32.mxu1 %vm4594_vm0, %v7498_v13  ;;  %v14782_v13 = vld [vmem:[#allocation6_spill] sm:$0xff] }
 0x4c1   : > { %v7941_v52 = vsel %vm14638_vm11, %v14782_v13, 0.0 }
 0x4c3   : > { %10695 = vmatmul.mubr.msk.f32.gmra.mrb[8].mxu1 %vm4594_vm0, %v7499_v22 }
 0x4c4   : > { %10697 = vmatprep.mubr.msk.f32.mxu1 %vm4594_vm0, %v7500_v38  ;;  %v7943_v38 = vsel %vm14572_vm13, %v7911_v32, 0.0 }
 0x4c7   : > { %10698 = vmatmul.mubr.msk.f32.gmra.mrb[10].mxu1 %vm4594_vm0, %v7501_v5  ;;  %v8443_v5 = vld [vmem:[%s14021_s5] sm:$0xff] }
 0x4c8   : > { %10700 = vmatprep.mubr.msk.f32.mxu1 %vm4594_vm0, %v7502_v44  ;;  %v8444_v44 = vld [vmem:[%s14021_s5 + $0x8] sm:$0xff] }
 0x4cb   : > { %10701 = vmatmul.mubr.msk.f32.gmra.mrb[12].mxu1 %vm4594_vm0, %v7503_v50  ;;  %v10870_v50 = vpack.c.bf16 %v8444_v44, %v8443_v5 }
 0x4cc   : > { %10703 = vmatprep.mubr.msk.f32.mxu1 %vm4594_vm0, %v7504_v35  ;;  %v8445_v35 = vld [vmem:[%s14021_s5 + $0x10] sm:$0xff] }
 0x4cd   : > { %10871 = vmatpush3.bf16.msra.mxu0 %v10870_v50 }
 0x4ce   : > { %10872 = vmatprep.subr.bf16.mxu0 %v11408_v30 }
 0x4cf   : > { %10704 = vmatmul.mubr.msk.f32.gmra.mrb[14].mxu1 %vm4594_vm0, %v7505_v57  ;;  %v8446_v57 = vld [vmem:[%s14021_s5 + $0x18] sm:$0xff] }
 0x4d0   : > { %10706 = vmatprep.mubr.msk.f32.mxu1 %vm4594_vm0, %v7506_v63  ;;  %v10873_v63 = vpack.c.bf16 %v8446_v57, %v8445_v35 }
 0x4d2   : > { %10874 = vmatpush3.bf16.msra.mxu0 %v10873_v63 }
 0x4d3   : > { %10707 = vmatmul.mubr.msk.f32.gmra.mrb[16].mxu1 %vm4594_vm0, %v7507_v28  ;;  %v14785_v28 = vmov 0.0  }
 0x4d4   : > { %10709 = vmatprep.mubr.msk.f32.mxu1 %vm4594_vm0, %v7508_v43  ;;  %10794 = vmatprep.mubr.msk.f32.mxu0 %vm11409_vm9, %v14785_v28  ;;  %v13939_v43 = vld [vmem:[%s14020_s4] ss:$0 sm:$0xff] }
 0x4d7   : > { %10710 = vmatmul.mubr.msk.f32.gmra.mrb[18].mxu1 %vm4594_vm0, %v7509_v53 }
 0x4d8   : > { %10712 = vmatprep.mubr.msk.f32.mxu1 %vm4594_vm0, %v7510_v2 }
 0x4db   : > { %10713 = vmatmul.mubr.msk.f32.gmra.mrb[20].mxu1 %vm4594_vm0, %v7511_v60 }
 0x4dc   : > { %10715 = vmatprep.mubr.msk.f32.mxu1 %vm4594_vm0, %v7512_v48 }
 0x4df   : > { %10716 = vmatmul.mubr.msk.f32.gmra.mrb[22].mxu1 %vm4594_vm0, %v7513_v40 }
 0x4e0   : > { %10718 = vmatprep.mubr.msk.f32.mxu1 %vm4594_vm0, %v7514_v23 }
 0x4e3   : > { %10719 = vmatmul.mubr.msk.f32.gmra.mrb[24].mxu1 %vm4594_vm0, %v7515_v37 }
 0x4e4   : > { %10721 = vmatprep.mubr.msk.f32.mxu1 %vm4594_vm0, %v7516_v42 }
 0x4e7   : > { %10722 = vmatmul.mubr.msk.f32.gmra.mrb[26].mxu1 %vm4594_vm0, %v7517_v55 }
 0x4e8   : > { %10724 = vmatprep.mubr.msk.f32.mxu1 %vm4594_vm0, %v13562_v9  ;;  %v7915_v9 = vsel %vm14752_vm1, %v13249_v17, 0.0  ;;  %v14758_v17 = vld [vmem:[#allocation44_spill] sm:$0xff] }
 0x4e9   : > { %vm14759_vm8 = vnez %v14758_v17 }
 0x4eb   : > { %10725 = vmatmul.mubr.msk.f32.gmra.mrb[28].mxu1 %vm4594_vm0, %v13566_v47 }
 0x4ec   : > { %10727 = vmatprep.mubr.msk.f32.mxu1 %vm4594_vm0, %v7520_v54 }
 0x4ef   : > { %10728 = vmatmul.mubr.msk.f32.gmra.mrb[30].mxu1 %vm4594_vm0, %v7521_v39 }
 0x4f0   : > { %10738 = vmatprep.mubr.msk.f32.mxu1 %vm4594_vm0, %v13236_v20  ;;  %v14753_v20 = vld [vmem:[#allocation38_spill] sm:$0xff] }
 0x4f1   : > { %vm14754_vm7 = vnez %v14753_v20 }
 0x4f2   : > { %v7917_v47 = vsel %vm14754_vm7, %v13259_v25, 0.0  ;;  %v14760_v25 = vld [vmem:[#allocation43_spill] sm:$0xff] }
 0x4f3   : > { %10739 = vmatmul.mubr.msk.f32.vlgmr.msra.gmra.mrb[0].mxu1 %vm4594_vm0, %v7913_v45 }
 0x4f4   : > { %10741 = vmatprep.mubr.msk.f32.mxu1 %vm4594_vm0, %v14691_v61  ;;  %v7919_v61 = vsel %vm14696_vm6, %v13269_v41, 0.0  ;;  %v14763_v41 = vld [vmem:[#allocation45_spill] sm:$0xff]  ;;  %vm14767_vm6 = vnez %v14766_v7 }
 0x4f5   : > { %v7927_v12 = vsel %vm14767_vm6, %v13309_v58, 0.0 }
 0x4f7   : > { %10742 = vmatmul.mubr.msk.f32.gmra.mrb[2].mxu1 %vm4594_vm0, %v7915_v9 }
 0x4f8   : > { %10744 = vmatprep.mubr.msk.f32.mxu1 %vm4594_vm0, %v14694_v62  ;;  %v7921_v62 = vsel %vm14759_vm8, %v13279_v56, 0.0  ;;  %v14765_v56 = vld [vmem:[#allocation46_spill] sm:$0xff] }
 0x4fb   : > { %10745 = vmatmul.mubr.msk.f32.gmra.mrb[4].mxu1 %vm4594_vm0, %v7917_v47 }
 0x4fc   : > { %10747 = vmatprep.mubr.msk.f32.mxu1 %vm4594_vm0, %v14755_v16 }
 0x4ff   : > { %10748 = vmatmul.mubr.msk.f32.gmra.mrb[6].mxu1 %vm4594_vm0, %v7919_v61 }
 0x500   : > { %10750 = vmatprep.mubr.msk.f32.mxu1 %vm4594_vm0, %v14757_v59 }
 0x503   : > { %10751 = vmatmul.mubr.msk.f32.gmra.mrb[8].mxu1 %vm4594_vm0, %v7921_v62 }
 0x504   : > { %10753 = vmatprep.mubr.msk.f32.mxu1 %vm4594_vm0, %v14760_v25 }
 0x507   : > { %10754 = vmatmul.mubr.msk.f32.gmra.mrb[10].mxu1 %vm4594_vm0, %v7923_v8 }
 0x508   : > { %10756 = vmatprep.mubr.msk.f32.mxu1 %vm4594_vm0, %v14763_v41 }
 0x50b   : > { %10757 = vmatmul.mubr.msk.f32.gmra.mrb[12].mxu1 %vm4594_vm0, %v7925_v1 }
 0x50c   : > { %10759 = vmatprep.mubr.msk.f32.mxu1 %vm4594_vm0, %v14765_v56 }
 0x50f   : > { %10760 = vmatmul.mubr.msk.f32.gmra.mrb[14].mxu1 %vm4594_vm0, %v7927_v12 }
 0x510   : > { %10762 = vmatprep.mubr.msk.f32.mxu1 %vm4594_vm0, %v14768_v36 }
 0x513   : > { %10763 = vmatmul.mubr.msk.f32.gmra.mrb[16].mxu1 %vm4594_vm0, %v7929_v26 }
 0x514   : > { %10765 = vmatprep.mubr.msk.f32.mxu1 %vm4594_vm0, %v14770_v10 }
 0x517   : > { %10766 = vmatmul.mubr.msk.f32.gmra.mrb[18].mxu1 %vm4594_vm0, %v7931_v18 }
 0x518   : > { %10768 = vmatprep.mubr.msk.f32.mxu1 %vm4594_vm0, %v14716_v19 }
 0x51b   : > { %10769 = vmatmul.mubr.msk.f32.gmra.mrb[20].mxu1 %vm4594_vm0, %v7933_v14 }
 0x51c   : > { %10771 = vmatprep.mubr.msk.f32.mxu1 %vm4594_vm0, %v14774_v34 }
 0x51f   : > { %10772 = vmatmul.mubr.msk.f32.gmra.mrb[22].mxu1 %vm4594_vm0, %v7935_v6 }
 0x520   : > { %10774 = vmatprep.mubr.msk.f32.mxu1 %vm4594_vm0, %v14778_v49 }
 0x523   : > { %10775 = vmatmul.mubr.msk.f32.gmra.mrb[24].mxu1 %vm4594_vm0, %v7937_v31 }
 0x524   : > { %10777 = vmatprep.mubr.msk.f32.mxu1 %vm4594_vm0, %v14722_v4 }
 0x527   : > { %10778 = vmatmul.mubr.msk.f32.gmra.mrb[26].mxu1 %vm4594_vm0, %v7939_v29 }
 0x528   : > { %10780 = vmatprep.mubr.msk.f32.mxu1 %vm4594_vm0, %v14781_v33 }
 0x52b   : > { %10781 = vmatmul.mubr.msk.f32.gmra.mrb[28].mxu1 %vm4594_vm0, %v7941_v52 }
 0x52c   : > { %10783 = vmatprep.mubr.msk.f32.mxu1 %vm4594_vm0, %v7910_v11 }
 0x52f   : > { %10784 = vmatmul.mubr.msk.f32.gmra.mrb[30].mxu1 %vm4594_vm0, %v7943_v38 }
 0x5c6   : > { %v10740_v53 = vpop.f32.mrb[0].mxu1 }
 0x5c7   : > { %v8310_v2 = vadd.f32 %v10740_v53, %v13939_v43  ;;  %v8111_v60 = vpop.f32.mrb[1].mxu1 }
 0x5c8   : > { %v8309_v48 = vadd.f32 %v13939_v43, %v8111_v60 }
 0x5c9   : > { %v8342_v40 = vmax.f32 %v8310_v2, 0.0 }
 0x5ca   : > { %v8341_v23 = vmax.f32 %v8309_v48, 0.0  ;;  %v10743_v37 = vpop.f32.mrb[2].mxu1 }
 0x5cb   : > { %v8374_v42 = vsel %vm4594_vm0, %v8342_v40, 0.0  ;;  %v8312_v55 = vadd.f32 %v10743_v37, %v13939_v43  ;;  %v8121_v54 = vpop.f32.mrb[3].mxu1 }
 0x5cc   : > { %v8373_v39 = vsel %vm4594_vm0, %v8341_v23, 0.0  ;;  %v8311_v45 = vadd.f32 %v13939_v43, %v8121_v54 }
 0x5cd   : > { %v8375_v9 = vadd.f32 %v8374_v42, %v8373_v39  ;;  %v8344_v20 = vmax.f32 %v8312_v55, 0.0 }
 0x5ce   : > { %v8343_v47 = vmax.f32 %v8311_v45, 0.0  ;;  %v10746_v16 = vpop.f32.mrb[4].mxu1 }
 0x5cf   : > { %v8314_v24 = vadd.f32 %v10746_v16, %v13939_v43  ;;  %v8131_v61 = vpop.f32.mrb[5].mxu1  ;;  %v8378_v25 = vsel %vm4594_vm0, %v8344_v20, 0.0 }
 0x5d0   : > { %v8376_v59 = vsel %vm4594_vm0, %v8343_v47, 0.0  ;;  %v8313_v17 = vadd.f32 %v13939_v43, %v8131_v61 }
 0x5d1   : > { %v8377_v62 = vadd.f32 %v8376_v59, %v8375_v9  ;;  %v8346_v15 = vmax.f32 %v8314_v24, 0.0 }
 0x5d2   : > { %v8345_v8 = vmax.f32 %v8313_v17, 0.0  ;;  %v10749_v41 = vpop.f32.mrb[6].mxu1 }
 0x5d3   : > { %v8379_v51 = vadd.f32 %v8378_v25, %v8377_v62  ;;  %v8316_v1 = vadd.f32 %v10749_v41, %v13939_v43  ;;  %v8141_v56 = vpop.f32.mrb[7].mxu1  ;;  %v8382_v0 = vsel %vm4594_vm0, %v8346_v15, 0.0 }
 0x5d4   : > { %v8380_v7 = vsel %vm4594_vm0, %v8345_v8, 0.0  ;;  %v8315_v12 = vadd.f32 %v13939_v43, %v8141_v56 }
 0x5d5   : > { %v8381_v36 = vadd.f32 %v8380_v7, %v8379_v51  ;;  %v8348_v26 = vmax.f32 %v8316_v1, 0.0 }
 0x5d6   : > { %v8347_v10 = vmax.f32 %v8315_v12, 0.0  ;;  %v10752_v3 = vpop.f32.mrb[8].mxu1 }
 0x5d7   : > { %v8383_v18 = vadd.f32 %v8382_v0, %v8381_v36  ;;  %v8318_v58 = vadd.f32 %v10752_v3, %v13939_v43  ;;  %v8151_v14 = vpop.f32.mrb[9].mxu1  ;;  %v8386_v6 = vsel %vm4594_vm0, %v8348_v26, 0.0 }
 0x5d8   : > { %v8384_v34 = vsel %vm4594_vm0, %v8347_v10, 0.0  ;;  %v8317_v27 = vadd.f32 %v13939_v43, %v8151_v14 }
 0x5d9   : > { %v8385_v46 = vadd.f32 %v8384_v34, %v8383_v18  ;;  %v8350_v49 = vmax.f32 %v8318_v58, 0.0 }
 0x5da   : > { %v8349_v19 = vmax.f32 %v8317_v27, 0.0  ;;  %v10755_v31 = vpop.f32.mrb[10].mxu1 }
 0x5db   : > { %v8387_v21 = vadd.f32 %v8386_v6, %v8385_v46  ;;  %v8320_v29 = vadd.f32 %v10755_v31, %v13939_v43  ;;  %v8161_v33 = vpop.f32.mrb[11].mxu1  ;;  %v8390_v22 = vsel %vm4594_vm0, %v8350_v49, 0.0 }
 0x5dc   : > { %v8388_v11 = vsel %vm4594_vm0, %v8349_v19, 0.0  ;;  %v8319_v32 = vadd.f32 %v13939_v43, %v8161_v33 }
 0x5dd   : > { %v8389_v13 = vadd.f32 %v8388_v11, %v8387_v21  ;;  %v8352_v52 = vmax.f32 %v8320_v29, 0.0 }
 0x5de   : > { %v8351_v4 = vmax.f32 %v8319_v32, 0.0  ;;  %v10758_v38 = vpop.f32.mrb[12].mxu1 }
 0x5df   : > { %v8391_v30 = vadd.f32 %v8390_v22, %v8389_v13  ;;  %v8322_v5 = vadd.f32 %v10758_v38, %v13939_v43  ;;  %v8171_v44 = vpop.f32.mrb[13].mxu1  ;;  %v8394_v63 = vsel %vm4594_vm0, %v8352_v52, 0.0 }
 0x5e0   : > { %v8392_v50 = vsel %vm4594_vm0, %v8351_v4, 0.0  ;;  %v8321_v35 = vadd.f32 %v13939_v43, %v8171_v44 }
 0x5e1   : > { %v8393_v57 = vadd.f32 %v8392_v50, %v8391_v30  ;;  %v8354_v28 = vmax.f32 %v8322_v5, 0.0 }
 0x5e2   : > { %v8353_v53 = vmax.f32 %v8321_v35, 0.0  ;;  %v10761_v2 = vpop.f32.mrb[14].mxu1 }
 0x5e3   : > { %v8395_v60 = vadd.f32 %v8394_v63, %v8393_v57  ;;  %v8324_v48 = vadd.f32 %v10761_v2, %v13939_v43  ;;  %v8181_v40 = vpop.f32.mrb[15].mxu1  ;;  %v8398_v55 = vsel %vm4594_vm0, %v8354_v28, 0.0 }
 0x5e4   : > { %v8396_v23 = vsel %vm4594_vm0, %v8353_v53, 0.0  ;;  %v8323_v37 = vadd.f32 %v13939_v43, %v8181_v40 }
 0x5e5   : > { %v8397_v42 = vadd.f32 %v8396_v23, %v8395_v60  ;;  %v8356_v54 = vmax.f32 %v8324_v48, 0.0 }
 0x5e6   : > { %v8355_v39 = vmax.f32 %v8323_v37, 0.0  ;;  %v10764_v45 = vpop.f32.mrb[16].mxu1 }
 0x5e7   : > { %v8399_v9 = vadd.f32 %v8398_v55, %v8397_v42  ;;  %v8326_v20 = vadd.f32 %v10764_v45, %v13939_v43  ;;  %v8191_v47 = vpop.f32.mrb[17].mxu1  ;;  %v8402_v59 = vsel %vm4594_vm0, %v8356_v54, 0.0 }
 0x5e8   : > { %v8400_v16 = vsel %vm4594_vm0, %v8355_v39, 0.0  ;;  %v8325_v24 = vadd.f32 %v13939_v43, %v8191_v47 }
 0x5e9   : > { %v8401_v61 = vadd.f32 %v8400_v16, %v8399_v9  ;;  %v8358_v17 = vmax.f32 %v8326_v20, 0.0 }
 0x5ea   : > { %v8357_v62 = vmax.f32 %v8325_v24, 0.0  ;;  %v10767_v25 = vpop.f32.mrb[18].mxu1 }
 0x5eb   : > { %v8403_v15 = vadd.f32 %v8402_v59, %v8401_v61  ;;  %v8328_v8 = vadd.f32 %v10767_v25, %v13939_v43  ;;  %v8201_v41 = vpop.f32.mrb[19].mxu1  ;;  %v8406_v7 = vsel %vm4594_vm0, %v8358_v17, 0.0 }
 0x5ec   : > { %v8404_v51 = vsel %vm4594_vm0, %v8357_v62, 0.0  ;;  %v8327_v1 = vadd.f32 %v13939_v43, %v8201_v41 }
 0x5ed   : > { %v8405_v56 = vadd.f32 %v8404_v51, %v8403_v15  ;;  %v8360_v12 = vmax.f32 %v8328_v8, 0.0 }
 0x5ee   : > { %v8359_v36 = vmax.f32 %v8327_v1, 0.0  ;;  %v10770_v0 = vpop.f32.mrb[20].mxu1 }
 0x5ef   : > { %v8407_v26 = vadd.f32 %v8406_v7, %v8405_v56  ;;  %v8330_v10 = vadd.f32 %v10770_v0, %v13939_v43  ;;  %v8211_v3 = vpop.f32.mrb[21].mxu1  ;;  %v8410_v34 = vsel %vm4594_vm0, %v8360_v12, 0.0 }
 0x5f0   : > { %v8408_v18 = vsel %vm4594_vm0, %v8359_v36, 0.0  ;;  %v8329_v58 = vadd.f32 %v13939_v43, %v8211_v3 }
 0x5f1   : > { %v8409_v14 = vadd.f32 %v8408_v18, %v8407_v26  ;;  %v8362_v27 = vmax.f32 %v8330_v10, 0.0 }
 0x5f2   : > { %v8361_v46 = vmax.f32 %v8329_v58, 0.0  ;;  %v10773_v6 = vpop.f32.mrb[22].mxu1 }
 0x5f3   : > { %v8411_v49 = vadd.f32 %v8410_v34, %v8409_v14  ;;  %v8332_v19 = vadd.f32 %v10773_v6, %v13939_v43  ;;  %v8221_v31 = vpop.f32.mrb[23].mxu1  ;;  %v8414_v11 = vsel %vm4594_vm0, %v8362_v27, 0.0  ;;  %v8447_v27 = vld [vmem:[%s14022_s6] sm:$0x1] }
 0x5f4   : > { %v8412_v21 = vsel %vm4594_vm0, %v8361_v46, 0.0  ;;  %v8331_v29 = vadd.f32 %v13939_v43, %v8221_v31 }
 0x5f5   : > { %v8413_v33 = vadd.f32 %v8412_v21, %v8411_v49  ;;  %v8364_v32 = vmax.f32 %v8332_v19, 0.0 }
 0x5f6   : > { %v8363_v13 = vmax.f32 %v8331_v29, 0.0  ;;  %v10776_v22 = vpop.f32.mrb[24].mxu1 }
 0x5f7   : > { %v8415_v52 = vadd.f32 %v8414_v11, %v8413_v33  ;;  %v8334_v4 = vadd.f32 %v10776_v22, %v13939_v43  ;;  %v8231_v38 = vpop.f32.mrb[25].mxu1  ;;  %v8418_v50 = vsel %vm4594_vm0, %v8364_v32, 0.0 }
 0x5f8   : > { %v8416_v30 = vsel %vm4594_vm0, %v8363_v13, 0.0  ;;  %v8333_v5 = vadd.f32 %v13939_v43, %v8231_v38 }
 0x5f9   : > { %v8417_v44 = vadd.f32 %v8416_v30, %v8415_v52  ;;  %v8366_v35 = vmax.f32 %v8334_v4, 0.0 }
 0x5fa   : > { %v8365_v57 = vmax.f32 %v8333_v5, 0.0  ;;  %v10779_v63 = vpop.f32.mrb[26].mxu1 }
 0x5fb   : > { %v8419_v28 = vadd.f32 %v8418_v50, %v8417_v44  ;;  %v8336_v53 = vadd.f32 %v10779_v63, %v13939_v43  ;;  %v8241_v2 = vpop.f32.mrb[27].mxu1  ;;  %v8422_v23 = vsel %vm4594_vm0, %v8366_v35, 0.0 }
 0x5fc   : > { %v8420_v60 = vsel %vm4594_vm0, %v8365_v57, 0.0  ;;  %v8335_v48 = vadd.f32 %v13939_v43, %v8241_v2 }
 0x5fd   : > { %v8421_v40 = vadd.f32 %v8420_v60, %v8419_v28  ;;  %v8368_v37 = vmax.f32 %v8336_v53, 0.0 }
 0x5fe   : > { %v8367_v42 = vmax.f32 %v8335_v48, 0.0  ;;  %v10782_v55 = vpop.f32.mrb[28].mxu1 }
 0x5ff   : > { %v8423_v54 = vadd.f32 %v8422_v23, %v8421_v40  ;;  %v8338_v39 = vadd.f32 %v10782_v55, %v13939_v43  ;;  %v8251_v45 = vpop.f32.mrb[29].mxu1  ;;  %v8426_v16 = vsel %vm4594_vm0, %v8368_v37, 0.0 }
 0x600   : > { %v8424_v9 = vsel %vm4594_vm0, %v8367_v42, 0.0  ;;  %v8337_v20 = vadd.f32 %v13939_v43, %v8251_v45 }
 0x601   : > { %v8425_v47 = vadd.f32 %v8424_v9, %v8423_v54  ;;  %v8370_v24 = vmax.f32 %v8338_v39, 0.0 }
 0x602   : > { %v8369_v61 = vmax.f32 %v8337_v20, 0.0  ;;  %v10785_v59 = vpop.f32.mrb[30].mxu1 }
 0x603   : > { %v8427_v17 = vadd.f32 %v8426_v16, %v8425_v47  ;;  %v8340_v62 = vadd.f32 %v10785_v59, %v13939_v43  ;;  %v8261_v25 = vpop.f32.mrb[31].mxu1  ;;  %v8430_v51 = vsel %vm4594_vm0, %v8370_v24, 0.0 }
 0x604   : > { %v8428_v15 = vsel %vm4594_vm0, %v8369_v61, 0.0  ;;  %v8339_v8 = vadd.f32 %v13939_v43, %v8261_v25 }
 0x605   : > { %v8429_v41 = vadd.f32 %v8428_v15, %v8427_v17  ;;  %v8372_v1 = vmax.f32 %v8340_v62, 0.0 }
 0x606   : > { %v8371_v56 = vmax.f32 %v8339_v8, 0.0 }
 0x607   : > { %v8431_v7 = vadd.f32 %v8430_v51, %v8429_v41  ;;  %v8434_v0 = vsel %vm4594_vm0, %v8372_v1, 0.0 }
 0x608   : > { %v8432_v12 = vsel %vm4594_vm0, %v8371_v56, 0.0 }
 0x609   : > { %v8433_v36 = vadd.f32 %v8432_v12, %v8431_v7 }
 0x60b   : > { %v8435_v26 = vadd.f32 %v8434_v0, %v8433_v36 }
 0x60d   : > { %v8436_v10 = vrot.slane %v8435_v26, 4 }
 0x60f   : > { %v8437_v3 = vadd.f32 %v8436_v10, %v8435_v26 }
 0x611   : > { %v8438_v18 = vrot.slane %v8437_v3, 2 }
 0x613   : > { %v8439_v58 = vadd.f32 %v8438_v18, %v8437_v3 }
 0x615   : > { %v8440_v14 = vrot.slane %v8439_v58, 1 }
 0x617   : > { %v8441_v34 = vadd.f32 %v8440_v14, %v8439_v58 }
 0x619   : > { %v8442_v43 = vmul.f32 0.00390625, %v8441_v34 }
 0x61b   : > { %10795 = vmatmul.mubr.msk.f32.vlgmr.msra.gmra.mrb[32].mxu0 %vm4594_vm0, %v8442_v43 }
 0x6ee   : > { %v8517_v46 = vpop.f32.mrb[32].mxu0 }
 0x6ef   : > { %v8518_v6 = vadd.f32 %v8517_v46, %v8447_v27  ;;  %v10796_v49 = vpop.f32.mrb[33].mxu0 }
 0x6f1   : > { %8522 = vst.msk [vmem:[%s274_s8] sm:$0x1] %vm8521_vm15, %v8518_v6 }
 0x6f2 PF: > { %s17_s24 = sadd.s32 1, %s11405_s24  }
 0x6f3   : > { %p14_p4 = scmp.ge.s32.totalorder %s17_s24, 4  }
 0x6f5   :  { %16 = sbr.rel (!%p14_p4) target bundleno = 1 (0x1), region = 94 }

</bundles_post_ra>
